<compile_context>
chip_gen: v5e
topology: v5e:2x2
jax: 0.10.0
libtpu: 0.0.40
codegen_flags: <defaults>
</compile_context>

<pallas_src>
import functools

import jax
import jax.numpy as jnp
from jax.experimental import pallas as pl
from jax.experimental.pallas import tpu as pltpu

N_EMBD = 384
BLOCK_SIZE = 256  # causal mask max length (T must be <= this)


def _mha_kernel(x_ref, wqkv_ref, wp_ref, bp_ref, mask_ref, o_ref,
                qkv_s, ctx_s, *, bb, seq_len, num_heads, head_size, tq):
    """Grid = (B // bb,). One (bb, T, C) block per step; heads fused inside."""
    H, hs = num_heads, head_size
    D = H * hs
    T = seq_len
    n_qt = T // tq

    # --- 1) Fused QKV projection, row-tiled, staged into bf16 VMEM scratch. ---
    for b in range(bb):
        for qt in range(n_qt):
            r = b * T + qt * tq
            xt = x_ref[b, qt * tq:(qt + 1) * tq, :]            # (tq, C) bf16
            # Split the N=3D matmul into q/k/v column groups to bound the live
            # f32 result tile to (tq, D).
            for part in range(3):
                qkv_s[r:r + tq, part * D:(part + 1) * D] = jnp.dot(
                    xt, wqkv_ref[:, part * D:(part + 1) * D],
                    preferred_element_type=jnp.float32).astype(jnp.bfloat16)

    # --- 2) Per (batch, head) attention with query-row tiling. -----------------
    # Softmax tiles (tq, T) stay f32 in-register; context tiles go straight to
    # the bf16 ctx scratch at their head column slot (no concat, no big lives).
    for b in range(bb):
        r0 = b * T
        for h in range(H):
            c_q = h * hs
            c_k = D + h * hs
            c_v = 2 * D + h * hs
            kh = qkv_s[r0:r0 + T, c_k:c_k + hs]                # (T, hs) bf16
            vh = qkv_s[r0:r0 + T, c_v:c_v + hs]                # (T, hs) bf16
            for qt in range(n_qt):
                q0 = qt * tq
                qh = qkv_s[r0 + q0:r0 + q0 + tq, c_q:c_q + hs]  # (tq, hs) bf16
                # q @ k^T via dot_general contracting hs (no explicit k.T);
                # 1/sqrt(hs) is already folded into the Q weights.
                s = jax.lax.dot_general(
                    qh, kh, (((1,), (1,)), ((), ())),
                    preferred_element_type=jnp.float32)         # (tq, T) f32
                s = s + mask_ref[q0:q0 + tq, :]                 # additive causal bias
                s = s - jnp.max(s, axis=-1, keepdims=True)
                e = jnp.exp(s)
                inv = pl.reciprocal(jnp.sum(e, axis=-1, keepdims=True), approx=True)
                p = (e * inv).astype(jnp.bfloat16)              # (tq, T) bf16
                ctx_s[r0 + q0:r0 + q0 + tq, c_q:c_q + hs] = jnp.dot(
                    p, vh, preferred_element_type=jnp.float32).astype(jnp.bfloat16)

    # --- 3) Output projection + bias, row-tiled, lane-dense (C = 384). --------
    for b in range(bb):
        for qt in range(n_qt):
            r = b * T + qt * tq
            o_ref[b, qt * tq:(qt + 1) * tq, :] = jnp.dot(
                ctx_s[r:r + tq, :], wp_ref[...],
                preferred_element_type=jnp.float32) + bp_ref[...]


def _pick_batch_block(B, T):
    """Bb*T rows per step (targets ~256 MXU rows) while keeping >=2 grid steps."""
    bb = max(1, min(B, max(1, 256 // max(T, 1))))
    while bb > 1 and (B % bb != 0 or (B // bb) < 2):
        bb -= 1
    return bb


def _pick_query_tile(T):
    if T <= 128:
        return T
    if T % 128 == 0:
        return 128
    if T % 64 == 0:
        return 64
    return T


def _vmem_budget_bytes(bb, T, C, D):
    xblk = bb * T * C * 2 * 2            # bf16 x block, double-buffered
    oblk = bb * T * C * 4 * 2            # f32 out block, double-buffered
    wts = (C * 3 * D + D * C) * 2 * 2 + C * 4 * 2
    msk = T * T * 4 * 2
    scr = bb * T * (3 * D + D) * 2       # bf16 scratch
    est = xblk + oblk + wts + msk + scr
    # generous headroom for compiler-internal scratch, capped under v7x's 64 MiB
    return int(min(max(2 * est + (8 << 20), 16 << 20), 48 << 20))


def multi_head_attention(x, wq, wk, wv, w_proj, b_proj, *, block_batch=None):
    """x: (B, T, C); wq/wk/wv: (H, C, hs); w_proj: (H, hs, C); b_proj: (1, C)."""
    B, T, C = x.shape
    H, _, hs = wq.shape
    D = H * hs
    assert C == N_EMBD and T <= BLOCK_SIZE

    bb = _pick_batch_block(B, T) if block_batch is None else block_batch
    assert B % bb == 0
    tq = _pick_query_tile(T)
    assert T % tq == 0

    scale = float(hs) ** -0.5
    # Fuse per-head weights into head-major (C, D) slabs; fold scale into Q.
    wq_f = (wq * scale).transpose(1, 0, 2).reshape(C, D)
    wk_f = wk.transpose(1, 0, 2).reshape(C, D)
    wv_f = wv.transpose(1, 0, 2).reshape(C, D)
    w_qkv = jnp.concatenate([wq_f, wk_f, wv_f], axis=-1).astype(jnp.bfloat16)  # (C, 3D)
    w_p = w_proj.reshape(D, C).astype(jnp.bfloat16)                            # (D, C)
    b_p = b_proj.astype(jnp.float32).reshape(1, C)                             # (1, C)

    # Precomputed additive causal bias: 0 on/below the diagonal, -1e30 above.
    row = jnp.arange(T)[:, None]
    col = jnp.arange(T)[None, :]
    mask_bias = jnp.where(col <= row, 0.0, -1e30).astype(jnp.float32)          # (T, T)

    x_bf16 = x.astype(jnp.bfloat16)   # halves the per-step input DMA

    kernel = functools.partial(_mha_kernel, bb=bb, seq_len=T, num_heads=H,
                               head_size=hs, tq=tq)

    return pl.pallas_call(
        kernel,
        out_shape=jax.ShapeDtypeStruct((B, T, C), jnp.float32),
        grid_spec=pltpu.PrefetchScalarGridSpec(
            num_scalar_prefetch=0,
            grid=(B // bb,),
            in_specs=[
                pl.BlockSpec((bb, T, C), lambda i: (i, 0, 0)),   # x (per-step batch block)
                pl.BlockSpec((C, 3 * D), lambda i: (0, 0)),      # fused qkv weight (resident)
                pl.BlockSpec((D, C), lambda i: (0, 0)),          # proj weight (resident)
                pl.BlockSpec((1, C), lambda i: (0, 0)),          # proj bias (resident)
                pl.BlockSpec((T, T), lambda i: (0, 0)),          # causal additive bias (resident)
            ],
            out_specs=pl.BlockSpec((bb, T, C), lambda i: (i, 0, 0)),
            scratch_shapes=[
                pltpu.VMEM((bb * T, 3 * D), jnp.bfloat16),       # staged QKV
                pltpu.VMEM((bb * T, D), jnp.bfloat16),           # staged per-head context
            ],
        ),
        compiler_params=pltpu.CompilerParams(
            dimension_semantics=("parallel",),
            vmem_limit_bytes=_vmem_budget_bytes(bb, T, C, D),
        ),
    )(x_bf16, w_qkv, w_p, b_p, mask_bias)


def _reference(x, wq, wk, wv, w_proj, b_proj):
    """Pure-JAX fp32 reference (eval-mode dropout = identity)."""
    B, T, C = x.shape
    H, _, hs = wq.shape
    outs = []
    mask = jnp.tril(jnp.ones((T, T), dtype=bool))
    for h in range(H):
        q = x @ wq[h]
        k = x @ wk[h]
        v = x @ wv[h]
        wei = (q @ jnp.swapaxes(k, -2, -1)) * (hs ** -0.5)
        wei = jnp.where(mask, wei, -jnp.inf)
        wei = jax.nn.softmax(wei, axis=-1)
        outs.append(wei @ v)
    cat = jnp.concatenate(outs, axis=-1)               # (B, T, H*hs)
    w_full = w_proj.reshape(H * hs, C)                 # concat order matches
    return cat @ w_full + b_proj[0]


if __name__ == "__main__":
    num_heads = 6
    head_size = 64          # 6 * 64 = 384 = n_embd
    B, T = 2, 16

    key = jax.random.PRNGKey(0)
    kx, kq, kk, kv, kp, kb = jax.random.split(key, 6)

    x = jax.random.normal(kx, (B, T, N_EMBD), dtype=jnp.float32)
    scale_in = 0.02
    wq = scale_in * jax.random.normal(kq, (num_heads, N_EMBD, head_size), jnp.float32)
    wk = scale_in * jax.random.normal(kk, (num_heads, N_EMBD, head_size), jnp.float32)
    wv = scale_in * jax.random.normal(kv, (num_heads, N_EMBD, head_size), jnp.float32)
    w_proj = scale_in * jax.random.normal(kp, (num_heads, head_size, N_EMBD), jnp.float32)
    b_proj = scale_in * jax.random.normal(kb, (1, N_EMBD), jnp.float32)

    out = multi_head_attention(x, wq, wk, wv, w_proj, b_proj)
    out = jax.block_until_ready(out)

    ref = _reference(x, wq, wk, wv, w_proj, b_proj)
    assert out.shape == (B, T, N_EMBD)
    # bf16 MXU operands + approx reciprocal => relaxed tolerance vs fp32 reference.
    assert jnp.allclose(out, ref, atol=2e-2, rtol=2e-2), "mismatch vs reference"

    print("KERNEL_OK")
</pallas_src>

<mosaic_0001>
module attributes {stable_mosaic.version = 11 : i64} {
  func.func @_mha_kernel(%arg0: i32, %arg1: memref<1x16x384xbf16, #tpu.memory_space<vmem>>, %arg2: memref<384x1152xbf16, #tpu.memory_space<vmem>>, %arg3: memref<384x384xbf16, #tpu.memory_space<vmem>>, %arg4: memref<1x384xf32, #tpu.memory_space<vmem>>, %arg5: memref<16x16xf32, #tpu.memory_space<vmem>>, %arg6: memref<1x16x384xf32, #tpu.memory_space<vmem>>, %arg7: memref<16x1152xbf16, #tpu.memory_space<vmem>>, %arg8: memref<16x384xbf16, #tpu.memory_space<vmem>>) attributes {dimension_semantics = [#tpu.dimension_semantics<parallel>], iteration_bounds = array<i64: 2>, scalar_prefetch = 0 : i64, scratch_operands = 2 : i64, tpu.core_type = #tpu.core_type<tc>, window_params = [{transform_indices = @transform_0, window_bounds = array<i64: 1, 16, 384>}, {pipeline_mode = #tpu.pipeline_mode<synchronous>, transform_indices = @transform_1, window_bounds = array<i64: 384, 1152>}, {pipeline_mode = #tpu.pipeline_mode<synchronous>, transform_indices = @transform_2, window_bounds = array<i64: 384, 384>}, {pipeline_mode = #tpu.pipeline_mode<synchronous>, transform_indices = @transform_3, window_bounds = array<i64: 1, 384>}, {pipeline_mode = #tpu.pipeline_mode<synchronous>, transform_indices = @transform_4, window_bounds = array<i64: 16, 16>}, {transform_indices = @transform_5, window_bounds = array<i64: 1, 16, 384>}]} {
    %c0 = arith.constant 0 : index
    %c0_0 = arith.constant 0 : index
    %c0_1 = arith.constant 0 : index
    %0 = vector.load %arg1[%c0, %c0_0, %c0_1] : memref<1x16x384xbf16, #tpu.memory_space<vmem>>, vector<1x16x384xbf16>
    %1 = vector.shape_cast %0 : vector<1x16x384xbf16> to vector<16x384xbf16>
    %c0_2 = arith.constant 0 : index
    %c0_3 = arith.constant 0 : index
    %2 = vector.load %arg2[%c0_2, %c0_3] : memref<384x1152xbf16, #tpu.memory_space<vmem>>, vector<384x384xbf16>
    %cst = arith.constant dense<0.000000e+00> : vector<16x384xf32>
    %3 = tpu.matmul %1, %2, %cst {dimension_numbers = #tpu.dot_dimension_numbers<[1], [0], [0], [1], [0, 0, 1, 1], [], []>} : vector<16x384xbf16>, vector<384x384xbf16>, vector<16x384xf32> -> vector<16x384xf32>
    %4 = arith.truncf %3 : vector<16x384xf32> to vector<16x384xbf16>
    %c0_4 = arith.constant 0 : index
    %c0_5 = arith.constant 0 : index
    %5 = vector.load %arg7[%c0_4, %c0_5] : memref<16x1152xbf16, #tpu.memory_space<vmem>>, vector<16x384xbf16>
    tpu.vector_store %arg7[%c0_4, %c0_5], %4 {strides = array<i32>} : memref<16x1152xbf16, #tpu.memory_space<vmem>>, vector<16x384xbf16>,
    %c0_6 = arith.constant 0 : index
    %c384 = arith.constant 384 : index
    %6 = vector.load %arg2[%c0_6, %c384] : memref<384x1152xbf16, #tpu.memory_space<vmem>>, vector<384x384xbf16>
    %cst_7 = arith.constant dense<0.000000e+00> : vector<16x384xf32>
    %7 = tpu.matmul %1, %6, %cst_7 {dimension_numbers = #tpu.dot_dimension_numbers<[1], [0], [0], [1], [0, 0, 1, 1], [], []>} : vector<16x384xbf16>, vector<384x384xbf16>, vector<16x384xf32> -> vector<16x384xf32>
    %8 = arith.truncf %7 : vector<16x384xf32> to vector<16x384xbf16>
    %c0_8 = arith.constant 0 : index
    %c384_9 = arith.constant 384 : index
    %9 = vector.load %arg7[%c0_8, %c384_9] : memref<16x1152xbf16, #tpu.memory_space<vmem>>, vector<16x384xbf16>
    tpu.vector_store %arg7[%c0_8, %c384_9], %8 {strides = array<i32>} : memref<16x1152xbf16, #tpu.memory_space<vmem>>, vector<16x384xbf16>,
    %c0_10 = arith.constant 0 : index
    %c768 = arith.constant 768 : index
    %10 = vector.load %arg2[%c0_10, %c768] : memref<384x1152xbf16, #tpu.memory_space<vmem>>, vector<384x384xbf16>
    %cst_11 = arith.constant dense<0.000000e+00> : vector<16x384xf32>
    %11 = tpu.matmul %1, %10, %cst_11 {dimension_numbers = #tpu.dot_dimension_numbers<[1], [0], [0], [1], [0, 0, 1, 1], [], []>} : vector<16x384xbf16>, vector<384x384xbf16>, vector<16x384xf32> -> vector<16x384xf32>
    %12 = arith.truncf %11 : vector<16x384xf32> to vector<16x384xbf16>
    %c0_12 = arith.constant 0 : index
    %c768_13 = arith.constant 768 : index
    %13 = vector.load %arg7[%c0_12, %c768_13] : memref<16x1152xbf16, #tpu.memory_space<vmem>>, vector<16x384xbf16>
    tpu.vector_store %arg7[%c0_12, %c768_13], %12 {strides = array<i32>} : memref<16x1152xbf16, #tpu.memory_space<vmem>>, vector<16x384xbf16>,
    %c0_14 = arith.constant 0 : index
    %c384_15 = arith.constant 384 : index
    %14 = vector.load %arg7[%c0_14, %c384_15] : memref<16x1152xbf16, #tpu.memory_space<vmem>>, vector<16x64xbf16>
    %c0_16 = arith.constant 0 : index
    %c768_17 = arith.constant 768 : index
    %15 = vector.load %arg7[%c0_16, %c768_17] : memref<16x1152xbf16, #tpu.memory_space<vmem>>, vector<16x64xbf16>
    %c0_18 = arith.constant 0 : index
    %c0_19 = arith.constant 0 : index
    %16 = vector.load %arg7[%c0_18, %c0_19] : memref<16x1152xbf16, #tpu.memory_space<vmem>>, vector<16x64xbf16>
    %cst_20 = arith.constant dense<0.000000e+00> : vector<16x16xf32>
    %17 = tpu.matmul %16, %14, %cst_20 {dimension_numbers = #tpu.dot_dimension_numbers<[1], [1], [0], [0], [0, 0, 1, 0], [], []>} : vector<16x64xbf16>, vector<16x64xbf16>, vector<16x16xf32> -> vector<16x16xf32>
    %c0_21 = arith.constant 0 : index
    %c0_22 = arith.constant 0 : index
    %18 = vector.load %arg5[%c0_21, %c0_22] : memref<16x16xf32, #tpu.memory_space<vmem>>, vector<16x16xf32>
    %19 = arith.addf %17, %18 : vector<16x16xf32>
    %cst_23 = arith.constant dense<0xFF800000> : vector<16xf32>
    %20 = vector.multi_reduction <maximumf>, %19, %cst_23 [1] : vector<16x16xf32> to vector<16xf32>
    %21 = vector.shape_cast %20 : vector<16xf32> to vector<16x1xf32>
    %22 = vector.broadcast %21 : vector<16x1xf32> to vector<16x16xf32>
    %23 = arith.subf %19, %22 : vector<16x16xf32>
    %24 = math.exp %23 : vector<16x16xf32>
    %cst_24 = arith.constant dense<0.000000e+00> : vector<16xf32>
    %25 = vector.multi_reduction <add>, %24, %cst_24 [1] : vector<16x16xf32> to vector<16xf32>
    %26 = vector.shape_cast %25 : vector<16xf32> to vector<16x1xf32>
    %27 = tpu.reciprocal %26 {approx = true} : vector<16x1xf32> -> vector<16x1xf32>
    %28 = vector.broadcast %27 : vector<16x1xf32> to vector<16x16xf32>
    %29 = arith.mulf %24, %28 : vector<16x16xf32>
    %30 = arith.truncf %29 : vector<16x16xf32> to vector<16x16xbf16>
    %cst_25 = arith.constant dense<0.000000e+00> : vector<16x64xf32>
    %31 = tpu.matmul %30, %15, %cst_25 {dimension_numbers = #tpu.dot_dimension_numbers<[1], [0], [0], [1], [0, 0, 1, 1], [], []>} : vector<16x16xbf16>, vector<16x64xbf16>, vector<16x64xf32> -> vector<16x64xf32>
    %32 = arith.truncf %31 : vector<16x64xf32> to vector<16x64xbf16>
    %c0_26 = arith.constant 0 : index
    %c0_27 = arith.constant 0 : index
    %33 = vector.load %arg8[%c0_26, %c0_27] : memref<16x384xbf16, #tpu.memory_space<vmem>>, vector<16x64xbf16>
    tpu.vector_store %arg8[%c0_26, %c0_27], %32 {strides = array<i32>} : memref<16x384xbf16, #tpu.memory_space<vmem>>, vector<16x64xbf16>,
    %c0_28 = arith.constant 0 : index
    %c448 = arith.constant 448 : index
    %34 = vector.load %arg7[%c0_28, %c448] : memref<16x1152xbf16, #tpu.memory_space<vmem>>, vector<16x64xbf16>
    %c0_29 = arith.constant 0 : index
    %c832 = arith.constant 832 : index
    %35 = vector.load %arg7[%c0_29, %c832] : memref<16x1152xbf16, #tpu.memory_space<vmem>>, vector<16x64xbf16>
    %c0_30 = arith.constant 0 : index
    %c64 = arith.constant 64 : index
    %36 = vector.load %arg7[%c0_30, %c64] : memref<16x1152xbf16, #tpu.memory_space<vmem>>, vector<16x64xbf16>
    %cst_31 = arith.constant dense<0.000000e+00> : vector<16x16xf32>
    %37 = tpu.matmul %36, %34, %cst_31 {dimension_numbers = #tpu.dot_dimension_numbers<[1], [1], [0], [0], [0, 0, 1, 0], [], []>} : vector<16x64xbf16>, vector<16x64xbf16>, vector<16x16xf32> -> vector<16x16xf32>
    %c0_32 = arith.constant 0 : index
    %c0_33 = arith.constant 0 : index
    %38 = vector.load %arg5[%c0_32, %c0_33] : memref<16x16xf32, #tpu.memory_space<vmem>>, vector<16x16xf32>
    %39 = arith.addf %37, %38 : vector<16x16xf32>
    %cst_34 = arith.constant dense<0xFF800000> : vector<16xf32>
    %40 = vector.multi_reduction <maximumf>, %39, %cst_34 [1] : vector<16x16xf32> to vector<16xf32>
    %41 = vector.shape_cast %40 : vector<16xf32> to vector<16x1xf32>
    %42 = vector.broadcast %41 : vector<16x1xf32> to vector<16x16xf32>
    %43 = arith.subf %39, %42 : vector<16x16xf32>
    %44 = math.exp %43 : vector<16x16xf32>
    %cst_35 = arith.constant dense<0.000000e+00> : vector<16xf32>
    %45 = vector.multi_reduction <add>, %44, %cst_35 [1] : vector<16x16xf32> to vector<16xf32>
    %46 = vector.shape_cast %45 : vector<16xf32> to vector<16x1xf32>
    %47 = tpu.reciprocal %46 {approx = true} : vector<16x1xf32> -> vector<16x1xf32>
    %48 = vector.broadcast %47 : vector<16x1xf32> to vector<16x16xf32>
    %49 = arith.mulf %44, %48 : vector<16x16xf32>
    %50 = arith.truncf %49 : vector<16x16xf32> to vector<16x16xbf16>
    %cst_36 = arith.constant dense<0.000000e+00> : vector<16x64xf32>
    %51 = tpu.matmul %50, %35, %cst_36 {dimension_numbers = #tpu.dot_dimension_numbers<[1], [0], [0], [1], [0, 0, 1, 1], [], []>} : vector<16x16xbf16>, vector<16x64xbf16>, vector<16x64xf32> -> vector<16x64xf32>
    %52 = arith.truncf %51 : vector<16x64xf32> to vector<16x64xbf16>
    %c0_37 = arith.constant 0 : index
    %c64_38 = arith.constant 64 : index
    %53 = vector.load %arg8[%c0_37, %c64_38] : memref<16x384xbf16, #tpu.memory_space<vmem>>, vector<16x64xbf16>
    tpu.vector_store %arg8[%c0_37, %c64_38], %52 {strides = array<i32>} : memref<16x384xbf16, #tpu.memory_space<vmem>>, vector<16x64xbf16>,
    %c0_39 = arith.constant 0 : index
    %c512 = arith.constant 512 : index
    %54 = vector.load %arg7[%c0_39, %c512] : memref<16x1152xbf16, #tpu.memory_space<vmem>>, vector<16x64xbf16>
    %c0_40 = arith.constant 0 : index
    %c896 = arith.constant 896 : index
    %55 = vector.load %arg7[%c0_40, %c896] : memref<16x1152xbf16, #tpu.memory_space<vmem>>, vector<16x64xbf16>
    %c0_41 = arith.constant 0 : index
    %c128 = arith.constant 128 : index
    %56 = vector.load %arg7[%c0_41, %c128] : memref<16x1152xbf16, #tpu.memory_space<vmem>>, vector<16x64xbf16>
    %cst_42 = arith.constant dense<0.000000e+00> : vector<16x16xf32>
    %57 = tpu.matmul %56, %54, %cst_42 {dimension_numbers = #tpu.dot_dimension_numbers<[1], [1], [0], [0], [0, 0, 1, 0], [], []>} : vector<16x64xbf16>, vector<16x64xbf16>, vector<16x16xf32> -> vector<16x16xf32>
    %c0_43 = arith.constant 0 : index
    %c0_44 = arith.constant 0 : index
    %58 = vector.load %arg5[%c0_43, %c0_44] : memref<16x16xf32, #tpu.memory_space<vmem>>, vector<16x16xf32>
    %59 = arith.addf %57, %58 : vector<16x16xf32>
    %cst_45 = arith.constant dense<0xFF800000> : vector<16xf32>
    %60 = vector.multi_reduction <maximumf>, %59, %cst_45 [1] : vector<16x16xf32> to vector<16xf32>
    %61 = vector.shape_cast %60 : vector<16xf32> to vector<16x1xf32>
    %62 = vector.broadcast %61 : vector<16x1xf32> to vector<16x16xf32>
    %63 = arith.subf %59, %62 : vector<16x16xf32>
    %64 = math.exp %63 : vector<16x16xf32>
    %cst_46 = arith.constant dense<0.000000e+00> : vector<16xf32>
    %65 = vector.multi_reduction <add>, %64, %cst_46 [1] : vector<16x16xf32> to vector<16xf32>
    %66 = vector.shape_cast %65 : vector<16xf32> to vector<16x1xf32>
    %67 = tpu.reciprocal %66 {approx = true} : vector<16x1xf32> -> vector<16x1xf32>
    %68 = vector.broadcast %67 : vector<16x1xf32> to vector<16x16xf32>
    %69 = arith.mulf %64, %68 : vector<16x16xf32>
    %70 = arith.truncf %69 : vector<16x16xf32> to vector<16x16xbf16>
    %cst_47 = arith.constant dense<0.000000e+00> : vector<16x64xf32>
    %71 = tpu.matmul %70, %55, %cst_47 {dimension_numbers = #tpu.dot_dimension_numbers<[1], [0], [0], [1], [0, 0, 1, 1], [], []>} : vector<16x16xbf16>, vector<16x64xbf16>, vector<16x64xf32> -> vector<16x64xf32>
    %72 = arith.truncf %71 : vector<16x64xf32> to vector<16x64xbf16>
    %c0_48 = arith.constant 0 : index
    %c128_49 = arith.constant 128 : index
    %73 = vector.load %arg8[%c0_48, %c128_49] : memref<16x384xbf16, #tpu.memory_space<vmem>>, vector<16x64xbf16>
    tpu.vector_store %arg8[%c0_48, %c128_49], %72 {strides = array<i32>} : memref<16x384xbf16, #tpu.memory_space<vmem>>, vector<16x64xbf16>,
    %c0_50 = arith.constant 0 : index
    %c576 = arith.constant 576 : index
    %74 = vector.load %arg7[%c0_50, %c576] : memref<16x1152xbf16, #tpu.memory_space<vmem>>, vector<16x64xbf16>
    %c0_51 = arith.constant 0 : index
    %c960 = arith.constant 960 : index
    %75 = vector.load %arg7[%c0_51, %c960] : memref<16x1152xbf16, #tpu.memory_space<vmem>>, vector<16x64xbf16>
    %c0_52 = arith.constant 0 : index
    %c192 = arith.constant 192 : index
    %76 = vector.load %arg7[%c0_52, %c192] : memref<16x1152xbf16, #tpu.memory_space<vmem>>, vector<16x64xbf16>
    %cst_53 = arith.constant dense<0.000000e+00> : vector<16x16xf32>
    %77 = tpu.matmul %76, %74, %cst_53 {dimension_numbers = #tpu.dot_dimension_numbers<[1], [1], [0], [0], [0, 0, 1, 0], [], []>} : vector<16x64xbf16>, vector<16x64xbf16>, vector<16x16xf32> -> vector<16x16xf32>
    %c0_54 = arith.constant 0 : index
    %c0_55 = arith.constant 0 : index
    %78 = vector.load %arg5[%c0_54, %c0_55] : memref<16x16xf32, #tpu.memory_space<vmem>>, vector<16x16xf32>
    %79 = arith.addf %77, %78 : vector<16x16xf32>
    %cst_56 = arith.constant dense<0xFF800000> : vector<16xf32>
    %80 = vector.multi_reduction <maximumf>, %79, %cst_56 [1] : vector<16x16xf32> to vector<16xf32>
    %81 = vector.shape_cast %80 : vector<16xf32> to vector<16x1xf32>
    %82 = vector.broadcast %81 : vector<16x1xf32> to vector<16x16xf32>
    %83 = arith.subf %79, %82 : vector<16x16xf32>
    %84 = math.exp %83 : vector<16x16xf32>
    %cst_57 = arith.constant dense<0.000000e+00> : vector<16xf32>
    %85 = vector.multi_reduction <add>, %84, %cst_57 [1] : vector<16x16xf32> to vector<16xf32>
    %86 = vector.shape_cast %85 : vector<16xf32> to vector<16x1xf32>
    %87 = tpu.reciprocal %86 {approx = true} : vector<16x1xf32> -> vector<16x1xf32>
    %88 = vector.broadcast %87 : vector<16x1xf32> to vector<16x16xf32>
    %89 = arith.mulf %84, %88 : vector<16x16xf32>
    %90 = arith.truncf %89 : vector<16x16xf32> to vector<16x16xbf16>
    %cst_58 = arith.constant dense<0.000000e+00> : vector<16x64xf32>
    %91 = tpu.matmul %90, %75, %cst_58 {dimension_numbers = #tpu.dot_dimension_numbers<[1], [0], [0], [1], [0, 0, 1, 1], [], []>} : vector<16x16xbf16>, vector<16x64xbf16>, vector<16x64xf32> -> vector<16x64xf32>
    %92 = arith.truncf %91 : vector<16x64xf32> to vector<16x64xbf16>
    %c0_59 = arith.constant 0 : index
    %c192_60 = arith.constant 192 : index
    %93 = vector.load %arg8[%c0_59, %c192_60] : memref<16x384xbf16, #tpu.memory_space<vmem>>, vector<16x64xbf16>
    tpu.vector_store %arg8[%c0_59, %c192_60], %92 {strides = array<i32>} : memref<16x384xbf16, #tpu.memory_space<vmem>>, vector<16x64xbf16>,
    %c0_61 = arith.constant 0 : index
    %c640 = arith.constant 640 : index
    %94 = vector.load %arg7[%c0_61, %c640] : memref<16x1152xbf16, #tpu.memory_space<vmem>>, vector<16x64xbf16>
    %c0_62 = arith.constant 0 : index
    %c1024 = arith.constant 1024 : index
    %95 = vector.load %arg7[%c0_62, %c1024] : memref<16x1152xbf16, #tpu.memory_space<vmem>>, vector<16x64xbf16>
    %c0_63 = arith.constant 0 : index
    %c256 = arith.constant 256 : index
    %96 = vector.load %arg7[%c0_63, %c256] : memref<16x1152xbf16, #tpu.memory_space<vmem>>, vector<16x64xbf16>
    %cst_64 = arith.constant dense<0.000000e+00> : vector<16x16xf32>
    %97 = tpu.matmul %96, %94, %cst_64 {dimension_numbers = #tpu.dot_dimension_numbers<[1], [1], [0], [0], [0, 0, 1, 0], [], []>} : vector<16x64xbf16>, vector<16x64xbf16>, vector<16x16xf32> -> vector<16x16xf32>
    %c0_65 = arith.constant 0 : index
    %c0_66 = arith.constant 0 : index
    %98 = vector.load %arg5[%c0_65, %c0_66] : memref<16x16xf32, #tpu.memory_space<vmem>>, vector<16x16xf32>
    %99 = arith.addf %97, %98 : vector<16x16xf32>
    %cst_67 = arith.constant dense<0xFF800000> : vector<16xf32>
    %100 = vector.multi_reduction <maximumf>, %99, %cst_67 [1] : vector<16x16xf32> to vector<16xf32>
    %101 = vector.shape_cast %100 : vector<16xf32> to vector<16x1xf32>
    %102 = vector.broadcast %101 : vector<16x1xf32> to vector<16x16xf32>
    %103 = arith.subf %99, %102 : vector<16x16xf32>
    %104 = math.exp %103 : vector<16x16xf32>
    %cst_68 = arith.constant dense<0.000000e+00> : vector<16xf32>
    %105 = vector.multi_reduction <add>, %104, %cst_68 [1] : vector<16x16xf32> to vector<16xf32>
    %106 = vector.shape_cast %105 : vector<16xf32> to vector<16x1xf32>
    %107 = tpu.reciprocal %106 {approx = true} : vector<16x1xf32> -> vector<16x1xf32>
    %108 = vector.broadcast %107 : vector<16x1xf32> to vector<16x16xf32>
    %109 = arith.mulf %104, %108 : vector<16x16xf32>
    %110 = arith.truncf %109 : vector<16x16xf32> to vector<16x16xbf16>
    %cst_69 = arith.constant dense<0.000000e+00> : vector<16x64xf32>
    %111 = tpu.matmul %110, %95, %cst_69 {dimension_numbers = #tpu.dot_dimension_numbers<[1], [0], [0], [1], [0, 0, 1, 1], [], []>} : vector<16x16xbf16>, vector<16x64xbf16>, vector<16x64xf32> -> vector<16x64xf32>
    %112 = arith.truncf %111 : vector<16x64xf32> to vector<16x64xbf16>
    %c0_70 = arith.constant 0 : index
    %c256_71 = arith.constant 256 : index
    %113 = vector.load %arg8[%c0_70, %c256_71] : memref<16x384xbf16, #tpu.memory_space<vmem>>, vector<16x64xbf16>
    tpu.vector_store %arg8[%c0_70, %c256_71], %112 {strides = array<i32>} : memref<16x384xbf16, #tpu.memory_space<vmem>>, vector<16x64xbf16>,
    %c0_72 = arith.constant 0 : index
    %c704 = arith.constant 704 : index
    %114 = vector.load %arg7[%c0_72, %c704] : memref<16x1152xbf16, #tpu.memory_space<vmem>>, vector<16x64xbf16>
    %c0_73 = arith.constant 0 : index
    %c1088 = arith.constant 1088 : index
    %115 = vector.load %arg7[%c0_73, %c1088] : memref<16x1152xbf16, #tpu.memory_space<vmem>>, vector<16x64xbf16>
    %c0_74 = arith.constant 0 : index
    %c320 = arith.constant 320 : index
    %116 = vector.load %arg7[%c0_74, %c320] : memref<16x1152xbf16, #tpu.memory_space<vmem>>, vector<16x64xbf16>
    %cst_75 = arith.constant dense<0.000000e+00> : vector<16x16xf32>
    %117 = tpu.matmul %116, %114, %cst_75 {dimension_numbers = #tpu.dot_dimension_numbers<[1], [1], [0], [0], [0, 0, 1, 0], [], []>} : vector<16x64xbf16>, vector<16x64xbf16>, vector<16x16xf32> -> vector<16x16xf32>
    %c0_76 = arith.constant 0 : index
    %c0_77 = arith.constant 0 : index
    %118 = vector.load %arg5[%c0_76, %c0_77] : memref<16x16xf32, #tpu.memory_space<vmem>>, vector<16x16xf32>
    %119 = arith.addf %117, %118 : vector<16x16xf32>
    %cst_78 = arith.constant dense<0xFF800000> : vector<16xf32>
    %120 = vector.multi_reduction <maximumf>, %119, %cst_78 [1] : vector<16x16xf32> to vector<16xf32>
    %121 = vector.shape_cast %120 : vector<16xf32> to vector<16x1xf32>
    %122 = vector.broadcast %121 : vector<16x1xf32> to vector<16x16xf32>
    %123 = arith.subf %119, %122 : vector<16x16xf32>
    %124 = math.exp %123 : vector<16x16xf32>
    %cst_79 = arith.constant dense<0.000000e+00> : vector<16xf32>
    %125 = vector.multi_reduction <add>, %124, %cst_79 [1] : vector<16x16xf32> to vector<16xf32>
    %126 = vector.shape_cast %125 : vector<16xf32> to vector<16x1xf32>
    %127 = tpu.reciprocal %126 {approx = true} : vector<16x1xf32> -> vector<16x1xf32>
    %128 = vector.broadcast %127 : vector<16x1xf32> to vector<16x16xf32>
    %129 = arith.mulf %124, %128 : vector<16x16xf32>
    %130 = arith.truncf %129 : vector<16x16xf32> to vector<16x16xbf16>
    %cst_80 = arith.constant dense<0.000000e+00> : vector<16x64xf32>
    %131 = tpu.matmul %130, %115, %cst_80 {dimension_numbers = #tpu.dot_dimension_numbers<[1], [0], [0], [1], [0, 0, 1, 1], [], []>} : vector<16x16xbf16>, vector<16x64xbf16>, vector<16x64xf32> -> vector<16x64xf32>
    %132 = arith.truncf %131 : vector<16x64xf32> to vector<16x64xbf16>
    %c0_81 = arith.constant 0 : index
    %c320_82 = arith.constant 320 : index
    %133 = vector.load %arg8[%c0_81, %c320_82] : memref<16x384xbf16, #tpu.memory_space<vmem>>, vector<16x64xbf16>
    tpu.vector_store %arg8[%c0_81, %c320_82], %132 {strides = array<i32>} : memref<16x384xbf16, #tpu.memory_space<vmem>>, vector<16x64xbf16>,
    %c0_83 = arith.constant 0 : index
    %c0_84 = arith.constant 0 : index
    %134 = vector.load %arg8[%c0_83, %c0_84] : memref<16x384xbf16, #tpu.memory_space<vmem>>, vector<16x384xbf16>
    %c0_85 = arith.constant 0 : index
    %c0_86 = arith.constant 0 : index
    %135 = vector.load %arg3[%c0_85, %c0_86] : memref<384x384xbf16, #tpu.memory_space<vmem>>, vector<384x384xbf16>
    %cst_87 = arith.constant dense<0.000000e+00> : vector<16x384xf32>
    %136 = tpu.matmul %134, %135, %cst_87 {dimension_numbers = #tpu.dot_dimension_numbers<[1], [0], [0], [1], [0, 0, 1, 1], [], []>} : vector<16x384xbf16>, vector<384x384xbf16>, vector<16x384xf32> -> vector<16x384xf32>
    %c0_88 = arith.constant 0 : index
    %c0_89 = arith.constant 0 : index
    %137 = vector.load %arg4[%c0_88, %c0_89] : memref<1x384xf32, #tpu.memory_space<vmem>>, vector<1x384xf32>
    %138 = vector.broadcast %137 : vector<1x384xf32> to vector<16x384xf32>
    %139 = arith.addf %136, %138 : vector<16x384xf32>
    %c0_90 = arith.constant 0 : index
    %c0_91 = arith.constant 0 : index
    %c0_92 = arith.constant 0 : index
    %140 = vector.load %arg6[%c0_90, %c0_91, %c0_92] : memref<1x16x384xf32, #tpu.memory_space<vmem>>, vector<1x16x384xf32>
    %141 = vector.shape_cast %140 : vector<1x16x384xf32> to vector<16x384xf32>
    %142 = vector.shape_cast %139 : vector<16x384xf32> to vector<1x16x384xf32>
    tpu.vector_store %arg6[%c0_90, %c0_91, %c0_92], %142 {strides = array<i32>} : memref<1x16x384xf32, #tpu.memory_space<vmem>>, vector<1x16x384xf32>,
    return
  }
  func.func @transform_0(%arg0: i32) -> (i32, i32, i32) {
    %c0_i32 = arith.constant 0 : i32
    %c0_i32_0 = arith.constant 0 : i32
    %c0_i32_1 = arith.constant 0 : i32
    return %arg0, %c0_i32, %c0_i32_0 : i32, i32, i32
  }
  func.func @transform_1(%arg0: i32) -> (i32, i32) {
    %c0_i32 = arith.constant 0 : i32
    %c0_i32_0 = arith.constant 0 : i32
    %c0_i32_1 = arith.constant 0 : i32
    return %c0_i32, %c0_i32_0 : i32, i32
  }
  func.func @transform_2(%arg0: i32) -> (i32, i32) {
    %c0_i32 = arith.constant 0 : i32
    %c0_i32_0 = arith.constant 0 : i32
    %c0_i32_1 = arith.constant 0 : i32
    return %c0_i32, %c0_i32_0 : i32, i32
  }
  func.func @transform_3(%arg0: i32) -> (i32, i32) {
    %c0_i32 = arith.constant 0 : i32
    %c0_i32_0 = arith.constant 0 : i32
    %c0_i32_1 = arith.constant 0 : i32
    return %c0_i32, %c0_i32_0 : i32, i32
  }
  func.func @transform_4(%arg0: i32) -> (i32, i32) {
    %c0_i32 = arith.constant 0 : i32
    %c0_i32_0 = arith.constant 0 : i32
    %c0_i32_1 = arith.constant 0 : i32
    return %c0_i32, %c0_i32_0 : i32, i32
  }
  func.func @transform_5(%arg0: i32) -> (i32, i32, i32) {
    %c0_i32 = arith.constant 0 : i32
    %c0_i32_0 = arith.constant 0 : i32
    %c0_i32_1 = arith.constant 0 : i32
    return %arg0, %c0_i32, %c0_i32_0 : i32, i32, i32
  }
}

</mosaic_0001>

<bundles_post_ra>
// kernel: tpu_custom_call.1
= control target key start
LH: loop header
LB: loop body
LE: loop exit
PB: predicated region body
PF: predicated region fallthrough
CT: control target
= control target key end

     0   :  { %s5887_s0 = inlined_call_operand.hbm [shape: bf16[2,16,384], index: 0, kind: input, shape index: {}]   ;;  %s5888_s1 = inlined_call_operand.hbm [shape: bf16[384,1152], index: 1, kind: input, shape index: {}]   ;;  %s5889_s2 = inlined_call_operand.hbm [shape: bf16[384,384], index: 2, kind: input, shape index: {}]   ;;  %s5890_s3 = inlined_call_operand.hbm [shape: f32[1,384], index: 3, kind: input, shape index: {}]   ;;  %s5891_s4 = inlined_call_operand.hbm [shape: f32[16,16], index: 4, kind: input, shape index: {}]   ;;  %s5892_s5 = inlined_call_operand.hbm [shape: f32[2,16,384], index: 5, kind: output, shape index: {}]  }
   0x1   :  { %5895 = sst [smem:[#allocation18_spill]] %s5888_s1 }
   0x2   :  { %10 = vsyncpa [#allocation5], 0 }
   0x3   :  { %12 = vsyncpa [#allocation5 + $0x1], 0 }
   0x4   :  { %13 = vsyncpa [#allocation8], 0 }
   0x5   :  { %14 = vsyncpa [#allocation11], 0 }
   0x6   :  { %15 = vsyncpa [#allocation6], 0 }
   0x7   :  { %17 = vsyncpa [#allocation6 + $0x1], 0  ;;  %s5519_s18 = smov 0   ;;  %s5521_s19 = smov 0  }
   0x8   :  { %s5523_s20 = smov 0   ;;  %s5525_s21 = smov 0  }
   0x9 LB: > { %s5540_s22 = sadd.s32 4294967295, %s5474_s21   ;;  %s3513_s23 = sadd.s32 4294967294, %s5474_s21   ;;  %s5474_s21 = sphi %s5525_s21, %s5909_s21   ;;  %s5470_s20 = sphi %s5523_s20, %s5908_s20   ;;  %s5466_s19 = sphi %s5521_s19, %s5907_s19   ;;  %s5462_s18 = sphi %s5519_s18, %s5906_s18  }
   0xa   : > { %p43_p0 = scmp.ne.s32.totalorder %s5466_s19, %s5462_s18  ;;  %p44_p1 = scmp.eq.s32.totalorder %s5540_s22, 0 }
   0xb   : > { %p151_p2 = scmp.eq.s32.totalorder %s5540_s22, 1  ;;  %p157_p3 = scmp.eq.s32.totalorder %s3513_s23, 1 }
   0xc   : > { %p5549_p4 = por %p44_p1, %p43_p0  ;;  %p3514_p5 = scmp.ge.s32.totalorder %s5474_s21, 1 }
   0xd   : > { %p5554_p6 = por %p157_p3, %p43_p0  ;;  %p164_p7 = scmp.lt.s32.totalorder %s5474_s21, 3 }
   0xe   : > { %s5898_s1 = sld [smem:[#allocation18_spill]]  ;;  %s5476_s30 = smov [#allocation7]  }
   0xf   : > { %p5562_p8 = pnand %p3514_p5, %p164_p7  ;;  %s177_s6 = sshll.u32 %s5476_s30, 4  ;;  %s178_s6 = int_to_ptr.vmem [resolvable:$true] %s177_s6 }
  0x10   : > { %s204_s10 = sshll.u32 %s5890_s3, 4  ;;  %s5477_s11 = smov 576   ;;  %s205_s10 = int_to_ptr.hbm [resolvable:$true] %s204_s10 }
  0x11   : > { %p5126_p9 = pneg %p5562_p8  ;;  %s5478_s12 = smov 36  }
  0x12   : > { %s5479_s13 = smov [#allocation10]   ;;  %s189_s17 = sshll.u32 %s5889_s2, 4  ;;  %s190_s17 = int_to_ptr.hbm [resolvable:$true] %s189_s17 }
  0x13   : > { %p5570_p10 = pnand %p5126_p9, %p44_p1  ;;  %s206_s14 = sshll.u32 %s5479_s13, 4  ;;  %s207_s14 = int_to_ptr.vmem [resolvable:$true] %s206_s14 }
  0x14   : > { %s175_s28 = sshll.u32 %s5898_s1, 4  ;;  %s5480_s23 = smov [#allocation9]   ;;  %s176_s28 = int_to_ptr.hbm [resolvable:$true] %s175_s28 }
  0x15   : > { %5129 = dma.hbm_to_vmem [thread:$0]  (!%p5570_p10), %s176_s28, 27648, %s178_s6, [#allocation8], %s5477_s11, %s5477_s11, %s5478_s12  }
  0x16   : > { %5135 = dma.hbm_to_vmem [thread:$0]  (!%p5570_p10), %s205_s10, 48, %s207_s14, [#allocation11]  }
  0x17   : > { %s191_s26 = sshll.u32 %s5480_s23, 4  ;;  %s215_s28 = sshll.u32 %s5891_s4, 4  ;;  %s192_s26 = int_to_ptr.vmem [resolvable:$true] %s191_s26  ;;  %s216_s28 = int_to_ptr.hbm [resolvable:$true] %s215_s28 }
  0x18   : > { %s5893_s6 = smov 192   ;;  %s5894_s8 = smov 12  }
  0x19   : > { %5132 = dma.hbm_to_vmem [thread:$0]  (!%p5570_p10), %s190_s17, 9216, %s192_s26, [#allocation8], %s5893_s6, %s5893_s6, %s5894_s8  }
  0x1a   : > { %s5483_s9 = smov [#allocation12]   ;;  %s5484_s11 = smov 128  }
  0x1b   : > { %s217_s10 = sshll.u32 %s5483_s9, 4  ;;  %s5485_s12 = smov 8   ;;  %s218_s10 = int_to_ptr.vmem [resolvable:$true] %s217_s10 }
  0x1c   : > { %5138 = dma.hbm_to_vmem [thread:$0]  (!%p5570_p10), %s216_s28, 256, %s218_s10, [#allocation11], %s5484_s11, %s5484_s11, %s5485_s12  }
  0x1d   : > { %s5596_s13 = sadd.s32 1, %s5474_s21   ;;  %s30_s15 = sadd.s32 1, %s5470_s20 }
  0x1e   : > { %s27_s14 = ssub.s32 %s5474_s21, %s5596_s13  ;;  %p37_p13 = scmp.ne.s32.totalorder %s5470_s20, %s5466_s19 }
  0x1f   : > { %p28_p12 = scmp.eq.s32.totalorder %s27_s14, 0  ;;  %p38_p0 = scmp.eq.s32.totalorder %s5474_s21, 0 }
  0x20   : > { %p5609_p5 = por %p151_p2, %p37_p13  ;;  %p5151_p7 = scmp.lt.s32.totalorder %s5474_s21, 2 }
  0x21   : > { %s5605_s16 = scalar_select %p28_p12, %s5470_s20, %s30_s15  }
  0x22   : > { %p39_p3 = por %p38_p0, %p37_p13  ;;  %s231_s23 = sand.u32 1, %s5470_s20  }
  0x23   : > { %s5101_s7 = smul.u32 24, %s231_s23  ;;  %s232_s14 = scalar_lea.sflag [#allocation5], %s231_s23 }
  0x24   : > { %s5102_s26 = smul.u32 24, %s5474_s21  ;;  %p5616_p9 = pnand %p5151_p7, %p39_p3 }
  0x25   : > { %s235_s10 = scalar_lea.vmem [#allocation4], %s5101_s7  ;;  %s5377_s30 = scalar_lea.hbm %s5887_s0, 48 }
  0x26   : > { %s240_s9 = scalar_lea.hbm %s5887_s0, %s5102_s26  ;;  %s243_s11 = sshll.u32 %s235_s10, 4  ;;  %s244_s11 = int_to_ptr.vmem [resolvable:$true] %s243_s11 }
  0x27   : > { %s241_s12 = sshll.u32 %s240_s9, 4  ;;  %p5374_p10 = pneg %p5616_p9  ;;  %s242_s12 = int_to_ptr.hbm [resolvable:$true] %s241_s12 }
  0x28   : > { %s5370_s15 = sshra.s32 %s242_s12, 4  ;;  %s5371_s15 = int_to_ptr.hbm [resolvable:$true] %s5370_s15 }
  0x29   : > { %s5372_s6 = scalar_lea.hbm %s5371_s15, 24  ;;  %p5378_p0 = scmp.lt.s32.totalorder %s5371_s15, %s5887_s0 }
  0x2a   : > { %p5373_p2 = scmp.ne.s32.totalorder %s5371_s15, %s5372_s6  ;;  %p5379_p3 = scmp.lt.s32.totalorder %s5377_s30, %s5372_s6 }
  0x2c   : > { %p5375_p12 = pnand %p5374_p10, %p5373_p2  ;;  %p5380_p7 = por %p5379_p3, %p5378_p0 }
  0x2e   : > { %p5376_p13 = pneg %p5375_p12 }
  0x30   : > { %p5381_p11 = pnand %p5380_p7, %p5376_p13 }
  0x32   : > { %5384 = shalt.err (!%p5381_p11)
}
  0x33   : > { %s5903_s23 = smov 12   ;;  %s5904_s7 = smov 192  }
  0x34   : > { %5142 = dma.hbm_to_vmem [thread:$0]  (!%p5616_p9), %s242_s12, 384, %s244_s11, %s232_s14, %s5904_s7, %s5904_s7, %s5903_s23  }
  0x35   : > { %255 = sbr.rel (%p5562_p8) target bundleno = 1588 (0x634), region = 40  ;;  %s5639_s1 = sand.u32 (!%p5562_p8), 1, %s5466_s19  }
  0x36   : > { %s5103_s8 = smul.u32 (!%p5562_p8), 24, %s5639_s1  ;;  %s258_s6 = scalar_lea.sflag (!%p5562_p8), [#allocation5], %s5639_s1 }
  0x38   : > { %s5643_s9 = scalar_lea.vmem (!%p5562_p8), [#allocation4], %s5103_s8 }
  0x3a   : > { %5445 = dma.done.wait (%p5549_p4), %s258_s6, 384  }
  0x3b   : > { %5447 = vsyncadd (%p5549_p4), %s258_s6, 4294966912 }
  0x3c   : > { %5449 = dma.done.wait (%p44_p1), [#allocation8], 36864  }
  0x3d   : > { %5451 = vsyncadd (%p44_p1), [#allocation8], 4294930432 }
  0x3e   : > { %5453 = dma.done.wait (%p44_p1), [#allocation11], 304  }
  0x3f   : > { %5455 = vsyncadd (%p44_p1), [#allocation11], 4294966992  ;;  %v3624_v0 = vld [vmem:[#allocation7 + $0x1f8] sm:$0xf]  ;;  %v4814_v1 = vld [vmem:[#allocation7 + $0x218] sm:$0xf0] }
  0x40   : > { %v3720_v2 = vld [vmem:[#allocation7 + $0x438] sm:$0xf]  ;;  %v3625_v3 = vor.u32 %v4814_v1, %v3624_v0  ;;  %v4838_v4 = vld [vmem:[#allocation7 + $0x458] sm:$0xf0]  ;;  %v3626_v10 = vld [vmem:[#allocation7 + $0x21c] sm:$0xf0] }
  0x41   : > { %v3816_v5 = vld [vmem:[#allocation7 + $0x678] sm:$0xf]  ;;  %v4862_v6 = vld [vmem:[#allocation7 + $0x698] sm:$0xf0]  ;;  %v3721_v7 = vor.u32 %v4838_v4, %v3720_v2  ;;  %v3612_v11 = vld [vmem:[#allocation7 + $0x1b0] sm:$0xf] }
  0x42   : > { %v3817_v8 = vor.u32 %v4862_v6, %v3816_v5  ;;  %v4813_v9 = vld [vmem:[#allocation7 + $0x1fc] sm:$0xf]  ;;  %810 = vmatpush.bf16.msra.mxu0 %v3625_v3  ;;  %v4811_v13 = vld [vmem:[#allocation7 + $0x1d0] sm:$0xf0]  ;;  %v3708_v14 = vld [vmem:[#allocation7 + $0x3f0] sm:$0xf] }
  0x43   : > { %v3629_v12 = vor.u32 %v4813_v9, %v3626_v10  ;;  %v4835_v15 = vld [vmem:[#allocation7 + $0x410] sm:$0xf0]  ;;  %824 = vmatpush.bf16.msra.mxu1 %v3721_v7  ;;  %v3613_v16 = vor.u32 %v4811_v13, %v3612_v11  ;;  %v3804_v18 = vld [vmem:[#allocation7 + $0x630] sm:$0xf]  ;;  %v3614_v22 = vld [vmem:[#allocation7 + $0x1d4] sm:$0xf0] }
  0x44   : > { %838 = vmatpush.bf16.msra.mxu2 %v3817_v8  ;;  %v3709_v17 = vor.u32 %v4835_v15, %v3708_v14  ;;  %v4859_v19 = vld [vmem:[#allocation7 + $0x650] sm:$0xf0]  ;;  %v3600_v23 = vld [vmem:[#allocation7 + $0x168] sm:$0xf]  ;;  %v4808_v24 = vld [vmem:[#allocation7 + $0x188] sm:$0xf0] }
  0x45   : > { %v4810_v20 = vld [vmem:[#allocation7 + $0x1b4] sm:$0xf]  ;;  %852 = vmatpush.bf16.msra.mxu3 %v3629_v12  ;;  %v3805_v21 = vor.u32 %v4859_v19, %v3804_v18  ;;  %v3696_v26 = vld [vmem:[#allocation7 + $0x3a8] sm:$0xf]  ;;  %v4832_v27 = vld [vmem:[#allocation7 + $0x3c8] sm:$0xf0]  ;;  %v3601_v29 = vor.u32 %v4808_v24, %v3600_v23 }
  0x46   : > { %v3617_v25 = vor.u32 %v4810_v20, %v3614_v22  ;;  %v3792_v28 = vld [vmem:[#allocation7 + $0x5e8] sm:$0xf]  ;;  %811 = vmatpush.bf16.msra.mxu0 %v3613_v16  ;;  %v4856_v30 = vld [vmem:[#allocation7 + $0x608] sm:$0xf0]  ;;  %v3602_v32 = vld [vmem:[#allocation7 + $0x18c] sm:$0xf0]  ;;  %v3697_v33 = vor.u32 %v4832_v27, %v3696_v26 }
  0x47   : > { %v4807_v31 = vld [vmem:[#allocation7 + $0x16c] sm:$0xf]  ;;  %825 = vmatpush.bf16.msra.mxu1 %v3709_v17  ;;  %v3793_v34 = vor.u32 %v4856_v30, %v3792_v28  ;;  %v3588_v35 = vld [vmem:[#allocation7 + $0x120] sm:$0xf]  ;;  %v4805_v36 = vld [vmem:[#allocation7 + $0x140] sm:$0xf0] }
  0x48   : > { %839 = vmatpush.bf16.msra.mxu2 %v3805_v21  ;;  %v3684_v37 = vld [vmem:[#allocation7 + $0x360] sm:$0xf]  ;;  %v3605_v38 = vor.u32 %v4807_v31, %v3602_v32  ;;  %v4829_v39 = vld [vmem:[#allocation7 + $0x380] sm:$0xf0]  ;;  %v3590_v43 = vld [vmem:[#allocation7 + $0x144] sm:$0xf0]  ;;  %v3589_v44 = vor.u32 %v4805_v36, %v3588_v35 }
  0x49   : > { %853 = vmatpush.bf16.msra.mxu3 %v3617_v25  ;;  %v3780_v40 = vld [vmem:[#allocation7 + $0x5a0] sm:$0xf]  ;;  %v4853_v41 = vld [vmem:[#allocation7 + $0x5c0] sm:$0xf0]  ;;  %v3685_v45 = vor.u32 %v4829_v39, %v3684_v37  ;;  %v3576_v47 = vld [vmem:[#allocation7 + $0xd8] sm:$0xf] }
  0x4a   : > { %v4804_v42 = vld [vmem:[#allocation7 + $0x124] sm:$0xf]  ;;  %812 = vmatpush.bf16.msra.mxu0 %v3601_v29  ;;  %v3781_v46 = vor.u32 %v4853_v41, %v3780_v40  ;;  %v4802_v48 = vld [vmem:[#allocation7 + $0xf8] sm:$0xf0]  ;;  %v3672_v49 = vld [vmem:[#allocation7 + $0x318] sm:$0xf] }
  0x4b   : > { %826 = vmatpush.bf16.msra.mxu1 %v3697_v33  ;;  %v3593_v50 = vor.u32 %v4804_v42, %v3590_v43  ;;  %v4826_v51 = vld [vmem:[#allocation7 + $0x338] sm:$0xf0]  ;;  %v3768_v52 = vld [vmem:[#allocation7 + $0x558] sm:$0xf]  ;;  %v3578_v55 = vld [vmem:[#allocation7 + $0xfc] sm:$0xf0]  ;;  %v3577_v56 = vor.u32 %v4802_v48, %v3576_v47 }
  0x4c   : > { %840 = vmatpush.bf16.msra.mxu2 %v3793_v34  ;;  %v4850_v53 = vld [vmem:[#allocation7 + $0x578] sm:$0xf0]  ;;  %v3673_v57 = vor.u32 %v4826_v51, %v3672_v49  ;;  %v3564_v59 = vld [vmem:[#allocation7 + $0x90] sm:$0xf]  ;;  %v4799_v60 = vld [vmem:[#allocation7 + $0xb0] sm:$0xf0] }
  0x4d   : > { %854 = vmatpush.bf16.msra.mxu3 %v3605_v38  ;;  %v4801_v54 = vld [vmem:[#allocation7 + $0xdc] sm:$0xf]  ;;  %v3769_v58 = vor.u32 %v4850_v53, %v3768_v52  ;;  %v3660_v61 = vld [vmem:[#allocation7 + $0x2d0] sm:$0xf]  ;;  %v4823_v63 = vld [vmem:[#allocation7 + $0x2f0] sm:$0xf0]  ;;  %v3565_v4 = vor.u32 %v4799_v60, %v3564_v59 }
  0x4e   : > { %813 = vmatpush.bf16.msra.mxu0 %v3589_v44  ;;  %v3581_v62 = vor.u32 %v4801_v54, %v3578_v55  ;;  %v3756_v0 = vld [vmem:[#allocation7 + $0x510] sm:$0xf]  ;;  %v4847_v1 = vld [vmem:[#allocation7 + $0x530] sm:$0xf0]  ;;  %v3566_v3 = vld [vmem:[#allocation7 + $0xb4] sm:$0xf0]  ;;  %v3661_v5 = vor.u32 %v4823_v63, %v3660_v61 }
  0x4f   : > { %827 = vmatpush.bf16.msra.mxu1 %v3685_v45  ;;  %v4798_v2 = vld [vmem:[#allocation7 + $0x94] sm:$0xf]  ;;  %v3757_v6 = vor.u32 %v4847_v1, %v3756_v0  ;;  %v3552_v7 = vld [vmem:[#allocation7 + $0x48] sm:$0xf]  ;;  %v4796_v8 = vld [vmem:[#allocation7 + $0x68] sm:$0xf0] }
  0x50   : > { %841 = vmatpush.bf16.msra.mxu2 %v3781_v46  ;;  %v3648_v9 = vld [vmem:[#allocation7 + $0x288] sm:$0xf]  ;;  %v3569_v10 = vor.u32 %v4798_v2, %v3566_v3  ;;  %v4820_v11 = vld [vmem:[#allocation7 + $0x2a8] sm:$0xf0]  ;;  %v3554_v15 = vld [vmem:[#allocation7 + $0x6c] sm:$0xf0]  ;;  %v3553_v16 = vor.u32 %v4796_v8, %v3552_v7 }
  0x51   : > { %855 = vmatpush.bf16.msra.mxu3 %v3593_v50  ;;  %v3744_v12 = vld [vmem:[#allocation7 + $0x4c8] sm:$0xf]  ;;  %v4844_v13 = vld [vmem:[#allocation7 + $0x4e8] sm:$0xf0]  ;;  %v3540_v17 = vld [vmem:[#allocation7] sm:$0xf]  ;;  %v3649_v19 = vor.u32 %v4820_v11, %v3648_v9 }
  0x52   : > { %814 = vmatpush.bf16.msra.mxu0 %v3577_v56  ;;  %v4795_v14 = vld [vmem:[#allocation7 + $0x4c] sm:$0xf]  ;;  %v4793_v18 = vld [vmem:[#allocation7 + $0x20] sm:$0xf0]  ;;  %v3745_v20 = vor.u32 %v4844_v13, %v3744_v12  ;;  %v3636_v21 = vld [vmem:[#allocation7 + $0x240] sm:$0xf] }
  0x53   : > { %828 = vmatpush.bf16.msra.mxu1 %v3673_v57  ;;  %v4817_v22 = vld [vmem:[#allocation7 + $0x260] sm:$0xf0]  ;;  %v3732_v23 = vld [vmem:[#allocation7 + $0x480] sm:$0xf]  ;;  %v3557_v24 = vor.u32 %v4795_v14, %v3554_v15  ;;  %v4837_v26 = vld [vmem:[#allocation7 + $0x43c] sm:$0xf]  ;;  %v3541_v31 = vor.u32 %v4793_v18, %v3540_v17 }
  0x54   : > { %842 = vmatpush.bf16.msra.mxu2 %v3769_v58  ;;  %v4841_v25 = vld [vmem:[#allocation7 + $0x4a0] sm:$0xf0]  ;;  %v3722_v27 = vld [vmem:[#allocation7 + $0x45c] sm:$0xf0]  ;;  %v4861_v28 = vld [vmem:[#allocation7 + $0x67c] sm:$0xf]  ;;  %v3637_v35 = vor.u32 %v4817_v22, %v3636_v21 }
  0x55   : > { %856 = vmatpush.bf16.msra.mxu3 %v3581_v62  ;;  %v3818_v29 = vld [vmem:[#allocation7 + $0x69c] sm:$0xf0]  ;;  %v4815_v32 = vld [vmem:[#allocation7 + $0x220] sm:$0xf0]  ;;  %v3542_v34 = vld [vmem:[#allocation7 + $0x24] sm:$0xf0]  ;;  %v3733_v36 = vor.u32 %v4841_v25, %v3732_v23  ;;  %v3725_v39 = vor.u32 %v4837_v26, %v3722_v27 }
  0x56   : > { %815 = vmatpush.bf16.msra.mxu0 %v3565_v4  ;;  %v3632_v30 = vld [vmem:[#allocation7 + $0x200] sm:$0xf]  ;;  %v4792_v33 = vld [vmem:[#allocation7 + $0x4] sm:$0xf]  ;;  %v3821_v40 = vor.u32 %v4861_v28, %v3818_v29  ;;  %v4834_v41 = vld [vmem:[#allocation7 + $0x3f4] sm:$0xf] }
  0x57   : > { %829 = vmatpush.bf16.msra.mxu1 %v3661_v5  ;;  %v3728_v37 = vld [vmem:[#allocation7 + $0x440] sm:$0xf]  ;;  %v4839_v38 = vld [vmem:[#allocation7 + $0x460] sm:$0xf0]  ;;  %v3633_v42 = vor.u32 %v4815_v32, %v3632_v30  ;;  %v3545_v43 = vor.u32 %v4792_v33, %v3542_v34  ;;  %v3710_v44 = vld [vmem:[#allocation7 + $0x414] sm:$0xf0] }
  0x58   : > { %843 = vmatpush.bf16.msra.mxu2 %v3757_v6  ;;  %v4858_v45 = vld [vmem:[#allocation7 + $0x634] sm:$0xf]  ;;  %v3806_v46 = vld [vmem:[#allocation7 + $0x654] sm:$0xf0]  ;;  %v3729_v47 = vor.u32 %v4839_v38, %v3728_v37  ;;  %v4812_v49 = vld [vmem:[#allocation7 + $0x1d8] sm:$0xf0]  ;;  %v3713_v54 = vor.u32 %v4834_v41, %v3710_v44 }
  0x59   : > { %857 = vmatpush.bf16.msra.mxu3 %v3569_v10  ;;  %v3620_v48 = vld [vmem:[#allocation7 + $0x1b8] sm:$0xf]  ;;  %v4836_v51 = vld [vmem:[#allocation7 + $0x418] sm:$0xf0]  ;;  %v3528_v52 = vld [vmem:[%s5643_s9] sm:$0xf]  ;;  %v3809_v55 = vor.u32 %v4858_v45, %v3806_v46 }
  0x5a   : > { %816 = vmatpush.bf16.msra.mxu0 %v3553_v16  ;;  %v3716_v50 = vld [vmem:[#allocation7 + $0x3f8] sm:$0xf]  ;;  %v4790_v53 = vld [vmem:[%s5643_s9 + $0x8] sm:$0xf0]  ;;  %v4831_v56 = vld [vmem:[#allocation7 + $0x3ac] sm:$0xf]  ;;  %v3621_v59 = vor.u32 %v4812_v49, %v3620_v48 }
  0x5b   : > { %830 = vmatpush.bf16.msra.mxu1 %v3649_v19  ;;  %v3698_v57 = vld [vmem:[#allocation7 + $0x3cc] sm:$0xf0]  ;;  %v5659_v58 = vor.u32 %v4790_v53, %v3528_v52  ;;  %v4855_v60 = vld [vmem:[#allocation7 + $0x5ec] sm:$0xf]  ;;  %v3717_v63 = vor.u32 %v4836_v51, %v3716_v50  ;;  %v4809_v1 = vld [vmem:[#allocation7 + $0x190] sm:$0xf0] }
  0x5c   : > { %844 = vmatpush.bf16.msra.mxu2 %v3745_v20  ;;  %v3794_v61 = vld [vmem:[#allocation7 + $0x60c] sm:$0xf0]  ;;  %v4789_v62 = vld [vmem:[%s5643_s9 + $0x4] sm:$0xf]  ;;  %v3530_v2 = vld [vmem:[%s5643_s9 + $0xc] sm:$0xf0]  ;;  %v3701_v6 = vor.u32 %v4831_v56, %v3698_v57 }
  0x5d   : > { %858 = vmatpush.bf16.msra.mxu3 %v3557_v24  ;;  %v3608_v0 = vld [vmem:[#allocation7 + $0x170] sm:$0xf]  ;;  %v4833_v4 = vld [vmem:[#allocation7 + $0x3d0] sm:$0xf0]  ;;  %v5664_v5 = vor.u32 %v4789_v62, %v3530_v2  ;;  %v3797_v7 = vor.u32 %v4855_v60, %v3794_v61  ;;  %v4828_v8 = vld [vmem:[#allocation7 + $0x364] sm:$0xf] }
  0x5e   : > { %817 = vmatpush.bf16.msra.mxu0 %v3541_v31  ;;  %v3704_v3 = vld [vmem:[#allocation7 + $0x3b0] sm:$0xf]  ;;  %v3686_v9 = vld [vmem:[#allocation7 + $0x384] sm:$0xf0]  ;;  %v4852_v10 = vld [vmem:[#allocation7 + $0x5a4] sm:$0xf]  ;;  %v3609_v11 = vor.u32 %v4809_v1, %v3608_v0 }
  0x5f   : > { %831 = vmatpush.bf16.msra.mxu1 %v3637_v35  ;;  %v3782_v12 = vld [vmem:[#allocation7 + $0x5c4] sm:$0xf0]  ;;  %v3536_v13 = vld [vmem:[%s5643_s9 + $0x8] sm:$0xf]  ;;  %v4791_v14 = vld [vmem:[%s5643_s9 + $0x10] sm:$0xf0]  ;;  %v3705_v15 = vor.u32 %v4833_v4, %v3704_v3  ;;  %v3689_v21 = vor.u32 %v4828_v8, %v3686_v9 }
  0x60   : > { %845 = vmatpush.bf16.msra.mxu2 %v3733_v36  ;;  %v3596_v16 = vld [vmem:[#allocation7 + $0x128] sm:$0xf]  ;;  %v4806_v17 = vld [vmem:[#allocation7 + $0x148] sm:$0xf0]  ;;  %v5669_v18 = vor.u32 %v4791_v14, %v3536_v13  ;;  %v3785_v22 = vor.u32 %v4852_v10, %v3782_v12  ;;  %v4825_v23 = vld [vmem:[#allocation7 + $0x31c] sm:$0xf] }
  0x61   : > { %859 = vmatpush.bf16.msra.mxu3 %v3545_v43  ;;  %818 = vmatmul.bf16.vlgmr.msra.gmra.mxu0 %v5659_v58  ;;  %v3692_v19 = vld [vmem:[#allocation7 + $0x368] sm:$0xf]  ;;  %v4830_v20 = vld [vmem:[#allocation7 + $0x388] sm:$0xf0]  ;;  %v3597_v24 = vor.u32 %v4806_v17, %v3596_v16  ;;  %v3674_v25 = vld [vmem:[#allocation7 + $0x33c] sm:$0xf0] }
  0x62   : > { %866 = vmatpush.bf16.msrb.mxu0 %v3725_v39  ;;  %832 = vmatmul.bf16.vlgmr.msra.gmra.mxu1 %v5664_v5  ;;  %v4849_v26 = vld [vmem:[#allocation7 + $0x55c] sm:$0xf]  ;;  %v3770_v27 = vld [vmem:[#allocation7 + $0x57c] sm:$0xf0]  ;;  %v3693_v28 = vor.u32 %v4830_v20, %v3692_v19  ;;  %v4803_v30 = vld [vmem:[#allocation7 + $0x100] sm:$0xf0]  ;;  %v3677_v33 = vor.u32 %v4825_v23, %v3674_v25 }
  0x63   : > { %880 = vmatpush.bf16.msrb.mxu1 %v3821_v40  ;;  %v3584_v29 = vld [vmem:[#allocation7 + $0xe0] sm:$0xf]  ;;  %846 = vmatmul.bf16.vlgmr.msra.gmra.mxu2 %v5669_v18  ;;  %v4827_v32 = vld [vmem:[#allocation7 + $0x340] sm:$0xf0]  ;;  %v3773_v34 = vor.u32 %v4849_v26, %v3770_v27  ;;  %v4822_v35 = vld [vmem:[#allocation7 + $0x2d4] sm:$0xf] }
  0x64   : > { %894 = vmatpush.bf16.msrb.mxu2 %v3633_v42  ;;  %860 = vmatmul.bf16.vlgmr.msra.gmra.mxu3 %v5659_v58  ;;  %v3680_v31 = vld [vmem:[#allocation7 + $0x320] sm:$0xf]  ;;  %v3585_v36 = vor.u32 %v4803_v30, %v3584_v29  ;;  %v3662_v37 = vld [vmem:[#allocation7 + $0x2f4] sm:$0xf0]  ;;  %v4846_v38 = vld [vmem:[#allocation7 + $0x514] sm:$0xf] }
  0x65   : > { %908 = vmatpush.bf16.msrb.mxu3 %v3729_v47  ;;  %v3758_v39 = vld [vmem:[#allocation7 + $0x534] sm:$0xf0]  ;;  %v3681_v40 = vor.u32 %v4827_v32, %v3680_v31  ;;  %v4800_v42 = vld [vmem:[#allocation7 + $0xb8] sm:$0xf0]  ;;  %v3665_v45 = vor.u32 %v4822_v35, %v3662_v37  ;;  %v4819_v47 = vld [vmem:[#allocation7 + $0x28c] sm:$0xf] }
  0x66   : > { %867 = vmatpush.bf16.msrb.mxu0 %v3713_v54  ;;  %v3572_v41 = vld [vmem:[#allocation7 + $0x98] sm:$0xf]  ;;  %v4824_v44 = vld [vmem:[#allocation7 + $0x2f8] sm:$0xf0]  ;;  %v3761_v46 = vor.u32 %v4846_v38, %v3758_v39  ;;  %v3650_v49 = vld [vmem:[#allocation7 + $0x2ac] sm:$0xf0] }
  0x67   : > { %881 = vmatpush.bf16.msrb.mxu1 %v3809_v55  ;;  %v3668_v43 = vld [vmem:[#allocation7 + $0x2d8] sm:$0xf]  ;;  %v3573_v48 = vor.u32 %v4800_v42, %v3572_v41  ;;  %v4843_v50 = vld [vmem:[#allocation7 + $0x4cc] sm:$0xf]  ;;  %v3746_v51 = vld [vmem:[#allocation7 + $0x4ec] sm:$0xf0]  ;;  %v3653_v57 = vor.u32 %v4819_v47, %v3650_v49 }
  0x68   : > { %895 = vmatpush.bf16.msrb.mxu2 %v3621_v59  ;;  %v3669_v52 = vor.u32 %v4824_v44, %v3668_v43  ;;  %v3560_v53 = vld [vmem:[#allocation7 + $0x50] sm:$0xf]  ;;  %v4797_v54 = vld [vmem:[#allocation7 + $0x70] sm:$0xf0]  ;;  %v3749_v59 = vor.u32 %v4843_v50, %v3746_v51  ;;  %v4816_v60 = vld [vmem:[#allocation7 + $0x244] sm:$0xf] }
  0x69   : > { %909 = vmatpush.bf16.msrb.mxu3 %v3717_v63  ;;  %v3656_v55 = vld [vmem:[#allocation7 + $0x290] sm:$0xf]  ;;  %v4821_v56 = vld [vmem:[#allocation7 + $0x2b0] sm:$0xf0]  ;;  %v3638_v61 = vld [vmem:[#allocation7 + $0x264] sm:$0xf0]  ;;  %v3561_v63 = vor.u32 %v4797_v54, %v3560_v53 }
  0x6a   : > { %868 = vmatpush.bf16.msrb.mxu0 %v3701_v6  ;;  %v4840_v62 = vld [vmem:[#allocation7 + $0x484] sm:$0xf]  ;;  %v3734_v0 = vld [vmem:[#allocation7 + $0x4a4] sm:$0xf0]  ;;  %v4794_v2 = vld [vmem:[#allocation7 + $0x28] sm:$0xf0]  ;;  %v3657_v3 = vor.u32 %v4821_v56, %v3656_v55 }
  0x6b   : > { %882 = vmatpush.bf16.msrb.mxu1 %v3797_v7  ;;  %v3548_v1 = vld [vmem:[#allocation7 + $0x8] sm:$0xf]  ;;  %v3824_v4 = vld [vmem:[#allocation7 + $0x680] sm:$0xf]  ;;  %v4863_v6 = vld [vmem:[#allocation7 + $0x6a0] sm:$0xf0]  ;;  %v3737_v12 = vor.u32 %v4840_v62, %v3734_v0 }
  0x6c   : > { %896 = vmatpush.bf16.msrb.mxu2 %v3609_v11  ;;  %v3912_v7 = vld [vmem:[#allocation7 + $0x204] sm:$0xf]  ;;  %v4886_v8 = vld [vmem:[#allocation7 + $0x224] sm:$0xf0]  ;;  %v3641_v11 = vor.u32 %v4816_v60, %v3638_v61  ;;  %v4818_v14 = vld [vmem:[#allocation7 + $0x268] sm:$0xf0]  ;;  %v3825_v16 = vor.u32 %v4863_v6, %v3824_v4 }
  0x6d   : > { %910 = vmatpush.bf16.msrb.mxu3 %v3705_v15  ;;  %v4008_v9 = vld [vmem:[#allocation7 + $0x444] sm:$0xf]  ;;  %v4910_v10 = vld [vmem:[#allocation7 + $0x464] sm:$0xf0]  ;;  %v3549_v15 = vor.u32 %v4794_v2, %v3548_v1  ;;  %v3913_v20 = vor.u32 %v4886_v8, %v3912_v7  ;;  %v4860_v23 = vld [vmem:[#allocation7 + $0x658] sm:$0xf0] }
  0x6e   : > { %869 = vmatpush.bf16.msrb.mxu0 %v3689_v21  ;;  %v3644_v13 = vld [vmem:[#allocation7 + $0x248] sm:$0xf]  ;;  %v4104_v17 = vld [vmem:[#allocation7 + $0x684] sm:$0xf]  ;;  %v4009_v21 = vor.u32 %v4910_v10, %v4008_v9  ;;  %v4883_v26 = vld [vmem:[#allocation7 + $0x1dc] sm:$0xf0] }
  0x6f   : > { %883 = vmatpush.bf16.msrb.mxu1 %v3785_v22  ;;  %v4934_v19 = vld [vmem:[#allocation7 + $0x6a4] sm:$0xf0]  ;;  %v3812_v22 = vld [vmem:[#allocation7 + $0x638] sm:$0xf]  ;;  %v3645_v25 = vor.u32 %v4818_v14, %v3644_v13  ;;  %v3996_v27 = vld [vmem:[#allocation7 + $0x3fc] sm:$0xf] }
  0x70   : > { %897 = vmatpush.bf16.msrb.mxu2 %v3597_v24  ;;  %v3900_v24 = vld [vmem:[#allocation7 + $0x1bc] sm:$0xf]  ;;  %v4105_v29 = vor.u32 %v4934_v19, %v4104_v17  ;;  %v3813_v30 = vor.u32 %v4860_v23, %v3812_v22  ;;  %v4931_v32 = vld [vmem:[#allocation7 + $0x65c] sm:$0xf0]  ;;  %v3800_v35 = vld [vmem:[#allocation7 + $0x5f0] sm:$0xf] }
  0x71   : > { %911 = vmatpush.bf16.msrb.mxu3 %v3693_v28  ;;  %v4907_v28 = vld [vmem:[#allocation7 + $0x41c] sm:$0xf0]  ;;  %v4092_v31 = vld [vmem:[#allocation7 + $0x63c] sm:$0xf]  ;;  %v3888_v37 = vld [vmem:[#allocation7 + $0x174] sm:$0xf] }
  0x72   : > { %870 = vmatpush.bf16.msrb.mxu0 %v3677_v33  ;;  %v3901_v33 = vor.u32 %v4883_v26, %v3900_v24  ;;  %v4880_v38 = vld [vmem:[#allocation7 + $0x194] sm:$0xf0]  ;;  %v3984_v39 = vld [vmem:[#allocation7 + $0x3b4] sm:$0xf]  ;;  %v4093_v41 = vor.u32 %v4931_v32, %v4092_v31  ;;  %v3788_v47 = vld [vmem:[#allocation7 + $0x5a8] sm:$0xf] }
  0x73   : > { %884 = vmatpush.bf16.msrb.mxu1 %v3773_v34  ;;  %v3997_v34 = vor.u32 %v4907_v28, %v3996_v27  ;;  %v4080_v43 = vld [vmem:[#allocation7 + $0x5f4] sm:$0xf]  ;;  %v4928_v44 = vld [vmem:[#allocation7 + $0x614] sm:$0xf0]  ;;  %v3876_v49 = vld [vmem:[#allocation7 + $0x12c] sm:$0xf] }
  0x74   : > { %898 = vmatpush.bf16.msrb.mxu2 %v3585_v36  ;;  %v4857_v36 = vld [vmem:[#allocation7 + $0x610] sm:$0xf0]  ;;  %v4877_v50 = vld [vmem:[#allocation7 + $0x14c] sm:$0xf0]  ;;  %v3972_v51 = vld [vmem:[#allocation7 + $0x36c] sm:$0xf]  ;;  %v4081_v53 = vor.u32 %v4928_v44, %v4080_v43 }
  0x75   : > { %912 = vmatpush.bf16.msrb.mxu3 %v3681_v40  ;;  %v4904_v40 = vld [vmem:[#allocation7 + $0x3d4] sm:$0xf0]  ;;  %v3801_v42 = vor.u32 %v4857_v36, %v3800_v35  ;;  %v4068_v55 = vld [vmem:[#allocation7 + $0x5ac] sm:$0xf]  ;;  %v4925_v56 = vld [vmem:[#allocation7 + $0x5cc] sm:$0xf0] }
  0x76   : > { %871 = vmatpush.bf16.msrb.mxu0 %v3665_v45  ;;  %v3889_v45 = vor.u32 %v4880_v38, %v3888_v37  ;;  %v3776_v60 = vld [vmem:[#allocation7 + $0x560] sm:$0xf]  ;;  %v4851_v61 = vld [vmem:[#allocation7 + $0x580] sm:$0xf0]  ;;  %v4898_v1 = vld [vmem:[#allocation7 + $0x344] sm:$0xf0]  ;;  %v4069_v2 = vor.u32 %v4925_v56, %v4068_v55 }
  0x77   : > { %885 = vmatpush.bf16.msrb.mxu1 %v3761_v46  ;;  %v3985_v46 = vor.u32 %v4904_v40, %v3984_v39  ;;  %v3864_v62 = vld [vmem:[#allocation7 + $0xe4] sm:$0xf]  ;;  %v4922_v6 = vld [vmem:[#allocation7 + $0x584] sm:$0xf0]  ;;  %v3764_v9 = vld [vmem:[#allocation7 + $0x518] sm:$0xf] }
  0x78   : > { %899 = vmatpush.bf16.msrb.mxu2 %v3573_v48  ;;  %v4854_v48 = vld [vmem:[#allocation7 + $0x5c8] sm:$0xf0]  ;;  %v3960_v0 = vld [vmem:[#allocation7 + $0x324] sm:$0xf]  ;;  %v4848_v10 = vld [vmem:[#allocation7 + $0x538] sm:$0xf0] }
  0x79   : > { %913 = vmatpush.bf16.msrb.mxu3 %v3669_v52  ;;  %v4901_v52 = vld [vmem:[#allocation7 + $0x38c] sm:$0xf0]  ;;  %v3789_v54 = vor.u32 %v4854_v48, %v3788_v47  ;;  %v4056_v4 = vld [vmem:[#allocation7 + $0x564] sm:$0xf]  ;;  %v3961_v8 = vor.u32 %v4898_v1, %v3960_v0  ;;  %v3948_v13 = vld [vmem:[#allocation7 + $0x2dc] sm:$0xf] }
  0x7a   : > { %872 = vmatpush.bf16.msrb.mxu0 %v3653_v57  ;;  %v3877_v57 = vor.u32 %v4877_v50, %v3876_v49  ;;  %v4895_v14 = vld [vmem:[#allocation7 + $0x2fc] sm:$0xf0]  ;;  %v4044_v17 = vld [vmem:[#allocation7 + $0x51c] sm:$0xf]  ;;  %v3752_v22 = vld [vmem:[#allocation7 + $0x4d0] sm:$0xf] }
  0x7b   : > { %886 = vmatpush.bf16.msrb.mxu1 %v3749_v59  ;;  %v3973_v59 = vor.u32 %v4901_v52, %v3972_v51  ;;  %v4919_v19 = vld [vmem:[#allocation7 + $0x53c] sm:$0xf0]  ;;  %v4845_v23 = vld [vmem:[#allocation7 + $0x4f0] sm:$0xf0]  ;;  %v4892_v27 = vld [vmem:[#allocation7 + $0x2b4] sm:$0xf0] }
  0x7c   : > { %900 = vmatpush.bf16.msrb.mxu2 %v3561_v63  ;;  %v4874_v63 = vld [vmem:[#allocation7 + $0x104] sm:$0xf0]  ;;  %v3840_v24 = vld [vmem:[#allocation7 + $0x54] sm:$0xf]  ;;  %v4045_v28 = vor.u32 %v4919_v19, %v4044_v17  ;;  %v4916_v31 = vld [vmem:[#allocation7 + $0x4f4] sm:$0xf0] }
  0x7d   : > { %914 = vmatpush.bf16.msrb.mxu3 %v3657_v3  ;;  %v3777_v3 = vor.u32 %v4851_v61, %v3776_v60  ;;  %v3865_v7 = vor.u32 %v4874_v63, %v3864_v62  ;;  %v3936_v26 = vld [vmem:[#allocation7 + $0x294] sm:$0xf]  ;;  %v3740_v32 = vld [vmem:[#allocation7 + $0x488] sm:$0xf]  ;;  %v3828_v36 = vld [vmem:[#allocation7 + $0xc] sm:$0xf] }
  0x7e   : > { %873 = vmatpush.bf16.msrb.mxu0 %v3641_v11  ;;  %v3852_v11 = vld [vmem:[#allocation7 + $0x9c] sm:$0xf]  ;;  %v3937_v35 = vor.u32 %v4892_v27, %v3936_v26  ;;  %v4865_v37 = vld [vmem:[#allocation7 + $0x2c] sm:$0xf0]  ;;  %v3924_v38 = vld [vmem:[#allocation7 + $0x24c] sm:$0xf] }
  0x7f   : > { %887 = vmatpush.bf16.msrb.mxu1 %v3737_v12  ;;  %v4871_v12 = vld [vmem:[#allocation7 + $0xbc] sm:$0xf0]  ;;  %v4889_v39 = vld [vmem:[#allocation7 + $0x26c] sm:$0xf0]  ;;  %v4885_v40 = vld [vmem:[#allocation7 + $0x208] sm:$0xf]  ;;  %v3829_v50 = vor.u32 %v4865_v37, %v3828_v36 }
  0x80   : > { %901 = vmatpush.bf16.msrb.mxu2 %v3549_v15  ;;  %v4057_v15 = vor.u32 %v4922_v6, %v4056_v4  ;;  %v4909_v43 = vld [vmem:[#allocation7 + $0x448] sm:$0xf]  ;;  %v4010_v44 = vld [vmem:[#allocation7 + $0x468] sm:$0xf0]  ;;  %v4913_v49 = vld [vmem:[#allocation7 + $0x4ac] sm:$0xf0]  ;;  %v3925_v51 = vor.u32 %v4889_v39, %v3924_v38 }
  0x81   : > { %915 = vmatpush.bf16.msrb.mxu3 %v3645_v25  ;;  %874 = vmatmul.bf16.vlgmr.msrb.gmra.mxu0 %v5664_v5  ;;  %v4868_v25 = vld [vmem:[#allocation7 + $0x74] sm:$0xf0]  ;;  %v4106_v47 = vld [vmem:[#allocation7 + $0x6a8] sm:$0xf0]  ;;  %v4013_v55 = vor.u32 %v4909_v43, %v4010_v44  ;;  %v4882_v56 = vld [vmem:[#allocation7 + $0x1c0] sm:$0xf] }
  0x82   : > { %922 = vmatpush.bf16.msra.mxu0 %v3825_v16  ;;  %888 = vmatmul.bf16.vlgmr.msrb.gmra.mxu1 %v5669_v18  ;;  %v3765_v16 = vor.u32 %v4848_v10, %v3764_v9  ;;  %v4020_v48 = vld [vmem:[#allocation7 + $0x48c] sm:$0xf]  ;;  %v3902_v60 = vld [vmem:[#allocation7 + $0x1e0] sm:$0xf0]  ;;  %v4906_v61 = vld [vmem:[#allocation7 + $0x400] sm:$0xf] }
  0x83   : > { %1424 = vmatpush.bf16.msra.mxu1 %v3913_v20  ;;  %902 = vmatmul.bf16.vlgmr.msrb.gmra.mxu2 %v5659_v58  ;;  %v3853_v20 = vor.u32 %v4871_v12, %v3852_v11  ;;  %v3920_v52 = vld [vmem:[#allocation7 + $0x20c] sm:$0xf]  ;;  %v3998_v62 = vld [vmem:[#allocation7 + $0x420] sm:$0xf0]  ;;  %v4930_v0 = vld [vmem:[#allocation7 + $0x640] sm:$0xf]  ;;  %v3905_v4 = vor.u32 %v4882_v56, %v3902_v60 }
  0x84   : > { %1438 = vmatpush.bf16.msra.mxu2 %v4009_v21  ;;  %916 = vmatmul.bf16.vlgmr.msrb.gmra.mxu3 %v5664_v5  ;;  %v3949_v21 = vor.u32 %v4895_v14, %v3948_v13  ;;  %v4094_v1 = vld [vmem:[#allocation7 + $0x660] sm:$0xf0]  ;;  %v4001_v6 = vor.u32 %v4906_v61, %v3998_v62  ;;  %v3890_v9 = vld [vmem:[#allocation7 + $0x198] sm:$0xf0]  ;;  %v4903_v10 = vld [vmem:[#allocation7 + $0x3b8] sm:$0xf] }
  0x85   : > { %1452 = vmatpush.bf16.msra.mxu3 %v4105_v29  ;;  %v4032_v29 = vld [vmem:[#allocation7 + $0x4d4] sm:$0xf]  ;;  %v3986_v11 = vld [vmem:[#allocation7 + $0x3d8] sm:$0xf0]  ;;  %v4927_v13 = vld [vmem:[#allocation7 + $0x5f8] sm:$0xf] }
  0x86   : > { %923 = vmatpush.bf16.msra.mxu0 %v3813_v30  ;;  %v3753_v30 = vor.u32 %v4845_v23, %v3752_v22  ;;  %v4082_v14 = vld [vmem:[#allocation7 + $0x618] sm:$0xf0]  ;;  %v3989_v19 = vor.u32 %v4903_v10, %v3986_v11  ;;  %v3878_v22 = vld [vmem:[#allocation7 + $0x150] sm:$0xf0]  ;;  %v4900_v23 = vld [vmem:[#allocation7 + $0x370] sm:$0xf] }
  0x87   : > { %1425 = vmatpush.bf16.msra.mxu1 %v3901_v33  ;;  %v4842_v33 = vld [vmem:[#allocation7 + $0x4a8] sm:$0xf0]  ;;  %v4924_v26 = vld [vmem:[#allocation7 + $0x5b0] sm:$0xf]  ;;  %v4070_v27 = vld [vmem:[#allocation7 + $0x5d0] sm:$0xf0] }
  0x88   : > { %1439 = vmatpush.bf16.msra.mxu2 %v3997_v34  ;;  %v3841_v34 = vor.u32 %v4868_v25, %v3840_v24  ;;  %v3974_v24 = vld [vmem:[#allocation7 + $0x390] sm:$0xf0]  ;;  %v3962_v36 = vld [vmem:[#allocation7 + $0x348] sm:$0xf0]  ;;  %v4921_v38 = vld [vmem:[#allocation7 + $0x568] sm:$0xf] }
  0x89   : > { %1453 = vmatpush.bf16.msra.mxu3 %v4093_v41  ;;  %v3914_v41 = vld [vmem:[#allocation7 + $0x228] sm:$0xf0]  ;;  %v4870_v44 = vld [vmem:[#allocation7 + $0xa0] sm:$0xf]  ;;  %v4867_v56 = vld [vmem:[#allocation7 + $0x58] sm:$0xf] }
  0x8a   : > { %924 = vmatpush.bf16.msra.mxu0 %v3801_v42  ;;  %v4033_v42 = vor.u32 %v4916_v31, %v4032_v29  ;;  %v4878_v29 = vld [vmem:[#allocation7 + $0x154] sm:$0xf0]  ;;  %v3977_v31 = vor.u32 %v4900_v23, %v3974_v24  ;;  %v4058_v39 = vld [vmem:[#allocation7 + $0x588] sm:$0xf0]  ;;  %v3938_v61 = vld [vmem:[#allocation7 + $0x2b8] sm:$0xf0] }
  0x8b   : > { %1426 = vmatpush.bf16.msra.mxu1 %v3889_v45  ;;  %v4933_v45 = vld [vmem:[#allocation7 + $0x688] sm:$0xf]  ;;  %v4891_v60 = vld [vmem:[#allocation7 + $0x298] sm:$0xf]  ;;  %v3926_v10 = vld [vmem:[#allocation7 + $0x270] sm:$0xf0] }
  0x8c   : > { %1440 = vmatpush.bf16.msra.mxu2 %v3985_v46  ;;  %v3741_v46 = vor.u32 %v4842_v33, %v3740_v32  ;;  %v4873_v32 = vld [vmem:[#allocation7 + $0xe8] sm:$0xf]  ;;  %v4073_v33 = vor.u32 %v4924_v26, %v4070_v27  ;;  %v4912_v11 = vld [vmem:[#allocation7 + $0x490] sm:$0xf]  ;;  %vm2190_vm0 = vcmask 523264   ;;  %s5486_s24 = smov 64  }
  0x8d   : > { %1454 = vmatpush.bf16.msra.mxu3 %v4081_v53  ;;  %v4887_v53 = vld [vmem:[#allocation7 + $0x22c] sm:$0xf0]  ;;  %vm2211_vm1 = vcmask 130048   ;;  %vm2260_vm2 = vcmask 519168   ;;  %vm2363_vm3 = vcmask 1043968   ;;  %s5104_s29 = smul.u32 48, %s5639_s1 }
  0x8e   : > { %925 = vmatpush.bf16.msra.mxu0 %v3789_v54  ;;  %v3917_v54 = vor.u32 %v4885_v40, %v3914_v41  ;;  %v3921_v63 = vor.u32 %v4887_v53, %v3920_v52  ;;  %v3872_v40 = vld [vmem:[#allocation7 + $0xec] sm:$0xf]  ;;  %v4875_v41 = vld [vmem:[#allocation7 + $0x10c] sm:$0xf0]  ;;  %v3860_v52 = vld [vmem:[#allocation7 + $0xa4] sm:$0xf] }
  0x8f   : > { %1427 = vmatpush.bf16.msra.mxu1 %v3877_v57  ;;  %v4109_v57 = vor.u32 %v4933_v45, %v4106_v47  ;;  %v4061_v45 = vor.u32 %v4921_v38, %v4058_v39  ;;  %v4894_v47 = vld [vmem:[#allocation7 + $0x2e0] sm:$0xf]  ;;  %v4872_v53 = vld [vmem:[#allocation7 + $0xc4] sm:$0xf0]  ;;  %v4935_v26 = vld [vmem:[#allocation7 + $0x6ac] sm:$0xf0] }
  0x90   : > { %1441 = vmatpush.bf16.msra.mxu2 %v3973_v59  ;;  %v4021_v59 = vor.u32 %v4913_v49, %v4020_v48  ;;  %v3950_v48 = vld [vmem:[#allocation7 + $0x300] sm:$0xf0]  ;;  %v3873_v49 = vor.u32 %v4875_v41, %v3872_v40  ;;  %v3861_v62 = vor.u32 %v4872_v53, %v3860_v52  ;;  %v4296_v27 = vld [vmem:[#allocation7 + $0x450] sm:$0xf]  ;;  %v4932_v39 = vld [vmem:[#allocation7 + $0x664] sm:$0xf0] }
  0x91   : > { %1455 = vmatpush.bf16.msra.mxu3 %v4069_v2  ;;  %v3908_v2 = vld [vmem:[#allocation7 + $0x1c4] sm:$0xf]  ;;  %v4284_v40 = vld [vmem:[#allocation7 + $0x408] sm:$0xf]  ;;  %v4272_v52 = vld [vmem:[#allocation7 + $0x3c0] sm:$0xf] }
  0x92   : > { %926 = vmatpush.bf16.msra.mxu0 %v3777_v3  ;;  %v4884_v3 = vld [vmem:[#allocation7 + $0x1e4] sm:$0xf0]  ;;  %v4100_v38 = vld [vmem:[#allocation7 + $0x644] sm:$0xf]  ;;  %s5845_s27 = scalar_lea.vmem [#allocation13], %s5104_s29  ;;  %s5105_s10 = smul.u32 48, %s5540_s22 }
  0x93   : > { %1428 = vmatpush.bf16.msra.mxu1 %v3865_v7  ;;  %v4879_v7 = vld [vmem:[#allocation7 + $0x178] sm:$0xf]  ;;  %v3909_v12 = vor.u32 %v4884_v3, %v3908_v2  ;;  %v4869_v2 = vld [vmem:[#allocation7 + $0x7c] sm:$0xf0]  ;;  %s3399_s15 = sshll.u32 %s5845_s27, 4  ;;  %s3387_s22 = scalar_lea.sflag [#allocation6], %s5639_s1  ;;  %s3400_s15 = int_to_ptr.vmem [resolvable:$true] %s3399_s15 }
  0x94   : > { %1442 = vmatpush.bf16.msra.mxu2 %v3961_v8  ;;  %v4097_v8 = vor.u32 %v4930_v0, %v4094_v1  ;;  %v3893_v17 = vor.u32 %v4879_v7, %v3890_v9  ;;  %v4034_v0 = vld [vmem:[#allocation7 + $0x4f8] sm:$0xf0]  ;;  %v3830_v7 = vld [vmem:[#allocation7 + $0x30] sm:$0xf0]  ;;  %s3398_s14 = scalar_lea.hbm %s5892_s5, %s5105_s10  ;;  %s5420_s8 = scalar_lea.hbm %s5892_s5, 96 }
  0x95   : > { %1456 = vmatpush.bf16.msra.mxu3 %v4057_v15  ;;  %v3896_v15 = vld [vmem:[#allocation7 + $0x17c] sm:$0xf]  ;;  %s3401_s30 = sshll.u32 %s3398_s14, 4  ;;  %s3402_s30 = int_to_ptr.hbm [resolvable:$true] %s3401_s30 }
  0x96   : > { %927 = vmatpush.bf16.msra.mxu0 %v3765_v16  ;;  %v4881_v16 = vld [vmem:[#allocation7 + $0x19c] sm:$0xf0]  ;;  %v3848_v1 = vld [vmem:[#allocation7 + $0x5c] sm:$0xf]  ;;  %s5414_s28 = sshra.s32 %s3402_s30, 4  ;;  %s5415_s28 = int_to_ptr.hbm [resolvable:$true] %s5414_s28 }
  0x97   : > { %1429 = vmatpush.bf16.msra.mxu1 %v3853_v20  ;;  %v4876_v20 = vld [vmem:[#allocation7 + $0x130] sm:$0xf]  ;;  %v3897_v25 = vor.u32 %v4881_v16, %v3896_v15  ;;  %s5416_s26 = scalar_lea.hbm %s5415_s28, 48  ;;  %p5421_p11 = scmp.lt.s32.totalorder %s5415_s28, %s5892_s5 }
  0x98   : > { %1443 = vmatpush.bf16.msra.mxu2 %v3949_v21  ;;  %v4085_v21 = vor.u32 %v4927_v13, %v4082_v14  ;;  %v3849_v13 = vor.u32 %v4869_v2, %v3848_v1  ;;  %v4016_v14 = vld [vmem:[#allocation7 + $0x44c] sm:$0xf]  ;;  %v4911_v15 = vld [vmem:[#allocation7 + $0x46c] sm:$0xf0]  ;;  %v4260_v1 = vld [vmem:[#allocation7 + $0x378] sm:$0xf]  ;;  %p5417_p1 = scmp.ne.s32.totalorder %s5415_s28, %s5416_s26  ;;  %p5422_p9 = scmp.lt.s32.totalorder %s5420_s8, %s5416_s26 }
  0x99   : > { %1457 = vmatpush.bf16.msra.mxu3 %v4045_v28  ;;  %v3884_v28 = vld [vmem:[#allocation7 + $0x134] sm:$0xf]  ;;  %v4200_v16 = vld [vmem:[#allocation7 + $0x210] sm:$0xf]  ;;  %v4017_v24 = vor.u32 %v4911_v15, %v4016_v14 }
  0x9a   : > { %928 = vmatpush.bf16.msra.mxu0 %v3753_v30  ;;  %v3881_v30 = vor.u32 %v4876_v20, %v3878_v22  ;;  %v3885_v37 = vor.u32 %v4878_v29, %v3884_v28  ;;  %v4866_v20 = vld [vmem:[#allocation7 + $0x34] sm:$0xf0]  ;;  %v4248_v14 = vld [vmem:[#allocation7 + $0x330] sm:$0xf]  ;;  %p5418_p4 = pnand %p5417_p1, %p5609_p5  ;;  %p5423_p2 = por %p5422_p9, %p5421_p11 }
  0x9b   : > { %1430 = vmatpush.bf16.msra.mxu1 %v3841_v34  ;;  %v3866_v34 = vld [vmem:[#allocation7 + $0x108] sm:$0xf0] }
  0x9c   : > { %1444 = vmatpush.bf16.msra.mxu2 %v3937_v35  ;;  %v4897_v35 = vld [vmem:[#allocation7 + $0x328] sm:$0xf]  ;;  %p5419_p8 = pneg %p5418_p4 }
  0x9d   : > { %1458 = vmatpush.bf16.msra.mxu3 %v4033_v42  ;;  %v3869_v42 = vor.u32 %v4873_v32, %v3866_v34  ;;  %v3965_v43 = vor.u32 %v4897_v35, %v3962_v36  ;;  %v4908_v32 = vld [vmem:[#allocation7 + $0x424] sm:$0xf0]  ;;  %v4955_v34 = vld [vmem:[#allocation7 + $0x1e8] sm:$0xf0] }
  0x9e   : > { %929 = vmatpush.bf16.msra.mxu0 %v3741_v46  ;;  %v3854_v46 = vld [vmem:[#allocation7 + $0xc0] sm:$0xf0]  ;;  %p5424_p10 = pnand %p5423_p2, %p5419_p8 }
  0x9f   : > { %1431 = vmatpush.bf16.msra.mxu1 %v3829_v50  ;;  %v4918_v50 = vld [vmem:[#allocation7 + $0x520] sm:$0xf] }
  0xa0   : > { %1445 = vmatpush.bf16.msra.mxu2 %v3925_v51  ;;  %v4046_v51 = vld [vmem:[#allocation7 + $0x540] sm:$0xf0] }
  0xa1   : > { %1459 = vmatpush.bf16.msra.mxu3 %v4021_v59  ;;  %930 = vmatmul.bf16.vlgmr.msra.gmra.mxu0 %v5669_v18  ;;  %v3842_v59 = vld [vmem:[#allocation7 + $0x78] sm:$0xf0] }
  0xa2   : > { %1466 = vmatpush.bf16.msrb.mxu0 %v3917_v54  ;;  %1432 = vmatmul.bf16.vlgmr.msra.gmra.mxu1 %v5659_v58  ;;  %v3857_v54 = vor.u32 %v4870_v44, %v3854_v46  ;;  %v3845_v3 = vor.u32 %v4867_v56, %v3842_v59  ;;  %v4905_v44 = vld [vmem:[#allocation7 + $0x3dc] sm:$0xf0]  ;;  %v4952_v46 = vld [vmem:[#allocation7 + $0x1a0] sm:$0xf0]  ;;  %v4902_v56 = vld [vmem:[#allocation7 + $0x394] sm:$0xf0] }
  0xa3   : > { %1480 = vmatpush.bf16.msrb.mxu1 %v4013_v55  ;;  %1446 = vmatmul.bf16.vlgmr.msra.gmra.mxu2 %v5664_v5  ;;  %v3953_v55 = vor.u32 %v4894_v47, %v3950_v48  ;;  %v4101_v47 = vor.u32 %v4932_v39, %v4100_v38  ;;  %v4949_v59 = vld [vmem:[#allocation7 + $0x158] sm:$0xf0]  ;;  %v4917_v38 = vld [vmem:[#allocation7 + $0x4fc] sm:$0xf0] }
  0xa4   : > { %1494 = vmatpush.bf16.msrb.mxu2 %v4109_v57  ;;  %1460 = vmatmul.bf16.vlgmr.msra.gmra.mxu3 %v5669_v18  ;;  %v4049_v57 = vor.u32 %v4918_v50, %v4046_v51  ;;  %v4088_v50 = vld [vmem:[#allocation7 + $0x5fc] sm:$0xf]  ;;  %v4929_v51 = vld [vmem:[#allocation7 + $0x61c] sm:$0xf0] }
  0xa5   : > { %1508 = vmatpush.bf16.msrb.mxu3 %v3921_v63  ;;  %v4915_v63 = vld [vmem:[#allocation7 + $0x4d8] sm:$0xf]  ;;  %v4224_v39 = vld [vmem:[#allocation7 + $0x2a0] sm:$0xf] }
  0xa6   : > { %1467 = vmatpush.bf16.msrb.mxu0 %v3905_v4  ;;  %v3941_v4 = vor.u32 %v4891_v60, %v3938_v61  ;;  %v4037_v9 = vor.u32 %v4915_v63, %v4034_v0  ;;  %v4089_v60 = vor.u32 %v4929_v51, %v4088_v50  ;;  %v4076_v63 = vld [vmem:[#allocation7 + $0x5b4] sm:$0xf]  ;;  %v4926_v0 = vld [vmem:[#allocation7 + $0x5d4] sm:$0xf0] }
  0xa7   : > { %1481 = vmatpush.bf16.msrb.mxu1 %v4001_v6  ;;  %v4864_v6 = vld [vmem:[#allocation7 + $0x10] sm:$0xf]  ;;  %v4298_v50 = vld [vmem:[#allocation7 + $0x474] sm:$0xf0]  ;;  %v4028_v51 = vld [vmem:[#allocation7 + $0x494] sm:$0xf] }
  0xa8   : > { %1495 = vmatpush.bf16.msrb.mxu2 %v4097_v8  ;;  %v4888_v8 = vld [vmem:[#allocation7 + $0x250] sm:$0xf] }
  0xa9   : > { %1509 = vmatpush.bf16.msrb.mxu3 %v3909_v12  ;;  %v4022_v12 = vld [vmem:[#allocation7 + $0x4b0] sm:$0xf0]  ;;  %v3929_v22 = vor.u32 %v4888_v8, %v3926_v10 }
  0xaa   : > { %1468 = vmatpush.bf16.msrb.mxu0 %v3893_v17  ;;  %v4958_v17 = vld [vmem:[#allocation7 + $0x230] sm:$0xf0]  ;;  %v4025_v23 = vor.u32 %v4912_v11, %v4022_v12  ;;  %v4064_v12 = vld [vmem:[#allocation7 + $0x56c] sm:$0xf] }
  0xab   : > { %1482 = vmatpush.bf16.msrb.mxu1 %v3989_v19  ;;  %v3836_v19 = vld [vmem:[#allocation7 + $0x14] sm:$0xf]  ;;  %v4201_v28 = vor.u32 %v4958_v17, %v4200_v16  ;;  %v3956_v17 = vld [vmem:[#allocation7 + $0x2e4] sm:$0xf] }
  0xac   : > { %1496 = vmatpush.bf16.msrb.mxu2 %v4085_v21  ;;  %v3833_v21 = vor.u32 %v4864_v6, %v3830_v7  ;;  %v3837_v29 = vor.u32 %v4866_v20, %v3836_v19  ;;  %v4899_v6 = vld [vmem:[#allocation7 + $0x34c] sm:$0xf0]  ;;  %v4946_v8 = vld [vmem:[#allocation7 + $0x110] sm:$0xf0]  ;;  %v4896_v19 = vld [vmem:[#allocation7 + $0x304] sm:$0xf0] }
  0xad   : > { %1510 = vmatpush.bf16.msrb.mxu3 %v3897_v25  ;;  %v4112_v25 = vld [vmem:[#allocation7 + $0x68c] sm:$0xf]  ;;  %v4152_v7 = vld [vmem:[#allocation7 + $0xf0] sm:$0xf]  ;;  %v4970_v16 = vld [vmem:[#allocation7 + $0x350] sm:$0xf0] }
  0xae   : > { %1469 = vmatpush.bf16.msrb.mxu0 %v3881_v30  ;;  %v4982_v30 = vld [vmem:[#allocation7 + $0x470] sm:$0xf0]  ;;  %v4113_v35 = vor.u32 %v4935_v26, %v4112_v25  ;;  %v4153_v15 = vor.u32 %v4946_v8, %v4152_v7  ;;  %v4140_v20 = vld [vmem:[#allocation7 + $0xa8] sm:$0xf]  ;;  %v4052_v25 = vld [vmem:[#allocation7 + $0x524] sm:$0xf] }
  0xaf   : > { %1483 = vmatpush.bf16.msrb.mxu1 %v3977_v31  ;;  %v4004_v31 = vld [vmem:[#allocation7 + $0x404] sm:$0xf]  ;;  %v4297_v36 = vor.u32 %v4982_v30, %v4296_v27  ;;  %v4920_v26 = vld [vmem:[#allocation7 + $0x544] sm:$0xf0]  ;;  %v3944_v30 = vld [vmem:[#allocation7 + $0x29c] sm:$0xf] }
  0xb0   : > { %1497 = vmatpush.bf16.msrb.mxu2 %v4073_v33  ;;  %v4188_v33 = vld [vmem:[#allocation7 + $0x1c8] sm:$0xf] }
  0xb1   : > { %1511 = vmatpush.bf16.msrb.mxu3 %v3885_v37  ;;  %v4005_v37 = vor.u32 %v4908_v32, %v4004_v31  ;;  %v4189_v41 = vor.u32 %v4955_v34, %v4188_v33  ;;  %v4236_v27 = vld [vmem:[#allocation7 + $0x2e8] sm:$0xf]  ;;  %v4893_v31 = vld [vmem:[#allocation7 + $0x2bc] sm:$0xf0]  ;;  %v4940_v33 = vld [vmem:[#allocation7 + $0x80] sm:$0xf0]  ;;  %v4053_v34 = vor.u32 %v4920_v26, %v4052_v25 }
  0xb2   : > { %1470 = vmatpush.bf16.msrb.mxu0 %v3869_v42  ;;  %v4979_v42 = vld [vmem:[#allocation7 + $0x428] sm:$0xf0]  ;;  %v4128_v32 = vld [vmem:[#allocation7 + $0x60] sm:$0xf]  ;;  %v4178_v25 = vld [vmem:[#allocation7 + $0x1a4] sm:$0xf0] }
  0xb3   : > { %1484 = vmatpush.bf16.msrb.mxu1 %v3965_v43  ;;  %v3992_v43 = vld [vmem:[#allocation7 + $0x3bc] sm:$0xf]  ;;  %v4285_v48 = vor.u32 %v4979_v42, %v4284_v40  ;;  %v4964_v40 = vld [vmem:[#allocation7 + $0x2c0] sm:$0xf0]  ;;  %v3932_v42 = vld [vmem:[#allocation7 + $0x254] sm:$0xf] }
  0xb4   : > { %1498 = vmatpush.bf16.msrb.mxu2 %v4061_v45  ;;  %v4176_v45 = vld [vmem:[#allocation7 + $0x180] sm:$0xf] }
  0xb5   : > { %1512 = vmatpush.bf16.msrb.mxu3 %v3873_v49  ;;  %v3993_v49 = vor.u32 %v4905_v44, %v3992_v43  ;;  %v4177_v53 = vor.u32 %v4952_v46, %v4176_v45  ;;  %v4890_v43 = vld [vmem:[#allocation7 + $0x274] sm:$0xf0]  ;;  %v4937_v45 = vld [vmem:[#allocation7 + $0x38] sm:$0xf0]  ;;  %v4392_v46 = vld [vmem:[#allocation7 + $0x690] sm:$0xf] }
  0xb6   : > { %1471 = vmatpush.bf16.msrb.mxu0 %v3857_v54  ;;  %v4976_v54 = vld [vmem:[#allocation7 + $0x3e0] sm:$0xf0]  ;;  %v4116_v44 = vld [vmem:[#allocation7 + $0x18] sm:$0xf] }
  0xb7   : > { %1485 = vmatpush.bf16.msrb.mxu1 %v3953_v55  ;;  %v3980_v55 = vld [vmem:[#allocation7 + $0x374] sm:$0xf]  ;;  %v4273_v61 = vor.u32 %v4976_v54, %v4272_v52  ;;  %v4225_v52 = vor.u32 %v4964_v40, %v4224_v39  ;;  %v4914_v54 = vld [vmem:[#allocation7 + $0x4b4] sm:$0xf0]  ;;  %v4358_v40 = vld [vmem:[#allocation7 + $0x5dc] sm:$0xf0] }
  0xb8   : > { %1499 = vmatpush.bf16.msrb.mxu2 %v4049_v57  ;;  %v4164_v57 = vld [vmem:[#allocation7 + $0x138] sm:$0xf] }
  0xb9   : > { %1513 = vmatpush.bf16.msrb.mxu3 %v3861_v62  ;;  %v3981_v62 = vor.u32 %v4902_v56, %v3980_v55  ;;  %v4165_v2 = vor.u32 %v4949_v59, %v4164_v57  ;;  %v4212_v55 = vld [vmem:[#allocation7 + $0x258] sm:$0xf]  ;;  %v4961_v56 = vld [vmem:[#allocation7 + $0x278] sm:$0xf0]  ;;  %v4117_v57 = vor.u32 %v4937_v45, %v4116_v44  ;;  %v5005_v59 = vld [vmem:[#allocation7 + $0x694] sm:$0xf] }
  0xba   : > { %1472 = vmatpush.bf16.msrb.mxu0 %v3845_v3  ;;  %v4973_v3 = vld [vmem:[#allocation7 + $0x398] sm:$0xf0]  ;;  %v4213_v7 = vor.u32 %v4961_v56, %v4212_v55  ;;  %v4250_v44 = vld [vmem:[#allocation7 + $0x354] sm:$0xf0]  ;;  %v4966_v55 = vld [vmem:[#allocation7 + $0x2ec] sm:$0xf] }
  0xbb   : > { %1486 = vmatpush.bf16.msrb.mxu1 %v3941_v4  ;;  %v3968_v4 = vld [vmem:[#allocation7 + $0x32c] sm:$0xf]  ;;  %v4261_v10 = vor.u32 %v4973_v3, %v4260_v1  ;;  %v4380_v1 = vld [vmem:[#allocation7 + $0x648] sm:$0xf]  ;;  %v4029_v3 = vor.u32 %v4914_v54, %v4028_v51  ;;  %v4238_v56 = vld [vmem:[#allocation7 + $0x30c] sm:$0xf0] }
  0xbc   : > { %1500 = vmatpush.bf16.msrb.mxu2 %v4037_v9  ;;  %v4077_v9 = vor.u32 %v4926_v0, %v4076_v63  ;;  %v3969_v11 = vor.u32 %v4899_v6, %v3968_v4  ;;  %v4394_v0 = vld [vmem:[#allocation7 + $0x6b4] sm:$0xf0]  ;;  %v4978_v4 = vld [vmem:[#allocation7 + $0x40c] sm:$0xf]  ;;  %v4286_v6 = vld [vmem:[#allocation7 + $0x42c] sm:$0xf0] }
  0xbd   : > { %1514 = vmatpush.bf16.msrb.mxu3 %v3849_v13  ;;  %v4923_v13 = vld [vmem:[#allocation7 + $0x58c] sm:$0xf0]  ;;  %v4991_v54 = vld [vmem:[#allocation7 + $0x548] sm:$0xf0] }
  0xbe   : > { %1473 = vmatpush.bf16.msrb.mxu0 %v3833_v21  ;;  %v4943_v21 = vld [vmem:[#allocation7 + $0xc8] sm:$0xf0] }
  0xbf   : > { %1487 = vmatpush.bf16.msrb.mxu1 %v3929_v22  ;;  %v4065_v22 = vor.u32 %v4923_v13, %v4064_v12  ;;  %v4190_v12 = vld [vmem:[#allocation7 + $0x1ec] sm:$0xf0] }
  0xc0   : > { %1501 = vmatpush.bf16.msrb.mxu2 %v4025_v23  ;;  %v4249_v23 = vor.u32 %v4970_v16, %v4248_v14  ;;  %v4289_v14 = vor.u32 %v4978_v4, %v4286_v6  ;;  %v4368_v16 = vld [vmem:[#allocation7 + $0x600] sm:$0xf]  ;;  %v4963_v4 = vld [vmem:[#allocation7 + $0x2a4] sm:$0xf]  ;;  %v4226_v6 = vld [vmem:[#allocation7 + $0x2c4] sm:$0xf0] }
  0xc1   : > { %1515 = vmatpush.bf16.msrb.mxu3 %v3837_v29  ;;  %1474 = vmatmul.bf16.vlgmr.msrb.gmra.mxu0 %v5659_v58  ;;  %v4967_v29 = vld [vmem:[#allocation7 + $0x308] sm:$0xf0] }
  0xc2   : > { %1522 = vmatpush.bf16.msra.mxu0 %v4017_v24  ;;  %1488 = vmatmul.bf16.vlgmr.msrb.gmra.mxu1 %v5664_v5  ;;  %v3957_v24 = vor.u32 %v4896_v19, %v3956_v17  ;;  %v5000_v17 = vld [vmem:[#allocation7 + $0x620] sm:$0xf0] }
  0xc3   : > { %1502 = vmatmul.bf16.vlgmr.msrb.gmra.mxu2 %v5669_v18  ;;  %1536 = vmatpush.bf16.msra.mxu1 %v4113_v35  ;;  %v4040_v35 = vld [vmem:[#allocation7 + $0x4dc] sm:$0xf]  ;;  %v4975_v19 = vld [vmem:[#allocation7 + $0x3c4] sm:$0xf]  ;;  %v4369_v26 = vor.u32 %v5000_v17, %v4368_v16  ;;  %v4322_v16 = vld [vmem:[#allocation7 + $0x504] sm:$0xf0] }
  0xc4   : > { %2038 = vmatpush.bf16.msra.mxu2 %v4201_v28  ;;  %1516 = vmatmul.bf16.vlgmr.msrb.gmra.mxu3 %v5659_v58  ;;  %v4141_v28 = vor.u32 %v4943_v21, %v4140_v20  ;;  %v4274_v20 = vld [vmem:[#allocation7 + $0x3e4] sm:$0xf0]  ;;  %v4308_v17 = vld [vmem:[#allocation7 + $0x498] sm:$0xf] }
  0xc5   : > { %2052 = vmatpush.bf16.msra.mxu3 %v4297_v36  ;;  %v4237_v36 = vor.u32 %v4967_v29, %v4236_v27  ;;  %v4277_v27 = vor.u32 %v4975_v19, %v4274_v20  ;;  %v4356_v29 = vld [vmem:[#allocation7 + $0x5b8] sm:$0xf]  ;;  %v4985_v19 = vld [vmem:[#allocation7 + $0x4b8] sm:$0xf0] }
  0xc6   : > { %1523 = vmatpush.bf16.msra.mxu0 %v4005_v37  ;;  %v3945_v37 = vor.u32 %v4893_v31, %v3944_v30  ;;  %v4997_v30 = vld [vmem:[#allocation7 + $0x5d8] sm:$0xf0] }
  0xc7   : > { %1537 = vmatpush.bf16.msra.mxu1 %v4101_v47  ;;  %v5006_v47 = vld [vmem:[#allocation7 + $0x6b0] sm:$0xf0]  ;;  %v4972_v31 = vld [vmem:[#allocation7 + $0x37c] sm:$0xf] }
  0xc8   : > { %2039 = vmatpush.bf16.msra.mxu2 %v4189_v41  ;;  %v4129_v41 = vor.u32 %v4940_v33, %v4128_v32  ;;  %v4262_v32 = vld [vmem:[#allocation7 + $0x39c] sm:$0xf0]  ;;  %v4960_v20 = vld [vmem:[#allocation7 + $0x25c] sm:$0xf] }
  0xc9   : > { %2053 = vmatpush.bf16.msra.mxu3 %v4285_v48  ;;  %v4041_v48 = vor.u32 %v4917_v38, %v4040_v35  ;;  %v4996_v35 = vld [vmem:[#allocation7 + $0x5bc] sm:$0xf]  ;;  %v4357_v38 = vor.u32 %v4997_v30, %v4356_v29  ;;  %v4265_v39 = vor.u32 %v4972_v31, %v4262_v32  ;;  %v4310_v29 = vld [vmem:[#allocation7 + $0x4bc] sm:$0xf0] }
  0xca   : > { %1524 = vmatpush.bf16.msra.mxu0 %v3993_v49  ;;  %v4981_v49 = vld [vmem:[#allocation7 + $0x454] sm:$0xf] }
  0xcb   : > { %1538 = vmatpush.bf16.msra.mxu1 %v4089_v60  ;;  %v4957_v60 = vld [vmem:[#allocation7 + $0x214] sm:$0xf]  ;;  %v4301_v63 = vor.u32 %v4981_v49, %v4298_v50  ;;  %v4154_v49 = vld [vmem:[#allocation7 + $0x114] sm:$0xf0] }
  0xcc   : > { %2040 = vmatpush.bf16.msra.mxu2 %v4177_v53  ;;  %v3933_v53 = vor.u32 %v4890_v43, %v3932_v42  ;;  %v4994_v42 = vld [vmem:[#allocation7 + $0x590] sm:$0xf0] }
  0xcd   : > { %2054 = vmatpush.bf16.msra.mxu3 %v4273_v61  ;;  %v4202_v61 = vld [vmem:[#allocation7 + $0x234] sm:$0xf0]  ;;  %v4969_v43 = vld [vmem:[#allocation7 + $0x334] sm:$0xf] }
  0xce   : > { %1525 = vmatpush.bf16.msra.mxu0 %v3981_v62  ;;  %v4393_v62 = vor.u32 %v5006_v47, %v4392_v46  ;;  %v4205_v8 = vor.u32 %v4957_v60, %v4202_v61  ;;  %v4361_v46 = vor.u32 %v4996_v35, %v4358_v40  ;;  %v4993_v47 = vld [vmem:[#allocation7 + $0x574] sm:$0xf]  ;;  %v4253_v51 = vor.u32 %v4969_v43, %v4250_v44  ;;  %v4990_v60 = vld [vmem:[#allocation7 + $0x52c] sm:$0xf] }
  0xcf   : > { %1539 = vmatpush.bf16.msra.mxu1 %v4077_v9  ;;  %v4397_v9 = vor.u32 %v5005_v59, %v4394_v0  ;;  %v4942_v61 = vld [vmem:[#allocation7 + $0xac] sm:$0xf]  ;;  %v4241_v0 = vor.u32 %v4966_v55, %v4238_v56 }
  0xd0   : > { %2041 = vmatpush.bf16.msra.mxu2 %v4165_v2  ;;  %v5003_v2 = vld [vmem:[#allocation7 + $0x668] sm:$0xf0] }
  0xd1   : > { %2055 = vmatpush.bf16.msra.mxu3 %v4261_v10  ;;  %v5002_v10 = vld [vmem:[#allocation7 + $0x64c] sm:$0xf]  ;;  %v4381_v13 = vor.u32 %v5003_v2, %v4380_v1  ;;  %v4334_v1 = vld [vmem:[#allocation7 + $0x54c] sm:$0xf0]  ;;  %v4320_v2 = vld [vmem:[#allocation7 + $0x4e0] sm:$0xf] }
  0xd2   : > { %1526 = vmatpush.bf16.msra.mxu0 %v3969_v11  ;;  %v4954_v11 = vld [vmem:[#allocation7 + $0x1cc] sm:$0xf] }
  0xd3   : > { %1540 = vmatpush.bf16.msra.mxu1 %v4065_v22  ;;  %v4193_v21 = vor.u32 %v4954_v11, %v4190_v12  ;;  %v4987_v11 = vld [vmem:[#allocation7 + $0x4e4] sm:$0xf] }
  0xd4   : > { %2042 = vmatpush.bf16.msra.mxu2 %v4153_v15  ;;  %v4382_v15 = vld [vmem:[#allocation7 + $0x66c] sm:$0xf0]  ;;  %v4939_v12 = vld [vmem:[#allocation7 + $0x64] sm:$0xf] }
  0xd5   : > { %2056 = vmatpush.bf16.msra.mxu3 %v4249_v23  ;;  %v4385_v22 = vor.u32 %v5002_v10, %v4382_v15  ;;  %v4999_v23 = vld [vmem:[#allocation7 + $0x604] sm:$0xf]  ;;  %v4229_v15 = vor.u32 %v4963_v4, %v4226_v6  ;;  %v4388_v6 = vld [vmem:[#allocation7 + $0x650] sm:$0xf] }
  0xd6   : > { %1527 = vmatpush.bf16.msra.mxu0 %v3957_v24  ;;  %v4951_v24 = vld [vmem:[#allocation7 + $0x184] sm:$0xf] }
  0xd7   : > { %1541 = vmatpush.bf16.msra.mxu1 %v4053_v34  ;;  %v4181_v33 = vor.u32 %v4951_v24, %v4178_v25  ;;  %v4936_v24 = vld [vmem:[#allocation7 + $0x1c] sm:$0xf]  ;;  %v4118_v25 = vld [vmem:[#allocation7 + $0x3c] sm:$0xf0] }
  0xd8   : > { %2043 = vmatpush.bf16.msra.mxu2 %v4141_v28  ;;  %v4370_v28 = vld [vmem:[#allocation7 + $0x624] sm:$0xf0]  ;;  %v4121_v30 = vor.u32 %v4936_v24, %v4118_v25  ;;  %v4340_v24 = vld [vmem:[#allocation7 + $0x530] sm:$0xf]  ;;  %v4992_v25 = vld [vmem:[#allocation7 + $0x550] sm:$0xf0] }
  0xd9   : > { %2057 = vmatpush.bf16.msra.mxu3 %v4237_v36  ;;  %v4373_v34 = vor.u32 %v4999_v23, %v4370_v28  ;;  %v4948_v36 = vld [vmem:[#allocation7 + $0x13c] sm:$0xf]  ;;  %v4325_v23 = vor.u32 %v4987_v11, %v4322_v16 }
  0xda   : > { %1528 = vmatpush.bf16.msra.mxu0 %v3945_v37  ;;  %v4166_v37 = vld [vmem:[#allocation7 + $0x15c] sm:$0xf0]  ;;  %v4984_v28 = vld [vmem:[#allocation7 + $0x49c] sm:$0xf] }
  0xdb   : > { %1542 = vmatpush.bf16.msra.mxu1 %v4041_v48  ;;  %v4169_v45 = vor.u32 %v4948_v36, %v4166_v37  ;;  %v4945_v48 = vld [vmem:[#allocation7 + $0xf4] sm:$0xf]  ;;  %v4313_v31 = vor.u32 %v4984_v28, %v4310_v29 }
  0xdc   : > { %2044 = vmatpush.bf16.msra.mxu2 %v4129_v41  ;;  %v4344_v41 = vld [vmem:[#allocation7 + $0x570] sm:$0xf] }
  0xdd   : > { %2058 = vmatpush.bf16.msra.mxu3 %v4225_v52  ;;  %v4345_v50 = vor.u32 %v4994_v42, %v4344_v41  ;;  %v4346_v52 = vld [vmem:[#allocation7 + $0x594] sm:$0xf0] }
  0xde   : > { %1529 = vmatpush.bf16.msra.mxu0 %v3933_v53  ;;  %v4332_v53 = vld [vmem:[#allocation7 + $0x528] sm:$0xf]  ;;  %v4349_v59 = vor.u32 %v4993_v47, %v4346_v52 }
  0xdf   : > { %1543 = vmatpush.bf16.msra.mxu1 %v4029_v3  ;;  %v4988_v3 = vld [vmem:[#allocation7 + $0x500] sm:$0xf0]  ;;  %v833_v10 = vpop.f32.mrf.mxu1 }
  0xe0   : > { %2045 = vmatpush.bf16.msra.mxu2 %v4117_v57  ;;  %v4157_v57 = vor.u32 %v4945_v48, %v4154_v49 }
  0xe1   : > { %1530 = vmatmul.bf16.vlgmr.msra.gmra.mxu0 %v5664_v5  ;;  %2059 = vmatpush.bf16.msra.mxu3 %v4213_v7  ;;  %v819_v7 = vpop.f32.mrf.mxu0 }
  0xe2   : > { %2066 = vmatpush.bf16.msrb.mxu0 %v4393_v62  ;;  %1544 = vmatmul.bf16.vlgmr.msra.gmra.mxu1 %v5669_v18  ;;  %v4142_v62 = vld [vmem:[#allocation7 + $0xcc] sm:$0xf0]  ;;  %v834_v35 = vadd.f32 %v833_v10, %v819_v7  ;;  %v5004_v7 = vld [vmem:[#allocation7 + $0x670] sm:$0xf0]  ;;  %v5001_v10 = vld [vmem:[#allocation7 + $0x628] sm:$0xf0] }
  0xe3   : > { %2080 = vmatpush.bf16.msrb.mxu1 %v4205_v8  ;;  %2046 = vmatmul.bf16.vlgmr.msra.gmra.mxu2 %v5659_v58  ;;  %v4145_v8 = vor.u32 %v4942_v61, %v4142_v62 }
  0xe4   : > { %2094 = vmatpush.bf16.msrb.mxu2 %v4301_v63  ;;  %2060 = vmatmul.bf16.vlgmr.msra.gmra.mxu3 %v5664_v5  ;;  %v4333_v63 = vor.u32 %v4991_v54, %v4332_v53 }
  0xe5   : > { %2108 = vmatpush.bf16.msrb.mxu3 %v4397_v9  ;;  %v4337_v9 = vor.u32 %v4990_v60, %v4334_v1  ;;  %v4400_v1 = vld [vmem:[#allocation7 + $0x698] sm:$0xf] }
  0xe6   : > { %2067 = vmatpush.bf16.msrb.mxu0 %v4381_v13  ;;  %v4130_v13 = vld [vmem:[#allocation7 + $0x84] sm:$0xf0]  ;;  %v847_v36 = vpop.f32.mrf.mxu2 }
  0xe7   : > { %2081 = vmatpush.bf16.msrb.mxu1 %v4193_v21  ;;  %v4214_v21 = vld [vmem:[#allocation7 + $0x27c] sm:$0xf0] }
  0xe8   : > { %2095 = vmatpush.bf16.msrb.mxu2 %v4289_v14  ;;  %v4321_v14 = vor.u32 %v4988_v3, %v4320_v2  ;;  %v5007_v2 = vld [vmem:[#allocation7 + $0x6b8] sm:$0xf0] }
  0xe9   : > { %2109 = vmatpush.bf16.msrb.mxu3 %v4385_v22  ;;  %v4133_v22 = vor.u32 %v4939_v12, %v4130_v13  ;;  %v821_v32 = vpop.f32.mrf.mxu0  ;;  %v4401_v4 = vor.u32 %v5007_v2, %v4400_v1  ;;  %v4364_v13 = vld [vmem:[#allocation7 + $0x5c0] sm:$0xf] }
  0xea   : > { %2068 = vmatpush.bf16.msrb.mxu0 %v4369_v26  ;;  %v4309_v26 = vor.u32 %v4985_v19, %v4308_v17  ;;  %v4352_v17 = vld [vmem:[#allocation7 + $0x578] sm:$0xf]  ;;  %v4995_v19 = vld [vmem:[#allocation7 + $0x598] sm:$0xf0] }
  0xeb   : > { %2082 = vmatpush.bf16.msrb.mxu1 %v4181_v33  ;;  %v835_v33 = vpop.f32.mrf.mxu1 }
  0xec   : > { %2096 = vmatpush.bf16.msrb.mxu2 %v4277_v27  ;;  %v4217_v27 = vor.u32 %v4960_v20, %v4214_v21  ;;  %v836_v44 = vadd.f32 %v835_v33, %v821_v32  ;;  %v4353_v21 = vor.u32 %v4995_v19, %v4352_v17 }
  0xed   : > { %2110 = vmatpush.bf16.msrb.mxu3 %v4373_v34  ;;  %v861_v34 = vpop.f32.mrf.mxu3 }
  0xee   : > { %2069 = vmatpush.bf16.msrb.mxu0 %v4357_v38  ;;  %v848_v38 = vadd.f32 %v847_v36, %v834_v35 }
  0xef   : > { %2083 = vmatpush.bf16.msrb.mxu1 %v4169_v45  ;;  %v849_v45 = vpop.f32.mrf.mxu2 }
  0xf0   : > { %2097 = vmatpush.bf16.msrb.mxu2 %v4265_v39  ;;  %v850_v49 = vadd.f32 %v849_v45, %v836_v44 }
  0xf1   : > { %2111 = vmatpush.bf16.msrb.mxu3 %v4361_v46 }
  0xf2   : > { %2070 = vmatpush.bf16.msrb.mxu0 %v4345_v50 }
  0xf3   : > { %2084 = vmatpush.bf16.msrb.mxu1 %v4157_v57 }
  0xf4   : > { %2098 = vmatpush.bf16.msrb.mxu2 %v4253_v51 }
  0xf5   : > { %2112 = vmatpush.bf16.msrb.mxu3 %v4349_v59  ;;  %v863_v43 = vpop.f32.mrf.mxu3 }
  0xf6   : > { %2071 = vmatpush.bf16.msrb.mxu0 %v4333_v63 }
  0xf7   : > { %2085 = vmatpush.bf16.msrb.mxu1 %v4145_v8  ;;  %v4389_v8 = vor.u32 %v5004_v7, %v4388_v6 }
  0xf8   : > { %2099 = vmatpush.bf16.msrb.mxu2 %v4241_v0 }
  0xf9   : > { %2113 = vmatpush.bf16.msrb.mxu3 %v4337_v9  ;;  %v4376_v9 = vld [vmem:[#allocation7 + $0x608] sm:$0xf] }
  0xfa   : > { %2072 = vmatpush.bf16.msrb.mxu0 %v4321_v14  ;;  %v4377_v12 = vor.u32 %v5001_v10, %v4376_v9  ;;  %v4998_v14 = vld [vmem:[#allocation7 + $0x5e0] sm:$0xf0] }
  0xfb   : > { %2086 = vmatpush.bf16.msrb.mxu1 %v4133_v22  ;;  %v4365_v16 = vor.u32 %v4998_v14, %v4364_v13 }
  0xfc   : > { %2100 = vmatpush.bf16.msrb.mxu2 %v4229_v15 }
  0xfd   : > { %2114 = vmatpush.bf16.msrb.mxu3 %v4325_v23 }
  0xfe   : > { %2073 = vmatpush.bf16.msrb.mxu0 %v4309_v26  ;;  %v875_v37 = vpop.f32.mrf.mxu0 }
  0xff   : > { %2087 = vmatpush.bf16.msrb.mxu1 %v4121_v30  ;;  %v876_v39 = vadd.f32 %v875_v37, %v861_v34  ;;  %v889_v40 = vpop.f32.mrf.mxu1  ;;  %v4328_v30 = vld [vmem:[#allocation7 + $0x4e8] sm:$0xf]  ;;  %v4316_v37 = vld [vmem:[#allocation7 + $0x4a0] sm:$0xf] }
 0x100   : > { %2101 = vmatpush.bf16.msrb.mxu2 %v4217_v27  ;;  %v4341_v27 = vor.u32 %v4992_v25, %v4340_v24 }
 0x101   : > { %2074 = vmatmul.bf16.vlgmr.msrb.gmra.mxu0 %v5669_v18  ;;  %2115 = vmatpush.bf16.msrb.mxu3 %v4313_v31  ;;  %v890_v41 = vadd.f32 %v889_v40, %v876_v39  ;;  %v4989_v31 = vld [vmem:[#allocation7 + $0x508] sm:$0xf0] }
 0x102   : > { %2088 = vmatmul.bf16.vlgmr.msrb.gmra.mxu1 %v5659_v58  ;;  %v4329_v33 = vor.u32 %v4989_v31, %v4328_v30  ;;  %v4208_v31 = vld [vmem:[#allocation7 + $0x218] sm:$0xf] }
 0x103   : > { %2102 = vmatmul.bf16.vlgmr.msrb.gmra.mxu2 %v5664_v5  ;;  %v936_v42 = vpack.c.bf16 %v890_v41, %v848_v38  ;;  %v4986_v38 = vld [vmem:[#allocation7 + $0x4c0] sm:$0xf0] }
 0x104   : > { %2116 = vmatmul.bf16.vlgmr.msrb.gmra.mxu3 %v5669_v18  ;;  %2150 = vmatpush.bf16.msra.mxu2 %v4401_v4  ;;  %v4317_v41 = vor.u32 %v4986_v38, %v4316_v37  ;;  %v4956_v37 = vld [vmem:[#allocation7 + $0x1f0] sm:$0xf0] }
 0x105   : > { %940 = vst [vmem:[#allocation2] sm:$0xff] %v936_v42 }
 0x106   : > { %v877_v46 = vpop.f32.mrf.mxu0  ;;  %v903_v53 = vpop.f32.mrf.mxu2 }
 0x107   : > { %v878_v47 = vadd.f32 %v877_v46, %v863_v43  ;;  %v891_v48 = vpop.f32.mrf.mxu1  ;;  %v917_v52 = vpop.f32.mrf.mxu3 }
 0x108   : > { %v918_v54 = vadd.f32 %v917_v52, %v903_v53  ;;  %2151 = vmatpush.bf16.msra.mxu2 %v4389_v8 }
 0x109   : > { %v892_v50 = vadd.f32 %v891_v48, %v878_v47 }
 0x10b   : > { %v938_v51 = vpack.c.bf16 %v892_v50, %v850_v49 }
 0x10c   : > { %2152 = vmatpush.bf16.msra.mxu2 %v4377_v12  ;;  %v4418_v4 = vld [vmem:[#allocation2] sm:$0xf] }
 0x10d   : > { %942 = vst [vmem:[#allocation2 + $0x24] sm:$0xff] %v938_v51  ;;  %v4404_v6 = vld [vmem:[#allocation2] sm:$0xf] }
 0x10e   : > { %v905_v60 = vpop.f32.mrf.mxu2 }
 0x10f   : > { %v919_v59 = vpop.f32.mrf.mxu3 }
 0x110   : > { %v920_v61 = vadd.f32 %v919_v59, %v905_v60  ;;  %2153 = vmatpush.bf16.msra.mxu2 %v4365_v16 }
 0x114   : > { %2154 = vmatpush.bf16.msra.mxu2 %v4353_v21  ;;  %v5010_v1 = vld [vmem:[#allocation2 + $0x20] sm:$0xf0]  ;;  %v5019_v13 = vld [vmem:[#allocation2 + $0x24] sm:$0xf0] }
 0x115   : > { %v4405_v8 = vor.u32 %v5010_v1, %v4404_v6 }
 0x118   : > { %2155 = vmatpush.bf16.msra.mxu2 %v4341_v27 }
 0x11c   : > { %2156 = vmatpush.bf16.msra.mxu2 %v4329_v33  ;;  %v4196_v33 = vld [vmem:[#allocation7 + $0x1d0] sm:$0xf] }
 0x11e   : > { %v931_v55 = vpop.f32.mrf.mxu0 }
 0x11f   : > { %v932_v56 = vadd.f32 %v931_v55, %v918_v54  ;;  %v1433_v3 = vpop.f32.mrf.mxu1 }
 0x120   : > { %2157 = vmatpush.bf16.msra.mxu2 %v4317_v41  ;;  %v4184_v41 = vld [vmem:[#allocation7 + $0x188] sm:$0xf] }
 0x121   : > { %v937_v57 = vpack.c.bf16 %v932_v56, %v932_v56 }
 0x123   : > { %941 = vst [vmem:[#allocation2 + $0x8] sm:$0xf] %v937_v57  ;;  %2158 = vmatmul.bf16.vlgmr.msra.gmra.mxu2 %v5669_v18 }
 0x126   : > { %v933_v62 = vpop.f32.mrf.mxu0  ;;  %v1447_v11 = vpop.f32.mrf.mxu2 }
 0x127   : > { %v934_v63 = vadd.f32 %v933_v62, %v920_v61  ;;  %v1435_v15 = vpop.f32.mrf.mxu1  ;;  %v1461_v26 = vpop.f32.mrf.mxu3  ;;  %v1448_v28 = vadd.f32 %v1447_v11, %v1433_v3 }
 0x129   : > { %v939_v0 = vpack.c.bf16 %v934_v63, %v934_v63  ;;  %v1462_v34 = vadd.f32 %v1461_v26, %v1448_v28 }
 0x12a   : > { %v4460_v30 = vld [vmem:[#allocation2 + $0x8] sm:$0xf] }
 0x12b   : > { %943 = vst [vmem:[#allocation2 + $0x2c] sm:$0xf] %v939_v0  ;;  %v5013_v0 = vld [vmem:[#allocation2 + $0x20] sm:$0xf0] }
 0x12c   : > { %v4419_v7 = vor.u32 %v5013_v0, %v4418_v4  ;;  %v4947_v4 = vld [vmem:[#allocation7 + $0x118] sm:$0xf0] }
 0x12e   : > { %v1449_v20 = vpop.f32.mrf.mxu2 }
 0x12f   : > { %v1450_v42 = vadd.f32 %v1449_v20, %v1435_v15  ;;  %v1463_v43 = vpop.f32.mrf.mxu3  ;;  %v4446_v15 = vld [vmem:[#allocation2 + $0x4] sm:$0xf] }
 0x130   : > { %v4447_v16 = vor.u32 %v5019_v13, %v4446_v15  ;;  %v4941_v13 = vld [vmem:[#allocation7 + $0x88] sm:$0xf0]  ;;  %v4124_v15 = vld [vmem:[#allocation7 + $0x20] sm:$0xf] }
 0x131   : > { %v1464_v46 = vadd.f32 %v1463_v43, %v1450_v42  ;;  %v4953_v42 = vld [vmem:[#allocation7 + $0x1a8] sm:$0xf0] }
 0x132   : > { %v5025_v20 = vld [vmem:[#allocation2 + $0x28] sm:$0xf0] }
 0x13e   : > { %v1475_v22 = vpop.f32.mrf.mxu0 }
 0x13f   : > { %v1489_v23 = vpop.f32.mrf.mxu1 }
 0x140   : > { %v1490_v29 = vadd.f32 %v1489_v23, %v1475_v22  ;;  %v4474_v22 = vld [vmem:[#allocation2 + $0x8] sm:$0xf] }
 0x141   : > { %v4475_v23 = vor.u32 %v5025_v20, %v4474_v22 }
 0x146   : > { %v1503_v32 = vpop.f32.mrf.mxu2  ;;  %v1477_v39 = vpop.f32.mrf.mxu0 }
 0x147   : > { %v1504_v35 = vadd.f32 %v1503_v32, %v1490_v29  ;;  %v1491_v40 = vpop.f32.mrf.mxu1  ;;  %v1517_v49 = vpop.f32.mrf.mxu3  ;;  %v5022_v29 = vld [vmem:[#allocation2 + $0x28] sm:$0xf0] }
 0x148   : > { %v1492_v44 = vadd.f32 %v1491_v40, %v1477_v39  ;;  %v4959_v32 = vld [vmem:[#allocation7 + $0x238] sm:$0xf0]  ;;  %v4197_v40 = vor.u32 %v4956_v37, %v4196_v33 }
 0x149   : > { %v1550_v36 = vpack.c.bf16 %v1504_v35, %v1462_v34  ;;  %v4461_v34 = vor.u32 %v5022_v29, %v4460_v30 }
 0x14b   : > { %1554 = vst [vmem:[#allocation2 + $0xc] sm:$0xff] %v1550_v36  ;;  %v4209_v36 = vor.u32 %v4959_v32, %v4208_v31 }
 0x14d   : > { %2122 = vmatpush.bf16.msra.mxu0 %v4209_v36 }
 0x14e   : > { %v1505_v45 = vpop.f32.mrf.mxu2 }
 0x14f   : > { %v1506_v47 = vadd.f32 %v1505_v45, %v1492_v44  ;;  %v1519_v3 = vpop.f32.mrf.mxu3 }
 0x151   : > { %v1552_v48 = vpack.c.bf16 %v1506_v47, %v1464_v46  ;;  %2123 = vmatpush.bf16.msra.mxu0 %v4197_v40  ;;  %v4185_v46 = vor.u32 %v4953_v42, %v4184_v41 }
 0x152   : > { %v4450_v50 = vld [vmem:[#allocation2 + $0x10] sm:$0xf]  ;;  %v4422_v51 = vld [vmem:[#allocation2 + $0xc] sm:$0xf] }
 0x153   : > { %1556 = vst [vmem:[#allocation2 + $0x30] sm:$0xff] %v1552_v48  ;;  %v4408_v52 = vld [vmem:[#allocation2 + $0xc] sm:$0xf]  ;;  %v4172_v48 = vld [vmem:[#allocation7 + $0x140] sm:$0xf] }
 0x154   : > { %v4436_v0 = vld [vmem:[#allocation2 + $0x10] sm:$0xf] }
 0x155   : > { %2124 = vmatpush.bf16.msra.mxu0 %v4185_v46  ;;  %v4292_v46 = vld [vmem:[#allocation7 + $0x410] sm:$0xf] }
 0x15a   : > { %v5017_v53 = vld [vmem:[#allocation2 + $0x30] sm:$0xf0]  ;;  %v5011_v54 = vld [vmem:[#allocation2 + $0x2c] sm:$0xf0] }
 0x15b   : > { %v5008_v55 = vld [vmem:[#allocation2 + $0x2c] sm:$0xf0]  ;;  %v4451_v56 = vor.u32 %v5017_v53, %v4450_v50  ;;  %v4423_v57 = vor.u32 %v5011_v54, %v4422_v51 }
 0x15c   : > { %v4409_v59 = vor.u32 %v5008_v55, %v4408_v52 }
 0x15d   : > { %2474 = vrot.lane.b32.xlu2 %v4451_v56, %s5486_s24  ;;  %2283 = vrot.lane.b32.xlu1 %v4423_v57, %s5486_s24 }
 0x15e   : > { %v1531_v60 = vpop.f32.mrf.mxu0  ;;  %v2195_v18 = vsel %vm2190_vm0, %v4409_v59, 0 }
 0x15f   : > { %v1532_v61 = vadd.f32 %v1531_v60, %v1517_v49  ;;  %2204 = vmatpush.bf16.xpose.msra.mxu3 %v2195_v18  ;;  %v1545_v62 = vpop.f32.mrf.mxu1  ;;  %v4950_v49 = vld [vmem:[#allocation7 + $0x160] sm:$0xf0] }
 0x160   : > { %v4173_v54 = vor.u32 %v4950_v49, %v4172_v48 }
 0x161   : > { %v1546_v63 = vadd.f32 %v1545_v62, %v1532_v61  ;;  %v5014_v62 = vld [vmem:[#allocation2 + $0x30] sm:$0xf0] }
 0x162   : > { %2125 = vmatpush.bf16.msra.mxu0 %v4173_v54  ;;  %v4437_v1 = vor.u32 %v5014_v62, %v4436_v0  ;;  %v4977_v54 = vld [vmem:[#allocation7 + $0x3e8] sm:$0xf0]  ;;  %v4256_v0 = vld [vmem:[#allocation7 + $0x338] sm:$0xf] }
 0x163   : > { %v1551_v2 = vpack.c.bf16 %v1546_v63, %v1546_v63 }
 0x165   : > { %1555 = vst [vmem:[#allocation2 + $0x14] sm:$0xf] %v1551_v2  ;;  %2276 = vrot.lane.b32.xlu1 %v4419_v7, %s5486_s24 }
 0x166   : > { %v1533_v9 = vpop.f32.mrf.mxu0  ;;  %4410 = vmatmul.msk.bf16.vlgmr.msra.gmra.mxu3 %vm2190_vm0, %v4405_v8  ;;  %v2047_v17 = vpop.f32.mrf.mxu2  ;;  %v4148_v8 = vld [vmem:[#allocation7 + $0xb0] sm:$0xf] }
 0x167   : > { %v1534_v10 = vadd.f32 %v1533_v9, %v1519_v3  ;;  %v1547_v11 = vpop.f32.mrf.mxu1  ;;  %v2061_v19 = vpop.f32.mrf.mxu3  ;;  %v4160_v3 = vld [vmem:[#allocation7 + $0xf8] sm:$0xf]  ;;  %v4944_v9 = vld [vmem:[#allocation7 + $0xd0] sm:$0xf0] }
 0x168   : > { %v2062_v39 = vadd.f32 %v2061_v19, %v2047_v17  ;;  %v4161_v7 = vor.u32 %v4947_v4, %v4160_v3 }
 0x169   : > { %v1548_v12 = vadd.f32 %v1547_v11, %v1534_v10  ;;  %v2388_v10 = vsel %vm2190_vm0, %v4437_v1, 0  ;;  %v4149_v11 = vor.u32 %v4944_v9, %v4148_v8  ;;  %v4971_v1 = vld [vmem:[#allocation7 + $0x358] sm:$0xf0]  ;;  %v4244_v9 = vld [vmem:[#allocation7 + $0x2f0] sm:$0xf] }
 0x16a   : > { %2126 = vmatpush.bf16.msra.mxu0 %v4161_v7  ;;  %v4257_v3 = vor.u32 %v4971_v1, %v4256_v0 }
 0x16b   : > { %v1553_v14 = vpack.c.bf16 %v1548_v12, %v1548_v12  ;;  %v4136_v12 = vld [vmem:[#allocation7 + $0x68] sm:$0xf] }
 0x16c   : > { %v4464_v21 = vld [vmem:[#allocation2 + $0x14] sm:$0xf] }
 0x16d   : > { %1557 = vst [vmem:[#allocation2 + $0x38] sm:$0xf] %v1553_v14  ;;  %2467 = vrot.lane.b32.xlu1 %v4447_v16, %s5486_s24  ;;  %v4137_v14 = vor.u32 %v4941_v13, %v4136_v12  ;;  %v4938_v16 = vld [vmem:[#allocation7 + $0x40] sm:$0xf0]  ;;  %v4232_v12 = vld [vmem:[#allocation7 + $0x2a8] sm:$0xf] }
 0x16e   : > { %v2049_v27 = vpop.f32.mrf.mxu2  ;;  %2127 = vmatpush.bf16.msra.mxu0 %v4149_v11  ;;  %v4125_v17 = vor.u32 %v4938_v16, %v4124_v15  ;;  %v4965_v13 = vld [vmem:[#allocation7 + $0x2c8] sm:$0xf0]  ;;  %v4220_v15 = vld [vmem:[#allocation7 + $0x260] sm:$0xf]  ;;  %v4962_v16 = vld [vmem:[#allocation7 + $0x280] sm:$0xf0] }
 0x16f   : > { %v2063_v28 = vpop.f32.mrf.mxu3 }
 0x170   : > { %v2064_v51 = vadd.f32 %v2063_v28, %v2049_v27  ;;  %v5713_v28 = vld [vmem:[#allocation12 + $0x8] sm:$0xff] }
 0x172   : > { %2128 = vmatpush.bf16.msra.mxu0 %v4137_v14  ;;  %v4233_v14 = vor.u32 %v4965_v13, %v4232_v12 }
 0x174   : > { %v5020_v24 = vld [vmem:[#allocation2 + $0x34] sm:$0xf0] }
 0x175   : > { %v4465_v25 = vor.u32 %v5020_v24, %v4464_v21  ;;  %2657 = vrot.lane.b32.xlu1 %v4475_v23, %s5486_s24  ;;  %v5708_v24 = vld [vmem:[#allocation12] sm:$0xff] }
 0x176   : > { %2129 = vmatpush.bf16.msra.mxu0 %v4125_v17  ;;  %v5023_v7 = vld [vmem:[#allocation2 + $0x34] sm:$0xf0]  ;;  %v4221_v17 = vor.u32 %v4962_v16, %v4220_v15 }
 0x177   : > { %v2578_v26 = vsel %vm2190_vm0, %v4465_v25, 0 }
 0x178   : > { %2587 = vmatpush.bf16.xpose.msrb.mxu2 %v2578_v26 }
 0x179   : > { %2130 = vmatmul.bf16.vlgmr.msra.gmra.mxu0 %v5659_v58 }
 0x17e   : > { %v2075_v38 = vpop.f32.mrf.mxu0 }
 0x17f   : > { %v2089_v35 = vpop.f32.mrf.mxu1  ;;  %4466 = vmatmul.msk.bf16.vlgmr.msrb.gmra.mxu2 %vm2190_vm0, %v4461_v34  ;;  %v2076_v45 = vadd.f32 %v2075_v38, %v2062_v39 }
 0x186   : > { %v2103_v43 = vpop.f32.mrf.mxu2  ;;  %v2077_v55 = vpop.f32.mrf.mxu0 }
 0x187   : > { %v2104_v44 = vadd.f32 %v2103_v43, %v2089_v35  ;;  %v2117_v47 = vpop.f32.mrf.mxu3  ;;  %v2091_v53 = vpop.f32.mrf.mxu1  ;;  %v2078_v59 = vadd.f32 %v2077_v55, %v2064_v51  ;;  %v4304_v43 = vld [vmem:[#allocation7 + $0x458] sm:$0xf] }
 0x189   : > { %v2118_v50 = vadd.f32 %v2117_v47, %v2104_v44  ;;  %v4983_v44 = vld [vmem:[#allocation7 + $0x478] sm:$0xf0]  ;;  %v4980_v47 = vld [vmem:[#allocation7 + $0x430] sm:$0xf0] }
 0x18b   : > { %v2164_v52 = vpack.c.bf16 %v2118_v50, %v2076_v45  ;;  %v4305_v45 = vor.u32 %v4983_v44, %v4304_v43 }
 0x18d   : > { %2168 = vst [vmem:[#allocation2 + $0x18] sm:$0xff] %v2164_v52  ;;  %2136 = vmatpush.bf16.msra.mxu1 %v4305_v45  ;;  %v4293_v52 = vor.u32 %v4980_v47, %v4292_v46 }
 0x18e   : > { %v2105_v56 = vpop.f32.mrf.mxu2 }
 0x18f   : > { %v2106_v57 = vadd.f32 %v2105_v56, %v2091_v53  ;;  %v2119_v60 = vpop.f32.mrf.mxu3  ;;  %v4280_v53 = vld [vmem:[#allocation7 + $0x3c8] sm:$0xf] }
 0x190   : > { %v4281_v56 = vor.u32 %v4977_v54, %v4280_v53 }
 0x191   : > { %v2120_v61 = vadd.f32 %v2119_v60, %v2106_v57  ;;  %2137 = vmatpush.bf16.msra.mxu1 %v4293_v52  ;;  %v4268_v57 = vld [vmem:[#allocation7 + $0x380] sm:$0xf] }
 0x193   : > { %v2166_v18 = vpack.c.bf16 %v2120_v61, %v2078_v59  ;;  %v4974_v59 = vld [vmem:[#allocation7 + $0x3a0] sm:$0xf0] }
 0x194   : > { %v4413_v63 = vld [vmem:[#allocation2 + $0x18] sm:$0xf]  ;;  %v4269_v62 = vor.u32 %v4974_v59, %v4268_v57 }
 0x195   : > { %2170 = vst [vmem:[#allocation2 + $0x3c] sm:$0xff] %v2166_v18  ;;  %2138 = vmatpush.bf16.msra.mxu1 %v4281_v56 }
 0x199   : > { %2139 = vmatpush.bf16.msra.mxu1 %v4269_v62 }
 0x19c   : > { %v5009_v2 = vld [vmem:[#allocation2 + $0x38] sm:$0xf0] }
 0x19d   : > { %v4414_v6 = vor.u32 %v5009_v2, %v4413_v63  ;;  %2140 = vmatpush.bf16.msra.mxu1 %v4257_v3 }
 0x19f   : > { %2251 = vmatpush.bf16.msrb.mxu3 %v4414_v6  ;;  %v4478_v6 = vld [vmem:[#allocation2 + $0x14] sm:$0xf] }
 0x1a0   : > { %v4479_v8 = vor.u32 %v5023_v7, %v4478_v6 }
 0x1a3   : > { %2397 = vmatpush.bf16.xpose.msra.mxu3 %v2388_v10  ;;  %v4968_v10 = vld [vmem:[#allocation7 + $0x310] sm:$0xf0] }
 0x1a4   : > { %v4245_v11 = vor.u32 %v4968_v10, %v4244_v9 }
 0x1a6   : > { %2141 = vmatpush.bf16.msra.mxu1 %v4245_v11  ;;  %v2159_v44 = vpop.f32.mrf.mxu2 }
 0x1aa   : > { %2142 = vmatpush.bf16.msra.mxu1 %v4233_v14 }
 0x1ae   : > { %2143 = vmatpush.bf16.msra.mxu1 %v4221_v17  ;;  %v2161_v47 = vpop.f32.mrf.mxu2 }
 0x1b1   : > { %2144 = vmatmul.bf16.vlgmr.msra.gmra.mxu1 %v5664_v5 }
 0x1b7   : > { %v2475_v19 = vpop.permute.xlu2 %2474 }
 0x1b8   : > { %v2480_v22 = vsel %vm2190_vm0, %v2475_v19, 0 }
 0x1cf   : > { %v2284_v20 = vpop.permute.xlu1 %2283 }
 0x1d0   : > { %v2289_v21 = vsel %vm2190_vm0, %v2284_v20, 0 }
 0x1d1   : > { %2298 = vmatpush.bf16.xpose.msrb.mxu0 %v2289_v21 }
 0x1d7   : > { %v2277_v23 = vpop.permute.xlu1 %2276 }
 0x1d8   : > { %4424 = vmatmul.msk.bf16.vlgmr.msrb.gmra.mxu0 %vm2190_vm0, %v2277_v23 }
 0x1d9   : > { %2489 = vmatpush.bf16.xpose.msra.mxu0 %v2480_v22 }
 0x1df   : > { %v2468_v25 = vpop.permute.xlu1 %2467 }
 0x1e7   : > { %v2658_v21 = vpop.permute.xlu1 %2657 }
 0x1e8   : > { %4452 = vmatmul.msk.bf16.vlgmr.msra.gmra.mxu0 %vm2190_vm0, %v2468_v25 }
 0x1e9   : > { %v2206_v26 = vpop.f32.mrf.mxu3 }
 0x1ea   : > { %v2207_v58 = vadd.f32 %v2206_v26, %v5708_v24 }
 0x1ec   : > { %v2212_v27 = vsel %vm2211_vm1, %v2207_v58, -inf }
 0x1ed   : > { %2213 = vmax.xlane.f32.xlu0 %v2212_v27 }
 0x1f1   : > { %v2208_v29 = vpop.f32.mrf.mxu3 }
 0x1f2   : > { %v2209_v30 = vadd.f32 %v2208_v29, %v5713_v28 }
 0x1f4   : > { %v2215_v31 = vsel %vm2211_vm1, %v2209_v30, -inf }
 0x1f5   : > { %2216 = vmax.xlane.f32.xlu0 %v2215_v31 }
 0x1f6   : > { %v5717_v32 = vpop.f32.mrf.mxu0 }
 0x1fe   : > { %v5719_v33 = vpop.f32.mrf.mxu0 }
 0x202   : > { %v2589_v57 = vpop.f32.mrf.mxu2 }
 0x22e   : > { %v2145_v45 = vpop.f32.mrf.mxu1 }
 0x22f   : > { %v2146_v46 = vadd.f32 %v2145_v45, %v5717_v32 }
 0x255   : > { %v2300_v34 = vpop.f32.mrf.mxu0 }
 0x256   : > { %v5722_v35 = vadd.f32 %v2300_v34, %v5708_v24 }
 0x258   : > { %v2305_v36 = vsel %vm2211_vm1, %v5722_v35, -inf }
 0x259   : > { %2306 = vmax.xlane.f32.xlu1 %v2305_v36  ;;  %v4441_v36 = vld [vmem:[#allocation2 + $0x1c] sm:$0xf] }
 0x25d   : > { %v2302_v38 = vpop.f32.mrf.mxu0 }
 0x25e   : > { %v2303_v19 = vadd.f32 %v2302_v38, %v5713_v28 }
 0x260   : > { %v2214_v37 = vpop.xlane.xlu0 %2213  ;;  %v2308_v20 = vsel %vm2211_vm1, %v2303_v19, -inf }
 0x261   : > { %v2218_v39 = vsub.f32 %v2207_v58, %v2214_v37  ;;  %v5015_v37 = vld [vmem:[#allocation2 + $0x3c] sm:$0xf0] }
 0x262   : > { %v4442_v38 = vor.u32 %v5015_v37, %v4441_v36  ;;  %v5018_v36 = vld [vmem:[#allocation2 + $0x3c] sm:$0xf0] }
 0x263   : > { %v2220_v40 = vmul.f32 1.442695, %v2218_v39 }
 0x265   : > { %5202 = vpow2.f32 %v2220_v40  ;;  %v2491_v49 = vpop.f32.mrf.mxu0 }
 0x266   : > { %v5731_v55 = vadd.f32 %v2491_v49, %v5708_v24 }
 0x268   : > { %v2217_v41 = vpop.xlane.xlu0 %2216  ;;  %v2496_v61 = vsel %vm2211_vm1, %v5731_v55, -inf }
 0x269   : > { %v2219_v42 = vsub.f32 %v2209_v30, %v2217_v41  ;;  %v5016_v41 = vld [vmem:[#allocation2 + $0x24] sm:$0xf0] }
 0x26b   : > { %v5726_v48 = vpop.eup %5202  ;;  %v2222_v50 = vmul.f32 1.442695, %v2219_v42  ;;  %v4432_v42 = vld [vmem:[#allocation2 + $0x4] sm:$0xf] }
 0x26c   : > { %v2224_v51 = vsel %vm2211_vm1, %v5726_v48, 0.0  ;;  %v4433_v43 = vor.u32 %v5016_v41, %v4432_v42 }
 0x26d   : > { %5204 = vpow2.f32 %v2222_v50  ;;  %2225 = vadd.xlane.f32.xlu2 %v2224_v51  ;;  %v2493_v63 = vpop.f32.mrf.mxu0  ;;  %v2147_v51 = vpop.f32.mrf.mxu1 }
 0x26e   : > { %v5737_v2 = vadd.f32 %v2493_v63, %v5713_v28  ;;  %v2148_v53 = vadd.f32 %v2147_v51, %v5719_v33  ;;  %v2591_v63 = vpop.f32.mrf.mxu2 }
 0x270   : > { %v2499_v4 = vsel %vm2211_vm1, %v5737_v2, -inf  ;;  %v2162_v56 = vadd.f32 %v2161_v47, %v2148_v53 }
 0x273   : > { %v5205_v60 = vpop.eup %5204 }
 0x274   : > { %v2227_v18 = vsel %vm2211_vm1, %v5205_v60, 0.0 }
 0x275   : > { %2497 = vmax.xlane.f32.xlu2 %v2496_v61  ;;  %2228 = vadd.xlane.f32.xlu0 %v2227_v18 }
 0x27d   : > { %2500 = vmax.xlane.f32.xlu2 %v2499_v4  ;;  %v5763_v4 = vadd.f32 %v2591_v63, %v5713_v28 }
 0x27f   : > { %v2597_v6 = vsel %vm2211_vm1, %v5763_v4, -inf }
 0x289   : > { %2664 = vrot.lane.b32.xlu0 %v4479_v8, %s5486_s24 }
 0x2b3   : > { %2309 = vmax.xlane.f32.xlu0 %v2308_v20 }
 0x2cc   : > { %v2307_v22 = vpop.xlane.xlu1 %2306 }
 0x2cd   : > { %v2311_v23 = vsub.f32 %v5722_v35, %v2307_v22 }
 0x2cf   : > { %v2313_v25 = vmul.f32 1.442695, %v2311_v23 }
 0x2d1   : > { %5206 = vpow2.f32 %v2313_v25  ;;  %v2590_v25 = vadd.f32 %v2589_v57, %v5708_v24 }
 0x2d7   : > { %v5746_v26 = vpop.eup %5206 }
 0x2d8   : > { %v2317_v58 = vsel %vm2211_vm1, %v5746_v26, 0.0 }
 0x2d9   : > { %2318 = vadd.xlane.f32.xlu1 %v2317_v58 }
 0x2e0   : > { %v2226_v27 = vpop.xlane.xlu2 %2225 }
 0x2e1   : > { %5208 = vrcp.f32 %v2226_v27 }
 0x2e7   : > { %v5209_v29 = vpop.eup %5208 }
 0x2e8   : > { %v2229_v5 = vpop.xlane.xlu0 %2228  ;;  %v2232_v31 = vmul.f32 %v5209_v29, %v5726_v48  ;;  %v2160_v48 = vadd.f32 %v2159_v44, %v2146_v46  ;;  %v2498_v50 = vpop.xlane.xlu2 %2497 }
 0x2e9   : > { %5210 = vrcp.f32 %v2229_v5  ;;  %v2502_v17 = vsub.f32 %v5731_v55, %v2498_v50  ;;  %v2594_v5 = vsel %vm2211_vm1, %v2590_v25, -inf }
 0x2ea   : > { %v2165_v49 = vpack.c.bf16 %v2160_v48, %v2160_v48 }
 0x2eb   : > { %v2504_v23 = vmul.f32 1.442695, %v2502_v17 }
 0x2ec   : > { %2169 = vst [vmem:[#allocation2 + $0x20] sm:$0xf] %v2165_v49 }
 0x2ef   : > { %v5211_v30 = vpop.eup %5210 }
 0x2f0   : > { %v2233_v34 = vmul.f32 %v5211_v30, %v5205_v60  ;;  %v2167_v60 = vpack.c.bf16 %v2162_v56, %v2162_v56  ;;  %v2501_v61 = vpop.xlane.xlu2 %2500 }
 0x2f1   : > { %v2503_v32 = vsub.f32 %v5737_v2, %v2501_v61 }
 0x2f2   : > { %v2234_v35 = vpack.c.bf16 %v2233_v34, %v2232_v31  ;;  %2171 = vst [vmem:[#allocation2 + $0x44] sm:$0xf] %v2167_v60  ;;  %v4427_v31 = vld [vmem:[#allocation2 + $0x18] sm:$0xf] }
 0x2f3   : > { %v4469_v0 = vld [vmem:[#allocation2 + $0x20] sm:$0xf]  ;;  %v2506_v3 = vmul.f32 1.442695, %v2503_v32 }
 0x2f4   : > { %4415 = vmatmul.msk.bf16.vlgmr.msrb.gmra.mxu3 %vm2211_vm1, %v2234_v35 }
 0x2f5   : > { %2443 = vmatpush.bf16.msrb.mxu3 %v4442_v38 }
 0x2f9   : > { %v5021_v1 = vld [vmem:[#allocation2 + $0x40] sm:$0xf0] }
 0x2fa   : > { %v4470_v33 = vor.u32 %v5021_v1, %v4469_v0 }
 0x2fb   : > { %v2665_v39 = vpop.permute.xlu0 %2664 }
 0x2fc   : > { %v2670_v40 = vsel %vm2190_vm0, %v2665_v39, 0 }
 0x2fd   : > { %2679 = vmatpush.bf16.xpose.msrb.mxu0 %v2670_v40 }
 0x304   : > { %4438 = vmatmul.msk.bf16.vlgmr.msra.gmra.mxu3 %vm2190_vm0, %v4433_v43  ;;  %4480 = vmatmul.msk.bf16.vlgmr.msrb.gmra.mxu0 %vm2190_vm0, %v2658_v21 }
 0x305   : > { %2633 = vmatpush.bf16.msra.mxu3 %v4470_v33 }
 0x326   : > { %v2310_v52 = vpop.xlane.xlu0 %2309 }
 0x327   : > { %v2312_v54 = vsub.f32 %v2303_v19, %v2310_v52 }
 0x329   : > { %v2315_v59 = vmul.f32 1.442695, %v2312_v54 }
 0x32b   : > { %5212 = vpow2.f32 %v2315_v59 }
 0x32c   : > { %5214 = vpow2.f32 %v2506_v3 }
 0x32d   : > { %5216 = vpow2.f32 %v2504_v23 }
 0x331   : > { %v5757_v18 = vpop.eup %5212 }
 0x332   : > { %v2320_v62 = vsel %vm2211_vm1, %v5757_v18, 0.0  ;;  %v5767_v7 = vpop.eup %5214 }
 0x333   : > { %2321 = vadd.xlane.f32.xlu0 %v2320_v62  ;;  %v2511_v2 = vsel %vm2211_vm1, %v5767_v7, 0.0  ;;  %v5787_v29 = vpop.eup %5216 }
 0x334   : > { %v2508_v30 = vsel %vm2211_vm1, %v5787_v29, 0.0 }
 0x33b   : > { %2598 = vmax.xlane.f32.xlu0 %v2597_v6 }
 0x343   : > { %2512 = vadd.xlane.f32.xlu0 %v2511_v2  ;;  %v4483_v2 = vld [vmem:[#allocation2 + $0x20] sm:$0xf] }
 0x34c   : > { %v2319_v35 = vpop.xlane.xlu1 %2318 }
 0x377   : > { %v2253_v8 = vpop.f32.mrf.mxu3 }
 0x378   : > { %v2258_v9 = vpack.c.bf16 %v2253_v8, %v2253_v8  ;;  %v5024_v8 = vld [vmem:[#allocation2 + $0x40] sm:$0xf0] }
 0x37a   : > { %2261 = vst.msk [vmem:[#allocation3] sm:$0xf] %vm2260_vm2, %v2258_v9  ;;  %v4484_v9 = vor.u32 %v5024_v8, %v4483_v2  ;;  %v4548_v8 = vld [vmem:[#allocation9 + $0x60] sm:$0xf] }
 0x37f   : > { %v2255_v10 = vpop.f32.mrf.mxu3 }
 0x380   : > { %v2259_v11 = vpack.c.bf16 %v2255_v10, %v2255_v10 }
 0x381   : > { %v2681_v12 = vpop.f32.mrf.mxu0 }
 0x382   : > { %2262 = vst.msk [vmem:[#allocation3 + $0xc] sm:$0xf] %vm2260_vm2, %v2259_v11  ;;  %v2682_v13 = vadd.f32 %v2681_v12, %v5708_v24 }
 0x384   : > { %v2686_v14 = vsel %vm2211_vm1, %v2682_v13, -inf }
 0x385   : > { %2687 = vmax.xlane.f32.xlu2 %v2686_v14 }
 0x387   : > { %v2399_v15 = vpop.f32.mrf.mxu3 }
 0x388   : > { %v2400_v16 = vadd.f32 %v2399_v15, %v5708_v24  ;;  %v5012_v24 = vld [vmem:[#allocation2 + $0x38] sm:$0xf0] }
 0x389   : > { %v2683_v19 = vpop.f32.mrf.mxu0  ;;  %v4428_v34 = vor.u32 %v5012_v24, %v4427_v31 }
 0x38a   : > { %v2684_v20 = vadd.f32 %v2683_v19, %v5713_v28  ;;  %v2404_v21 = vsel %vm2211_vm1, %v2400_v16, -inf }
 0x38b   : > { %2405 = vmax.xlane.f32.xlu1 %v2404_v21 }
 0x38c   : > { %v2689_v22 = vsel %vm2211_vm1, %v2684_v20, -inf }
 0x38d   : > { %2690 = vmax.xlane.f32.xlu2 %v2689_v22 }
 0x38f   : > { %v2401_v58 = vpop.f32.mrf.mxu3 }
 0x390   : > { %v5782_v27 = vadd.f32 %v2401_v58, %v5713_v28  ;;  %v4455_v28 = vld [vmem:[#allocation2 + $0x1c] sm:$0xf] }
 0x391   : > { %v4456_v37 = vor.u32 %v5018_v36, %v4455_v28 }
 0x392   : > { %v2407_v55 = vsel %vm2211_vm1, %v5782_v27, -inf }
 0x393   : > { %2595 = vmax.xlane.f32.xlu1 %v2594_v5 }
 0x395   : > { %2408 = vmax.xlane.f32.xlu2 %v2407_v55 }
 0x39b   : > { %2509 = vadd.xlane.f32.xlu1 %v2508_v30 }
 0x3a6   : > { %v2322_v41 = vpop.xlane.xlu0 %2321 }
 0x3ad   : > { %2333 = vrot.lane.b32.xlu2 %v4428_v34, %s5486_s24 }
 0x3ae   : > { %v2599_v52 = vpop.xlane.xlu0 %2598 }
 0x3af   : > { %v2601_v61 = vsub.f32 %v5763_v4, %v2599_v52  ;;  %v5051_v52 = vld [vmem:[#allocation9 + $0xb0] sm:$0xf0] }
 0x3b1   : > { %v2604_v0 = vmul.f32 1.442695, %v2601_v61 }
 0x3b4   : > { %2524 = vrot.lane.b32.xlu1 %v4456_v37, %s5486_s24 }
 0x3f8   : > { %v2688_v38 = vpop.xlane.xlu2 %2687 }
 0x3f9   : > { %v2692_v39 = vsub.f32 %v2682_v13, %v2688_v38 }
 0x3fb   : > { %v2694_v40 = vmul.f32 1.442695, %v2692_v39 }
 0x3fd   : > { %5218 = vpow2.f32 %v2694_v40 }
 0x3fe   : > { %v2406_v42 = vpop.xlane.xlu1 %2405 }
 0x3ff   : > { %v2410_v43 = vsub.f32 %v2400_v16, %v2406_v42 }
 0x400   : > { %v2691_v44 = vpop.xlane.xlu2 %2690 }
 0x401   : > { %v2412_v45 = vmul.f32 1.442695, %v2410_v43  ;;  %v2693_v46 = vsub.f32 %v2684_v20, %v2691_v44 }
 0x403   : > { %v5793_v47 = vpop.eup %5218  ;;  %5220 = vpow2.f32 %v2412_v45  ;;  %v2696_v48 = vmul.f32 1.442695, %v2693_v46 }
 0x404   : > { %5222 = vrcp.f32 %v2322_v41  ;;  %v2698_v49 = vsel %vm2211_vm1, %v5793_v47, 0.0 }
 0x405   : > { %5224 = vpow2.f32 %v2696_v48  ;;  %2699 = vadd.xlane.f32.xlu0 %v2698_v49 }
 0x406   : > { %v2596_v50 = vpop.xlane.xlu1 %2595  ;;  %5226 = vrcp.f32 %v2319_v35 }
 0x407   : > { %v2600_v51 = vsub.f32 %v2590_v25, %v2596_v50 }
 0x408   : > { %v2409_v53 = vpop.xlane.xlu2 %2408 }
 0x409   : > { %v5797_v54 = vpop.eup %5220  ;;  %v2602_v56 = vmul.f32 1.442695, %v2600_v51  ;;  %v2411_v19 = vsub.f32 %v5782_v27, %v2409_v53  ;;  %v4584_v51 = vld [vmem:[#allocation9 + $0xa8] sm:$0xf]  ;;  %v5050_v53 = vld [vmem:[#allocation9 + $0xac] sm:$0xf] }
 0x40a   : > { %v5223_v57 = vpop.eup %5222  ;;  %v2416_v59 = vsel %vm2211_vm1, %v5797_v54, 0.0 }
 0x40b   : > { %v5225_v60 = vpop.eup %5224  ;;  %5228 = vpow2.f32 %v2602_v56  ;;  %2417 = vadd.xlane.f32.xlu1 %v2416_v59  ;;  %v2326_v63 = vmul.f32 %v5223_v57, %v5757_v18  ;;  %v2414_v20 = vmul.f32 1.442695, %v2411_v19  ;;  %v4585_v57 = vor.u32 %v5051_v52, %v4584_v51  ;;  %v4586_v59 = vld [vmem:[#allocation9 + $0xb4] sm:$0xf0]  ;;  %v4524_v19 = vld [vmem:[#allocation9 + $0x30] sm:$0xf] }
 0x40c   : > { %v2701_v32 = vsel %vm2211_vm1, %v5225_v60, 0.0  ;;  %v5227_v62 = vpop.eup %5226  ;;  %5230 = vpow2.f32 %v2604_v0  ;;  %v4589_v61 = vor.u32 %v5050_v53, %v4586_v59  ;;  %v4676_v51 = vld [vmem:[#allocation9 + $0x158] sm:$0xf]  ;;  %v5073_v52 = vld [vmem:[#allocation9 + $0x160] sm:$0xf0] }
 0x40d   : > { %2702 = vadd.xlane.f32.xlu2 %v2701_v32  ;;  %v2325_v1 = vmul.f32 %v5227_v62, %v5746_v26  ;;  %v2513_v26 = vpop.xlane.xlu0 %2512  ;;  %v5047_v32 = vld [vmem:[#allocation9 + $0x94] sm:$0xf]  ;;  %v4574_v62 = vld [vmem:[#allocation9 + $0x9c] sm:$0xf0]  ;;  %3254 = vmatpush.bf16.msra.mxu2 %v4585_v57  ;;  %v4656_v57 = vld [vmem:[#allocation9 + $0x138] sm:$0xf] }
 0x40e   : > { %v2510_v10 = vpop.xlane.xlu1 %2509  ;;  %v4577_v0 = vor.u32 %v5047_v32, %v4574_v62  ;;  %v5069_v59 = vld [vmem:[#allocation9 + $0x140] sm:$0xf0]  ;;  %v5070_v32 = vld [vmem:[#allocation9 + $0x148] sm:$0xf0] }
 0x40f   : > { %v2327_v6 = vpack.c.bf16 %v2326_v63, %v2325_v1  ;;  %5232 = vrcp.f32 %v2510_v10  ;;  %v4560_v1 = vld [vmem:[#allocation9 + $0x78] sm:$0xf]  ;;  %v5041_v10 = vld [vmem:[#allocation9 + $0x64] sm:$0xf]  ;;  %v4657_v62 = vor.u32 %v5069_v59, %v4656_v57  ;;  %v4764_v57 = vld [vmem:[#allocation9 + $0x210] sm:$0xf] }
 0x410   : > { %v2334_v33 = vpop.permute.xlu2 %2333  ;;  %5234 = vrcp.f32 %v2513_v26 }
 0x411   : > { %v5805_v3 = vpop.eup %5228  ;;  %2346 = vmatpush.bf16.msrb.mxu1 %v2334_v33  ;;  %5236 = vpow2.f32 %v2414_v20  ;;  %v5045_v33 = vld [vmem:[#allocation9 + $0x80] sm:$0xf0]  ;;  %v5036_v20 = vld [vmem:[#allocation9 + $0x38] sm:$0xf0] }
 0x412   : > { %v2606_v4 = vsel %vm2211_vm1, %v5805_v3, 0.0  ;;  %v5231_v18 = vpop.eup %5230 }
 0x413   : > { %v2609_v11 = vsel %vm2211_vm1, %v5231_v18, 0.0 }
 0x414   : > { %4429 = vmatmul.msk.bf16.vlgmr.msrb.gmra.mxu1 %vm2211_vm1, %v2327_v6  ;;  %v4562_v6 = vld [vmem:[#allocation9 + $0x84] sm:$0xf0] }
 0x415   : > { %2607 = vadd.xlane.f32.xlu2 %v2606_v4  ;;  %v5233_v12 = vpop.eup %5232  ;;  %v4561_v4 = vor.u32 %v5045_v33, %v4560_v1 }
 0x416   : > { %v5235_v13 = vpop.eup %5234  ;;  %v2516_v14 = vmul.f32 %v5233_v12, %v5787_v29  ;;  %v4536_v12 = vld [vmem:[#allocation9 + $0x48] sm:$0xf] }
 0x417   : > { %v2517_v15 = vmul.f32 %v5235_v13, %v5767_v7  ;;  %v5237_v21 = vpop.eup %5236  ;;  %v5039_v13 = vld [vmem:[#allocation9 + $0x50] sm:$0xf0] }
 0x418   : > { %v2419_v22 = vsel %vm2211_vm1, %v5237_v21, 0.0 }
 0x419   : > { %2714 = vrot.lane.b32.xlu0 %v4484_v9, %s5486_s24  ;;  %v2518_v17 = vpack.c.bf16 %v2517_v15, %v2516_v14  ;;  %v5042_v9 = vld [vmem:[#allocation9 + $0x68] sm:$0xf0]  ;;  %v4538_v15 = vld [vmem:[#allocation9 + $0x54] sm:$0xf0] }
 0x41a   : > { %v4549_v26 = vor.u32 %v5042_v9, %v4548_v8  ;;  %v5038_v14 = vld [vmem:[#allocation9 + $0x4c] sm:$0xf] }
 0x41d   : > { %2610 = vadd.xlane.f32.xlu2 %v2609_v11 }
 0x426   : > { %v2525_v16 = vpop.permute.xlu1 %2524 }
 0x427   : > { %2537 = vmatpush.bf16.msra.mxu1 %v2525_v16  ;;  %v4537_v16 = vor.u32 %v5039_v13, %v4536_v12  ;;  %v4646_v12 = vld [vmem:[#allocation9 + $0x12c] sm:$0xf0]  ;;  %v4652_v13 = vld [vmem:[#allocation9 + $0x128] sm:$0xf] }
 0x42a   : > { %4457 = vmatmul.msk.bf16.vlgmr.msra.gmra.mxu1 %vm2211_vm1, %v2518_v17  ;;  %v4541_v17 = vor.u32 %v5038_v14, %v4538_v15  ;;  %v5067_v14 = vld [vmem:[#allocation9 + $0x130] sm:$0xf0] }
 0x443   : > { %2420 = vadd.xlane.f32.xlu0 %v2419_v22  ;;  %v4525_v22 = vor.u32 %v5036_v20, %v4524_v19  ;;  %v5063_v19 = vld [vmem:[#allocation9 + $0x110] sm:$0xf0]  ;;  %v5062_v20 = vld [vmem:[#allocation9 + $0x10c] sm:$0xf] }
 0x478   : > { %v2700_v23 = vpop.xlane.xlu0 %2699 }
 0x47e   : > { %v2418_v38 = vpop.xlane.xlu1 %2417 }
 0x480   : > { %v2703_v25 = vpop.xlane.xlu2 %2702 }
 0x481   : > { %5238 = vrcp.f32 %v2703_v25 }
 0x482   : > { %5240 = vrcp.f32 %v2700_v23  ;;  %v4526_v23 = vld [vmem:[#allocation9 + $0x3c] sm:$0xf0] }
 0x483   : > { %5242 = vrcp.f32 %v2418_v38  ;;  %v5075_v38 = vld [vmem:[#allocation9 + $0x170] sm:$0xf0] }
 0x487   : > { %v5239_v58 = vpop.eup %5238 }
 0x488   : > { %v5241_v5 = vpop.eup %5240  ;;  %v2707_v7 = vmul.f32 %v5239_v58, %v5225_v60  ;;  %v2608_v39 = vpop.xlane.xlu2 %2607  ;;  %v4572_v60 = vld [vmem:[#allocation9 + $0x90] sm:$0xf] }
 0x489   : > { %v2706_v55 = vmul.f32 %v5241_v5, %v5793_v47  ;;  %v5243_v41 = vpop.eup %5242  ;;  %v4512_v5 = vld [vmem:[#allocation9 + $0x18] sm:$0xf] }
 0x48a   : > { %v2424_v43 = vmul.f32 %v5243_v41, %v5797_v54  ;;  %v5048_v54 = vld [vmem:[#allocation9 + $0x98] sm:$0xf0]  ;;  %v4682_v41 = vld [vmem:[#allocation9 + $0x174] sm:$0xf0] }
 0x48b   : > { %v2715_v29 = vpop.permute.xlu0 %2714  ;;  %v2708_v30 = vpack.c.bf16 %v2707_v7, %v2706_v55  ;;  %v4573_v63 = vor.u32 %v5048_v54, %v4572_v60  ;;  %v5033_v7 = vld [vmem:[#allocation9 + $0x20] sm:$0xf0]  ;;  %v5068_v60 = vld [vmem:[#allocation9 + $0x13c] sm:$0xf]  ;;  %v4658_v54 = vld [vmem:[#allocation9 + $0x144] sm:$0xf0] }
 0x48c   : > { %2727 = vmatpush.bf16.msrb.mxu1 %v2715_v29  ;;  %v4513_v55 = vor.u32 %v5033_v7, %v4512_v5  ;;  %v5032_v29 = vld [vmem:[#allocation9 + $0x1c] sm:$0xf]  ;;  %v4620_v7 = vld [vmem:[#allocation9 + $0xf0] sm:$0xf] }
 0x48d   : > { %3255 = vmatpush.bf16.msra.mxu2 %v4573_v63  ;;  %v4661_v63 = vor.u32 %v5068_v60, %v4658_v54  ;;  %v5096_v60 = vld [vmem:[#allocation9 + $0x218] sm:$0xf0]  ;;  %v5098_v54 = vld [vmem:[#allocation9 + $0x22c] sm:$0xf] }
 0x48f   : > { %4485 = vmatmul.msk.bf16.vlgmr.msrb.gmra.mxu1 %vm2211_vm1, %v2708_v30  ;;  %v4514_v30 = vld [vmem:[#allocation9 + $0x24] sm:$0xf0] }
 0x490   : > { %v2611_v45 = vpop.xlane.xlu2 %2610  ;;  %3296 = vmatpush.bf16.msra.mxu1 %v4589_v61  ;;  %v4664_v61 = vld [vmem:[#allocation9 + $0x140] sm:$0xf] }
 0x491   : > { %v2348_v27 = vpop.f32.mrf.mxu1  ;;  %3256 = vmatpush.bf16.msra.mxu2 %v4561_v4 }
 0x492   : > { %v2353_v31 = vpack.c.bf16 %v2348_v27, %v2348_v27  ;;  %v4517_v27 = vor.u32 %v5032_v29, %v4514_v30  ;;  %v5059_v29 = vld [vmem:[#allocation9 + $0xf4] sm:$0xf] }
 0x494   : > { %2357 = vrot.lane.b32.xlu2 %v2353_v31, %s5486_s24  ;;  %3297 = vmatpush.bf16.msra.mxu1 %v4577_v0  ;;  %v4500_v31 = vld [vmem:[#allocation9] sm:$0xf]  ;;  %v4665_v0 = vor.u32 %v5070_v32, %v4664_v61  ;;  %v4765_v61 = vor.u32 %v5096_v60, %v4764_v57  ;;  %v4778_v32 = vld [vmem:[#allocation9 + $0x234] sm:$0xf0]  ;;  %v4736_v60 = vld [vmem:[#allocation9 + $0x1d0] sm:$0xf] }
 0x495   : > { %3257 = vmatpush.bf16.msra.mxu2 %v4549_v26  ;;  %v5065_v26 = vld [vmem:[#allocation9 + $0x124] sm:$0xf] }
 0x496   : > { %v4649_v15 = vor.u32 %v5065_v26, %v4646_v12  ;;  %v5092_v12 = vld [vmem:[#allocation9 + $0x1fc] sm:$0xf] }
 0x499   : > { %v2350_v24 = vpop.f32.mrf.mxu1  ;;  %3258 = vmatpush.bf16.msra.mxu2 %v4537_v16  ;;  %v4653_v16 = vor.u32 %v5067_v14, %v4652_v13  ;;  %v4754_v14 = vld [vmem:[#allocation9 + $0x204] sm:$0xf0] }
 0x49a   : > { %v2354_v34 = vpack.c.bf16 %v2350_v24, %v2350_v24  ;;  %v5030_v24 = vld [vmem:[#allocation9 + $0x8] sm:$0xf0] }
 0x49c   : > { %2359 = vrot.lane.b32.xlu1 %v2354_v34, %s5486_s24  ;;  %v5029_v34 = vld [vmem:[#allocation9 + $0x4] sm:$0xf] }
 0x49d   : > { %3259 = vmatpush.bf16.msra.mxu2 %v4525_v22  ;;  %v4634_v22 = vld [vmem:[#allocation9 + $0x114] sm:$0xf0] }
 0x4a1   : > { %3260 = vmatpush.bf16.msra.mxu2 %v4513_v55  ;;  %v5060_v55 = vld [vmem:[#allocation9 + $0xf8] sm:$0xf0] }
 0x4a2   : > { %v4621_v30 = vor.u32 %v5060_v55, %v4620_v7  ;;  %v5087_v7 = vld [vmem:[#allocation9 + $0x1d0] sm:$0xf0] }
 0x4a7   : > { %v2539_v28 = vpop.f32.mrf.mxu1 }
 0x4a8   : > { %v2544_v36 = vpack.c.bf16 %v2539_v28, %v2539_v28  ;;  %v4501_v28 = vor.u32 %v5030_v24, %v4500_v31  ;;  %v4628_v31 = vld [vmem:[#allocation9 + $0xf8] sm:$0xf]  ;;  %v5061_v24 = vld [vmem:[#allocation9 + $0x100] sm:$0xf0] }
 0x4aa   : > { %2548 = vrot.lane.b32.xlu0 %v2544_v36, %s5486_s24  ;;  %v4502_v36 = vld [vmem:[#allocation9 + $0xc] sm:$0xf0]  ;;  %3261 = vmatpush.bf16.msra.mxu2 %v4501_v28  ;;  %v4629_v28 = vor.u32 %v5061_v24, %v4628_v31 }
 0x4ab   : > { %v4716_v24 = vld [vmem:[#allocation9 + $0x1b0] sm:$0xf] }
 0x4af   : > { %v2541_v37 = vpop.f32.mrf.mxu1 }
 0x4b0   : > { %v2545_v35 = vpack.c.bf16 %v2541_v37, %v2541_v37  ;;  %v4505_v37 = vor.u32 %v5029_v34, %v4502_v36  ;;  %v4608_v36 = vld [vmem:[#allocation9 + $0xd8] sm:$0xf] }
 0x4b2   : > { %2550 = vrot.lane.b32.xlu2 %v2545_v35, %s5486_s24  ;;  %v4680_v35 = vld [vmem:[#allocation9 + $0x168] sm:$0xf] }
 0x4b6   : > { %v2421_v40 = vpop.xlane.xlu0 %2420 }
 0x4b7   : > { %5244 = vrcp.f32 %v2421_v40  ;;  %v4681_v40 = vor.u32 %v5075_v38, %v4680_v35  ;;  %v5056_v35 = vld [vmem:[#allocation9 + $0xdc] sm:$0xf] }
 0x4b8   : > { %5246 = vrcp.f32 %v2611_v45 }
 0x4b9   : > { %5248 = vrcp.f32 %v2608_v39  ;;  %v5074_v39 = vld [vmem:[#allocation9 + $0x16c] sm:$0xf] }
 0x4bd   : > { %v5245_v42 = vpop.eup %5244 }
 0x4be   : > { %v2425_v44 = vmul.f32 %v5245_v42, %v5237_v21  ;;  %v5247_v47 = vpop.eup %5246  ;;  %v5035_v21 = vld [vmem:[#allocation9 + $0x34] sm:$0xf]  ;;  %v4688_v42 = vld [vmem:[#allocation9 + $0x170] sm:$0xf] }
 0x4bf   : > { %v5249_v48 = vpop.eup %5248  ;;  %v2615_v49 = vmul.f32 %v5247_v47, %v5231_v18  ;;  %v4550_v18 = vld [vmem:[#allocation9 + $0x6c] sm:$0xf0]  ;;  %v4529_v58 = vor.u32 %v5035_v21, %v4526_v23  ;;  %v5072_v47 = vld [vmem:[#allocation9 + $0x158] sm:$0xf0] }
 0x4c0   : > { %v2426_v46 = vpack.c.bf16 %v2425_v44, %v2424_v43  ;;  %v2614_v50 = vmul.f32 %v5249_v48, %v5805_v3  ;;  %v5044_v3 = vld [vmem:[#allocation9 + $0x7c] sm:$0xf]  ;;  %v4553_v11 = vor.u32 %v5041_v10, %v4550_v18  ;;  %v4685_v44 = vor.u32 %v5074_v39, %v4682_v41  ;;  %v5071_v48 = vld [vmem:[#allocation9 + $0x154] sm:$0xf]  ;;  %v4644_v10 = vld [vmem:[#allocation9 + $0x120] sm:$0xf] }
 0x4c1   : > { %v4565_v2 = vor.u32 %v5044_v3, %v4562_v6  ;;  %v5076_v43 = vld [vmem:[#allocation9 + $0x178] sm:$0xf0]  ;;  %v5066_v18 = vld [vmem:[#allocation9 + $0x128] sm:$0xf0]  ;;  %v4640_v23 = vld [vmem:[#allocation9 + $0x110] sm:$0xf] }
 0x4c2   : > { %4443 = vmatmul.msk.bf16.vlgmr.msrb.gmra.mxu3 %vm2211_vm1, %v2426_v46  ;;  %v2616_v56 = vpack.c.bf16 %v2615_v49, %v2614_v50  ;;  %v4689_v45 = vor.u32 %v5076_v43, %v4688_v42  ;;  %v4668_v46 = vld [vmem:[#allocation9 + $0x150] sm:$0xf]  ;;  %v4670_v50 = vld [vmem:[#allocation9 + $0x15c] sm:$0xf0]  ;;  %3310 = vmatpush.bf16.msrb.mxu2 %v4685_v44  ;;  %v4610_v39 = vld [vmem:[#allocation9 + $0xe4] sm:$0xf0] }
 0x4c3   : > { %3298 = vmatpush.bf16.msra.mxu1 %v4565_v2  ;;  %3268 = vmatpush.bf16.msrb.mxu3 %v4681_v40  ;;  %v4669_v49 = vor.u32 %v5072_v47, %v4668_v46  ;;  %v4673_v53 = vor.u32 %v5071_v48, %v4670_v50  ;;  %v4616_v40 = vld [vmem:[#allocation9 + $0xe0] sm:$0xf]  ;;  %v5058_v41 = vld [vmem:[#allocation9 + $0xe8] sm:$0xf0]  ;;  %v4613_v42 = vor.u32 %v5056_v35, %v4610_v39  ;;  %v5053_v46 = vld [vmem:[#allocation9 + $0xc4] sm:$0xf] }
 0x4c4   : > { %v4617_v43 = vor.u32 %v5058_v41, %v4616_v40  ;;  %v4596_v44 = vld [vmem:[#allocation9 + $0xc0] sm:$0xf]  ;;  %v4598_v48 = vld [vmem:[#allocation9 + $0xcc] sm:$0xf0]  ;;  %v5055_v50 = vld [vmem:[#allocation9 + $0xd0] sm:$0xf0] }
 0x4c5   : > { %v5081_v35 = vld [vmem:[#allocation9 + $0x1a0] sm:$0xf0] }
 0x4c6   : > { %3311 = vmatpush.bf16.msrb.mxu2 %v4673_v53  ;;  %v4776_v53 = vld [vmem:[#allocation9 + $0x228] sm:$0xf] }
 0x4c7   : > { %3299 = vmatpush.bf16.msra.mxu1 %v4553_v11  ;;  %3269 = vmatpush.bf16.msrb.mxu3 %v4669_v49  ;;  %v4645_v11 = vor.u32 %v5066_v18, %v4644_v10  ;;  %v4604_v49 = vld [vmem:[#allocation9 + $0xc8] sm:$0xf]  ;;  %v5097_v10 = vld [vmem:[#allocation9 + $0x220] sm:$0xf0] }
 0x4ca   : > { %3312 = vmatpush.bf16.msrb.mxu2 %v4661_v63  ;;  %v5100_v63 = vld [vmem:[#allocation9 + $0x238] sm:$0xf0] }
 0x4cb   : > { %3300 = vmatpush.bf16.msra.mxu1 %v4541_v17  ;;  %3270 = vmatpush.bf16.msrb.mxu3 %v4657_v62  ;;  %v4632_v17 = vld [vmem:[#allocation9 + $0x108] sm:$0xf]  ;;  %v4784_v62 = vld [vmem:[#allocation9 + $0x230] sm:$0xf] }
 0x4cc   : > { %v4633_v21 = vor.u32 %v5063_v19, %v4632_v17  ;;  %v4740_v19 = vld [vmem:[#allocation9 + $0x1e0] sm:$0xf] }
 0x4ce   : > { %3313 = vmatpush.bf16.msrb.mxu2 %v4649_v15  ;;  %v4760_v15 = vld [vmem:[#allocation9 + $0x200] sm:$0xf] }
 0x4cf   : > { %3301 = vmatpush.bf16.msra.mxu1 %v4529_v58  ;;  %3271 = vmatpush.bf16.msrb.mxu3 %v4645_v11  ;;  %v4637_v58 = vor.u32 %v5062_v20, %v4634_v22  ;;  %v5090_v20 = vld [vmem:[#allocation9 + $0x1e8] sm:$0xf0] }
 0x4d2   : > { %4471 = vmatmul.msk.bf16.vlgmr.msra.gmra.mxu3 %vm2211_vm1, %v2616_v56  ;;  %v4677_v56 = vor.u32 %v5073_v52, %v4676_v51  ;;  %3314 = vmatpush.bf16.msrb.mxu2 %v4637_v58  ;;  %v4601_v51 = vor.u32 %v5053_v46, %v4598_v48  ;;  %v4605_v52 = vor.u32 %v5055_v50, %v4604_v49  ;;  %v5091_v58 = vld [vmem:[#allocation9 + $0x1f0] sm:$0xf0]  ;;  %v4742_v46 = vld [vmem:[#allocation9 + $0x1ec] sm:$0xf0]  ;;  %v4692_v48 = vld [vmem:[#allocation9 + $0x180] sm:$0xf] }
 0x4d3   : > { %3302 = vmatpush.bf16.msra.mxu1 %v4517_v27  ;;  %3272 = vmatpush.bf16.msrb.mxu3 %v4633_v21  ;;  %v4622_v27 = vld [vmem:[#allocation9 + $0xfc] sm:$0xf0]  ;;  %v4757_v21 = vor.u32 %v5092_v12, %v4754_v14  ;;  %v5078_v49 = vld [vmem:[#allocation9 + $0x188] sm:$0xf0] }
 0x4d4   : > { %v4625_v34 = vor.u32 %v5059_v29, %v4622_v27  ;;  %v5086_v50 = vld [vmem:[#allocation9 + $0x1cc] sm:$0xf] }
 0x4d5   : > { %v5082_v12 = vld [vmem:[#allocation9 + $0x1a8] sm:$0xf0] }
 0x4d6   : > { %3315 = vmatpush.bf16.msrb.mxu2 %v4625_v34  ;;  %v5084_v34 = vld [vmem:[#allocation9 + $0x1b8] sm:$0xf0] }
 0x4d7   : > { %3303 = vmatpush.bf16.msra.mxu1 %v4505_v37  ;;  %3273 = vmatpush.bf16.msrb.mxu3 %v4621_v30  ;;  %v5057_v37 = vld [vmem:[#allocation9 + $0xe0] sm:$0xf0] }
 0x4d8   : > { %v4609_v38 = vor.u32 %v5057_v37, %v4608_v36  ;;  %v4704_v37 = vld [vmem:[#allocation9 + $0x198] sm:$0xf] }
 0x4d9   : > { %v4705_v41 = vor.u32 %v5081_v35, %v4704_v37 }
 0x4da   : > { %3316 = vmatpush.bf16.msrb.mxu2 %v4613_v42 }
 0x4db   : > { %3352 = vmatpush.bf16.msrb.mxu1 %v4689_v45  ;;  %3274 = vmatpush.bf16.msrb.mxu3 %v4609_v38  ;;  %v5054_v45 = vld [vmem:[#allocation9 + $0xc8] sm:$0xf0] }
 0x4dc   : > { %v4597_v47 = vor.u32 %v5054_v45, %v4596_v44  ;;  %v5089_v45 = vld [vmem:[#allocation9 + $0x1e4] sm:$0xf] }
 0x4de   : > { %3317 = vmatpush.bf16.msrb.mxu2 %v4601_v51  ;;  %v4693_v51 = vor.u32 %v5078_v49, %v4692_v48 }
 0x4df   : > { %3353 = vmatpush.bf16.msrb.mxu1 %v4677_v56  ;;  %3275 = vmatpush.bf16.msrb.mxu3 %v4597_v47  ;;  %v5099_v56 = vld [vmem:[#allocation9 + $0x230] sm:$0xf0]  ;;  %v4745_v47 = vor.u32 %v5089_v45, %v4742_v46 }
 0x4e0   : > { %v4777_v59 = vor.u32 %v5099_v56, %v4776_v53  ;;  %v4592_v53 = vld [vmem:[#allocation9 + $0xb0] sm:$0xf]  ;;  %v5052_v56 = vld [vmem:[#allocation9 + $0xb8] sm:$0xf0] }
 0x4e2   : > { %3282 = vmatpush.bf16.msra.mxu0 %v4777_v59  ;;  %v4593_v59 = vor.u32 %v5052_v56, %v4592_v53 }
 0x4e3   : > { %3354 = vmatpush.bf16.msrb.mxu1 %v4665_v0  ;;  %v4752_v0 = vld [vmem:[#allocation9 + $0x1f8] sm:$0xf] }
 0x4e6   : > { %3283 = vmatpush.bf16.msra.mxu0 %v4765_v61  ;;  %v5083_v61 = vld [vmem:[#allocation9 + $0x1b4] sm:$0xf] }
 0x4e7   : > { %3355 = vmatpush.bf16.msrb.mxu1 %v4653_v16  ;;  %v5094_v16 = vld [vmem:[#allocation9 + $0x208] sm:$0xf0] }
 0x4e8   : > { %v4761_v22 = vor.u32 %v5094_v16, %v4760_v15  ;;  %v5077_v15 = vld [vmem:[#allocation9 + $0x184] sm:$0xf]  ;;  %v4694_v16 = vld [vmem:[#allocation9 + $0x18c] sm:$0xf0] }
 0x4ee   : > { %v2358_v25 = vpop.permute.xlu2 %2357 }
 0x4ef   : > { %2364 = vst.msk [vmem:[#allocation3] sm:$0xf] %vm2363_vm3, %v2358_v25  ;;  %v5064_v25 = vld [vmem:[#allocation9 + $0x118] sm:$0xf0] }
 0x4f0   : > { %v4641_v5 = vor.u32 %v5064_v25, %v4640_v23  ;;  %v4741_v23 = vor.u32 %v5090_v20, %v4740_v19  ;;  %v4748_v25 = vld [vmem:[#allocation9 + $0x1e8] sm:$0xf]  ;;  %v5043_v19 = vld [vmem:[#allocation9 + $0x70] sm:$0xf0] }
 0x4f1   : > { %v4749_v30 = vor.u32 %v5091_v58, %v4748_v25  ;;  %v4700_v20 = vld [vmem:[#allocation9 + $0x188] sm:$0xf]  ;;  %v4544_v58 = vld [vmem:[#allocation9 + $0x50] sm:$0xf] }
 0x4f2   : > { %3356 = vmatpush.bf16.msrb.mxu1 %v4641_v5  ;;  %v4728_v5 = vld [vmem:[#allocation9 + $0x1c8] sm:$0xf] }
 0x4f3   : > { %v4729_v27 = vor.u32 %v5087_v7, %v4728_v5  ;;  %v5040_v5 = vld [vmem:[#allocation9 + $0x58] sm:$0xf0] }
 0x4f4   : > { %v4545_v7 = vor.u32 %v5040_v5, %v4544_v58 }
 0x4f6   : > { %v4488_v2 = vld [vmem:[#allocation3] sm:$0xf]  ;;  %3357 = vmatpush.bf16.msrb.mxu1 %v4629_v28  ;;  %v4717_v28 = vor.u32 %v5084_v34, %v4716_v24  ;;  %v4508_v34 = vld [vmem:[#allocation9 + $0x8] sm:$0xf] }
 0x4fa   : > { %3358 = vmatpush.bf16.msrb.mxu1 %v4617_v43 }
 0x4fe   : > { %3359 = vmatpush.bf16.msrb.mxu1 %v4605_v52  ;;  %v4730_v52 = vld [vmem:[#allocation9 + $0x1d4] sm:$0xf0] }
 0x4ff   : > { %v4733_v57 = vor.u32 %v5086_v50, %v4730_v52 }
 0x50c   : > { %v2729_v1 = vpop.f32.mrf.mxu1  ;;  %v2551_v31 = vpop.permute.xlu2 %2550 }
 0x50d   : > { %v2734_v33 = vpack.c.bf16 %v2729_v1, %v2729_v1  ;;  %v5093_v1 = vld [vmem:[#allocation9 + $0x200] sm:$0xf0] }
 0x50e   : > { %v2360_v3 = vpop.permute.xlu1 %2359  ;;  %v4753_v13 = vor.u32 %v5093_v1, %v4752_v0  ;;  %v5049_v0 = vld [vmem:[#allocation9 + $0xa0] sm:$0xf0] }
 0x50f   : > { %2365 = vst.msk [vmem:[#allocation3 + $0xc] sm:$0xf] %vm2363_vm3, %v2360_v3  ;;  %2738 = vrot.lane.b32.xlu1 %v2734_v33, %s5486_s24  ;;  %v4781_v33 = vor.u32 %v5098_v54, %v4778_v32  ;;  %v4785_v3 = vor.u32 %v5100_v63, %v4784_v62  ;;  %v5088_v54 = vld [vmem:[#allocation9 + $0x1d8] sm:$0xf0]  ;;  %v4718_v62 = vld [vmem:[#allocation9 + $0x1bc] sm:$0xf0] }
 0x510   : > { %3284 = vmatpush.bf16.msra.mxu0 %v4753_v13  ;;  %v4737_v32 = vor.u32 %v5088_v54, %v4736_v60  ;;  %v4580_v63 = vld [vmem:[#allocation9 + $0x98] sm:$0xf]  ;;  %v4721_v1 = vor.u32 %v5083_v61, %v4718_v62 }
 0x511   : > { %3324 = vmatpush.bf16.msra.mxu3 %v4781_v33  ;;  %v4581_v33 = vor.u32 %v5049_v0, %v4580_v63 }
 0x514   : > { %v2731_v6 = vpop.f32.mrf.mxu1  ;;  %3285 = vmatpush.bf16.msra.mxu0 %v4741_v23 }
 0x515   : > { %v2735_v4 = vpack.c.bf16 %v2731_v6, %v2731_v6  ;;  %v5095_v6 = vld [vmem:[#allocation9 + $0x214] sm:$0xf] }
 0x516   : > { %v5027_v8 = vld [vmem:[#allocation3 + $0x8] sm:$0xf0] }
 0x517   : > { %2740 = vrot.lane.b32.xlu0 %v2735_v4, %s5486_s24  ;;  %v5831_v9 = vor.u32 %v5027_v8, %v4488_v2  ;;  %v4766_v2 = vld [vmem:[#allocation9 + $0x21c] sm:$0xf0]  ;;  %v4772_v8 = vld [vmem:[#allocation9 + $0x218] sm:$0xf] }
 0x518   : > { %v4769_v26 = vor.u32 %v5095_v6, %v4766_v2  ;;  %v4773_v11 = vor.u32 %v5097_v10, %v4772_v8  ;;  %3286 = vmatpush.bf16.msra.mxu0 %v4729_v27  ;;  %v5085_v6 = vld [vmem:[#allocation9 + $0x1c0] sm:$0xf0]  ;;  %v5080_v2 = vld [vmem:[#allocation9 + $0x19c] sm:$0xf]  ;;  %v4706_v8 = vld [vmem:[#allocation9 + $0x1a4] sm:$0xf0] }
 0x519   : > { %3262 = vmatmul.bf16.vlgmr.msra.gmra.mxu2 %v5831_v9  ;;  %3304 = vmatmul.bf16.vlgmr.msra.gmra.mxu1 %v5831_v9  ;;  %v4568_v10 = vld [vmem:[#allocation9 + $0x80] sm:$0xf] }
 0x51a   : > { %3366 = vmatpush.bf16.msra.mxu2 %v4785_v3  ;;  %3325 = vmatpush.bf16.msra.mxu3 %v4769_v26  ;;  %v4724_v3 = vld [vmem:[#allocation9 + $0x1b8] sm:$0xf]  ;;  %v5046_v26 = vld [vmem:[#allocation9 + $0x88] sm:$0xf0]  ;;  %v4520_v27 = vld [vmem:[#allocation9 + $0x20] sm:$0xf] }
 0x51b   : > { %v4569_v13 = vor.u32 %v5046_v26, %v4568_v10 }
 0x51c   : > { %v2549_v17 = vpop.permute.xlu0 %2548  ;;  %3287 = vmatpush.bf16.msra.mxu0 %v4717_v28  ;;  %v5031_v28 = vld [vmem:[#allocation9 + $0x10] sm:$0xf0] }
 0x51e   : > { %3367 = vmatpush.bf16.msra.mxu2 %v4773_v11  ;;  %3326 = vmatpush.bf16.msra.mxu3 %v4757_v21  ;;  %v4712_v11 = vld [vmem:[#allocation9 + $0x1a0] sm:$0xf]  ;;  %v5079_v21 = vld [vmem:[#allocation9 + $0x190] sm:$0xf0] }
 0x51f   : > { %v4713_v14 = vor.u32 %v5082_v12, %v4712_v11  ;;  %v4701_v25 = vor.u32 %v5079_v21, %v4700_v20 }
 0x520   : > { %3288 = vmatpush.bf16.msra.mxu0 %v4705_v41 }
 0x522   : > { %3368 = vmatpush.bf16.msra.mxu2 %v4761_v22  ;;  %3327 = vmatpush.bf16.msra.mxu3 %v4745_v47  ;;  %v4697_v22 = vor.u32 %v5077_v15, %v4694_v16 }
 0x524   : > { %3289 = vmatpush.bf16.msra.mxu0 %v4693_v51 }
 0x526   : > { %3369 = vmatpush.bf16.msra.mxu2 %v4749_v30  ;;  %3328 = vmatpush.bf16.msra.mxu3 %v4733_v57 }
 0x528   : > { %3338 = vmatpush.bf16.msrb.mxu0 %v4593_v59 }
 0x52a   : > { %3370 = vmatpush.bf16.msra.mxu2 %v4737_v32  ;;  %3329 = vmatpush.bf16.msra.mxu3 %v4721_v1 }
 0x52c   : > { %3339 = vmatpush.bf16.msrb.mxu0 %v4581_v33 }
 0x530   : > { %3340 = vmatpush.bf16.msrb.mxu0 %v4569_v13 }
 0x545   : > { %v2445_v4 = vpop.f32.mrf.mxu3 }
 0x546   : > { %v2450_v18 = vpack.c.bf16 %v2445_v4, %v2445_v4  ;;  %v4725_v4 = vor.u32 %v5085_v6, %v4724_v3 }
 0x548   : > { %2452 = vst.msk [vmem:[#allocation3 + $0x4] sm:$0xf] %vm2260_vm2, %v2450_v18  ;;  %3371 = vmatpush.bf16.msra.mxu2 %v4725_v4  ;;  %v4709_v18 = vor.u32 %v5080_v2, %v4706_v8 }
 0x549   : > { %2554 = vst.msk [vmem:[#allocation3 + $0x4] sm:$0xf] %vm2363_vm3, %v2549_v17  ;;  %v4556_v17 = vld [vmem:[#allocation9 + $0x68] sm:$0xf] }
 0x54a   : > { %3330 = vmatpush.bf16.msra.mxu3 %v4709_v18  ;;  %v4557_v23 = vor.u32 %v5043_v19, %v4556_v17 }
 0x54c   : > { %3372 = vmatpush.bf16.msra.mxu2 %v4713_v14  ;;  %3341 = vmatpush.bf16.msrb.mxu0 %v4557_v23 }
 0x54d   : > { %v2447_v55 = vpop.f32.mrf.mxu3 }
 0x54e   : > { %v2451_v29 = vpack.c.bf16 %v2447_v55, %v2447_v55  ;;  %3331 = vmatpush.bf16.msra.mxu3 %v4697_v22  ;;  %v4532_v55 = vld [vmem:[#allocation9 + $0x38] sm:$0xf] }
 0x550   : > { %2453 = vst.msk [vmem:[#allocation3 + $0x10] sm:$0xf] %vm2260_vm2, %v2451_v29  ;;  %v5026_v39 = vld [vmem:[#allocation3 + $0x4] sm:$0xf]  ;;  %3373 = vmatpush.bf16.msra.mxu2 %v4701_v25  ;;  %3342 = vmatpush.bf16.msrb.mxu0 %v4545_v7  ;;  %v5037_v29 = vld [vmem:[#allocation9 + $0x40] sm:$0xf0] }
 0x551   : > { %2555 = vst.msk [vmem:[#allocation3 + $0x10] sm:$0xf] %vm2363_vm3, %v2551_v31  ;;  %v4533_v30 = vor.u32 %v5037_v29, %v4532_v55  ;;  %v5034_v31 = vld [vmem:[#allocation9 + $0x28] sm:$0xf0] }
 0x552   : > { %v4521_v24 = vor.u32 %v5034_v31, %v4520_v27 }
 0x554   : > { %3343 = vmatpush.bf16.msrb.mxu0 %v4533_v30 }
 0x555   : > { %v2635_v36 = vpop.f32.mrf.mxu3 }
 0x556   : > { %v2640_v38 = vpack.c.bf16 %v2635_v36, %v2635_v36  ;;  %v4509_v36 = vor.u32 %v5031_v28, %v4508_v34 }
 0x558   : > { %2642 = vst.msk [vmem:[#allocation3 + $0x8] sm:$0xf] %vm2260_vm2, %v2640_v38  ;;  %v4490_v40 = vld [vmem:[#allocation3 + $0xc] sm:$0xf0]  ;;  %3344 = vmatpush.bf16.msrb.mxu0 %v4521_v24 }
 0x559   : > { %v4493_v42 = vor.u32 %v5026_v39, %v4490_v40 }
 0x55b   : > { %3276 = vmatmul.bf16.vlgmr.msrb.gmra.mxu3 %v4493_v42  ;;  %3318 = vmatmul.bf16.vlgmr.msrb.gmra.mxu2 %v4493_v42 }
 0x55c   : > { %3360 = vmatmul.bf16.vlgmr.msrb.gmra.mxu1 %v4493_v42  ;;  %3345 = vmatpush.bf16.msrb.mxu0 %v4509_v36 }
 0x55d   : > { %v2637_v43 = vpop.f32.mrf.mxu3 }
 0x55e   : > { %v2641_v44 = vpack.c.bf16 %v2637_v43, %v2637_v43  ;;  %v2846_v43 = vld [vmem:[#allocation10] sm:$0x7] }
 0x55f   : > { %v2848_v45 = vperm.slane %v2846_v43, 0  ;;  %v2849_v49 = vperm.slane %v2846_v43, 1  ;;  %v2850_v33 = vperm.slane %v2846_v43, 2 }
 0x560   : > { %2643 = vst.msk [vmem:[#allocation3 + $0x14] sm:$0xf] %vm2260_vm2, %v2641_v44 }
 0x581   : > { %v2739_v37 = vpop.permute.xlu1 %2738 }
 0x582   : > { %2744 = vst.msk [vmem:[#allocation3 + $0x8] sm:$0xf] %vm2363_vm3, %v2739_v37 }
 0x589   : > { %v2741_v35 = vpop.permute.xlu0 %2740  ;;  %v4496_v38 = vld [vmem:[#allocation3 + $0x8] sm:$0xf] }
 0x58a   : > { %2745 = vst.msk [vmem:[#allocation3 + $0x14] sm:$0xf] %vm2363_vm3, %v2741_v35 }
 0x591   : > { %v5028_v39 = vld [vmem:[#allocation3 + $0x10] sm:$0xf0] }
 0x592   : > { %v4497_v40 = vor.u32 %v5028_v39, %v4496_v38 }
 0x594   : > { %3290 = vmatmul.bf16.vlgmr.msra.gmra.mxu0 %v4497_v40  ;;  %3332 = vmatmul.bf16.vlgmr.msra.gmra.mxu3 %v4497_v40 }
 0x595   : > { %3374 = vmatmul.bf16.vlgmr.msra.gmra.mxu2 %v4497_v40 }
 0x596   : > { %v3305_v47 = vpop.f32.mrf.mxu1 }
 0x597   : > { %v3306_v56 = vadd.f32 %v3305_v47, %v2849_v49 }
 0x59c   : > { %v3263_v41 = vpop.f32.mrf.mxu2 }
 0x59d   : > { %v3264_v46 = vadd.f32 %v3263_v41, %v2848_v45 }
 0x59e   : > { %v3307_v61 = vpop.f32.mrf.mxu1 }
 0x59f   : > { %v3308_v0 = vadd.f32 %v3307_v61, %v2849_v49 }
 0x5a4   : > { %3346 = vmatmul.bf16.vlgmr.msrb.gmra.mxu0 %v5831_v9  ;;  %v3265_v44 = vpop.f32.mrf.mxu2 }
 0x5a5   : > { %v3266_v9 = vadd.f32 %v3265_v44, %v2848_v45 }
 0x5d9   : > { %v3361_v4 = vpop.f32.mrf.mxu1 }
 0x5de   : > { %v3277_v42 = vpop.f32.mrf.mxu3  ;;  %v3319_v51 = vpop.f32.mrf.mxu2 }
 0x5df   : > { %v3278_v50 = vadd.f32 %v3277_v42, %v3264_v46  ;;  %v3320_v57 = vadd.f32 %v3319_v51, %v3306_v56 }
 0x5e1   : > { %v3363_v13 = vpop.f32.mrf.mxu1 }
 0x5e6   : > { %v3279_v48 = vpop.f32.mrf.mxu3  ;;  %v3321_v63 = vpop.f32.mrf.mxu2 }
 0x5e7   : > { %v3280_v60 = vadd.f32 %v3279_v48, %v3266_v9  ;;  %v3322_v1 = vadd.f32 %v3321_v63, %v3308_v0 }
 0x611   : > { %v3291_v52 = vpop.f32.mrf.mxu0 }
 0x612   : > { %v3292_v53 = vadd.f32 %v3291_v52, %v3278_v50 }
 0x614   : > { %3380 = vst [vmem:[%s5845_s27] sm:$0xff] %v3292_v53 }
 0x617   : > { %v3333_v59 = vpop.f32.mrf.mxu3 }
 0x618   : > { %v3334_v54 = vadd.f32 %v3333_v59, %v3320_v57  ;;  %v3375_v10 = vpop.f32.mrf.mxu2 }
 0x619   : > { %v3293_v32 = vpop.f32.mrf.mxu0 }
 0x61a   : > { %3381 = vst [vmem:[%s5845_s27 + $0x8] sm:$0xff] %v3334_v54  ;;  %v3294_v62 = vadd.f32 %v3293_v32, %v3280_v60 }
 0x61c   : > { %3383 = vst [vmem:[%s5845_s27 + $0x18] sm:$0xff] %v3294_v62 }
 0x61f   : > { %v3335_v3 = vpop.f32.mrf.mxu3 }
 0x620   : > { %v3336_v6 = vadd.f32 %v3335_v3, %v3322_v1  ;;  %v3377_v15 = vpop.f32.mrf.mxu2 }
 0x621   : > { %v3347_v2 = vpop.f32.mrf.mxu0 }
 0x622   : > { %3384 = vst [vmem:[%s5845_s27 + $0x20] sm:$0xff] %v3336_v6  ;;  %v3348_v8 = vadd.f32 %v3347_v2, %v2850_v33 }
 0x624   : > { %v3362_v18 = vadd.f32 %v3361_v4, %v3348_v8 }
 0x626   : > { %v3376_v26 = vadd.f32 %v3375_v10, %v3362_v18 }
 0x628   : > { %3382 = vst [vmem:[%s5845_s27 + $0x10] sm:$0xff] %v3376_v26 }
 0x629   : > { %v3349_v11 = vpop.f32.mrf.mxu0 }
 0x62a   : > { %v3350_v12 = vadd.f32 %v3349_v11, %v2850_v33 }
 0x62c   : > { %v3364_v14 = vadd.f32 %v3363_v13, %v3350_v12 }
 0x62e   : > { %v3378_v16 = vadd.f32 %v3377_v15, %v3364_v14 }
 0x630   : > { %3385 = vst [vmem:[%s5845_s27 + $0x28] sm:$0xff] %v3378_v16 }
 0x631   : > { %5427 = shalt.err (!%p5424_p10)
}
 0x632   : > { %s5487_s1 = smov 384   ;;  %s5488_s24 = smov 24  }
 0x633   : > { %5124 = dma.vmem_to_hbm [thread:$0]  (%p5609_p5), %s3400_s15, 768, %s3402_s30, %s3387_s22, %s5487_s1, %s5487_s1, %s5488_s24  }
 0x634 PF: > { %s3416_s29 = sand.u32 1, %s5462_s18   ;;  %p5905_p12 = scmp.ge.s32.totalorder %s5474_s21, 2 }
 0x635   : > { %s3417_s27 = scalar_lea.sflag [#allocation6], %s3416_s29 }
 0x636   : > { %p5144_p13 = pnand %p5905_p12, %p5554_p6 }
 0x638   : > { %p5145_p0 = pneg %p5144_p13 }
 0x63a   : > { %5457 = dma.done.wait (%p5145_p0), %s3417_s27, 768  }
 0x63b   : > { %5459 = vsyncadd (%p5145_p0), %s3417_s27, 4294966528  ;;  %p20_p3 = scmp.ge.s32.totalorder %s5596_s13, 4   ;;  %s5906_s18 = smov %s5466_s19 }
 0x63c   : > { %s5907_s19 = smov %s5470_s20  ;;  %s5908_s20 = smov %s5605_s16 }
 0x63d   : > { %s5909_s21 = smov %s5596_s13  ;;  %22 = sbr.rel (!%p20_p3) target bundleno = 9 (0x9), region = 101 }
 0x642   :  { %3423 = vsyncpa [#allocation5], 1 }
 0x643   :  { %3425 = vsyncpa [#allocation5 + $0x1], 1 }
 0x644   :  { %3426 = vsyncpa [#allocation8], 1 }
 0x645   :  { %3427 = vsyncpa [#allocation11], 1 }
 0x646   :  { %3428 = vsyncpa [#allocation6], 1 }
 0x647   :  { %3430 = vsyncpa [#allocation6 + $0x1], 1 }

</bundles_post_ra>
